<compile_context>
chip_gen: v7x
topology: tpu7x:2x2x1
jax: 0.10.0
libtpu: 0.0.40
codegen_flags: <defaults>
</compile_context>

<pallas_src>
import jax
import jax.numpy as jnp
from jax.experimental import pallas as pl
from jax.experimental.pallas import tpu as pltpu


# ---------------------------------------------------------------------------
# Pallas kernel (single invocation, in-kernel time loop)
# ---------------------------------------------------------------------------
def _make_kernel(seq_l, S, Nn, C, H):
    H3 = 3 * H
    H6 = 6 * H

    def kernel(x_seq, a_s2n_seq, a_n2s_seq,
               w_c, b_c, w_h, b_h, w_i, b_i,
               h0, hi0, mc0,
               out_ref):
        # ---- hoisted: load weights once, broadcast biases once (outside the loop) ----
        W_c = w_c[...]                                  # (C+H,   6H)  center GRU
        W_h = w_h[...]                                  # (C+2H,  6H)  local_rnn_hiden
        W_i = w_i[...]                                  # (C+H,   6H)  local_rnn_input
        b_c_full = jnp.broadcast_to(b_c[...], (Nn, H6))
        b_h_full = jnp.broadcast_to(b_h[...], (S, H6))
        b_i_full = jnp.broadcast_to(b_i[...], (S, H6))

        def gru(lhs, h_prev, W, b_full):
            # lhs = concat([input, h_prev]); W = blockdiag(W_ih^T, W_hh^T)
            # -> g[:, :3H] = gi, g[:, 3H:] = gh.  PyTorch GRUCell gate order: r, z, n.
            g = jnp.dot(lhs, W, preferred_element_type=jnp.float32) + b_full
            gi = g[:, :H3]
            gh = g[:, H3:]
            r = jax.nn.sigmoid(gi[:, :H] + gh[:, :H])
            z = jax.nn.sigmoid(gi[:, H:2 * H] + gh[:, H:2 * H])
            n = jnp.tanh(gi[:, 2 * H:] + r * gh[:, 2 * H:])
            return (1.0 - z) * n + z * h_prev

        # ---- initial carries (vreg-resident through the fori_loop) ----
        h = jnp.broadcast_to(h0[...], (S, H))
        hi = jnp.broadcast_to(hi0[...], (S, H))
        mc = jnp.broadcast_to(mc0[...], (Nn, H))
        m = jnp.zeros((S, C + H), jnp.float32)

        def step(t, carry):
            h, hi, mc, m = carry
            x = x_seq[t]                                                        # (S, C)
            a_s2n = a_s2n_seq[t]                                                # (Nn, S)
            a_n2s = a_n2s_seq[t]                                                # (S, Nn)

            # stock -> news propagation (mean aggregation) as dense matmul.
            cm = jnp.dot(a_s2n, x, preferred_element_type=jnp.float32)          # (Nn, C)

            # center GRU: m_c = GRU(cm, m_c)   (single fused gi/gh matmul)
            mc = gru(jnp.concatenate([cm, mc], axis=-1), mc, W_c, b_c_full)      # (Nn, H)

            # news -> stock propagation of cat([cm, m_c]) -- single fused matmul.
            cm_cat = jnp.concatenate([cm, mc], axis=-1)                          # (Nn, C+H)
            m = jnp.dot(a_n2s, cm_cat, preferred_element_type=jnp.float32)       # (S, C+H)

            # local_rnn_hiden: h = GRU(m, h)
            h = gru(jnp.concatenate([m, h], axis=-1), h, W_h, b_h_full)          # (S, H)

            # local_rnn_input: h_input = GRU(x, h_input)
            hi = gru(jnp.concatenate([x, hi], axis=-1), hi, W_i, b_i_full)       # (S, H)
            return (h, hi, mc, m)

        h, hi, mc, m = jax.lax.fori_loop(0, seq_l, step, (h, hi, mc, m),
                                         unroll=True)

        # single packed store, once per kernel: [m | h | h_input] -> (S, C + 3H)
        out_ref[...] = jnp.concatenate([m, h, hi], axis=-1)

    return kernel


# ---------------------------------------------------------------------------
# Wrapper
# ---------------------------------------------------------------------------
def gcnn_rnn_hidden(inputs, a_s2n, a_n2s, params, hidden_channel):
    """inputs: (seq_l, stocks_len, C); a_s2n: (seq_l, news_len, stocks_len);
    a_n2s: (seq_l, stocks_len, news_len). Returns (m, h, h_input)."""
    seq_l, S, C = inputs.shape
    Nn = a_s2n.shape[1]
    H = hidden_channel

    def blockdiag(w_ih_t, w_hh_t):
        # (in, 3H) x (H, 3H) -> (in+H, 6H) so that concat([x, h]) @ W = [gi | gh]
        top = jnp.concatenate(
            [w_ih_t, jnp.zeros((w_ih_t.shape[0], w_hh_t.shape[1]), jnp.float32)], axis=1)
        bot = jnp.concatenate(
            [jnp.zeros((w_hh_t.shape[0], w_ih_t.shape[1]), jnp.float32), w_hh_t], axis=1)
        return jnp.concatenate([top, bot], axis=0)

    # fused GRU weights / biases (built once, outside the kernel)
    wh_ih_t = jnp.concatenate([params["wh_ih_x"], params["wh_ih_m"]], axis=0)   # (C+H, 3H)
    w_c = blockdiag(params["wc_ih"], params["wc_hh"])                           # (C+H,  6H)
    w_h = blockdiag(wh_ih_t, params["wh_hh"])                                   # (C+2H, 6H)
    w_i = blockdiag(params["wi_ih"], params["wi_hh"])                           # (C+H,  6H)
    b_c = jnp.concatenate([params["bc_ih"], params["bc_hh"]], axis=-1)          # (1, 6H)
    b_h = jnp.concatenate([params["bh_ih"], params["bh_hh"]], axis=-1)          # (1, 6H)
    b_i = jnp.concatenate([params["bi_ih"], params["bi_hh"]], axis=-1)          # (1, 6H)

    args = (inputs, a_s2n, a_n2s, w_c, b_c, w_h, b_h, w_i, b_i,
            params["h0"], params["hi0"], params["mc0"])

    # No grid: every operand is a whole-array VMEM block (they total a few tens of KB);
    # the time loop runs inside the kernel.
    vmem_spec = lambda: pl.BlockSpec(memory_space=pltpu.MemorySpace.VMEM)
    packed = pl.pallas_call(
        _make_kernel(seq_l, S, Nn, C, H),
        out_shape=jax.ShapeDtypeStruct((S, C + 3 * H), jnp.float32),
        in_specs=[vmem_spec() for _ in args],
        out_specs=vmem_spec(),
    )(*args)

    m = packed[:, :C + H]
    h = packed[:, C + H:C + 2 * H]
    h_input = packed[:, C + 2 * H:]
    return m, h, h_input


# ---------------------------------------------------------------------------
# Glue: dense adjacency (mean aggregation) from edge_index, deterministic params
# ---------------------------------------------------------------------------
def build_mean_adj(src, dst, num_src, num_dst):
    """Row-normalized dense adjacency A[dst, src] implementing scatter-mean at dst."""
    src_oh = jax.nn.one_hot(src, num_src, dtype=jnp.float32)   # (E, num_src)
    dst_oh = jax.nn.one_hot(dst, num_dst, dtype=jnp.float32)   # (E, num_dst)
    counts = dst_oh.T @ src_oh                                 # (num_dst, num_src)
    deg = counts.sum(axis=-1, keepdims=True)
    return counts / jnp.maximum(deg, 1.0)


def init_gru_params(key, in_dim, H):
    k1, k2, k3, k4 = jax.random.split(key, 4)
    bound = 1.0 / float(H) ** 0.5
    w_ih = jax.random.uniform(k1, (3 * H, in_dim), jnp.float32, -bound, bound)
    w_hh = jax.random.uniform(k2, (3 * H, H), jnp.float32, -bound, bound)
    b_ih = jax.random.uniform(k3, (3 * H,), jnp.float32, -bound, bound)
    b_hh = jax.random.uniform(k4, (3 * H,), jnp.float32, -bound, bound)
    # transpose so that gi = x @ W_ih^T is a plain matmul; biases as (1, 3H) rows
    return w_ih.T, w_hh.T, b_ih.reshape(1, -1), b_hh.reshape(1, -1)


def ref_forward(inputs, a_s2n, a_n2s, p, H):
    """Pure-JAX reference of the PyTorch forward (mean-aggr SimpleConv + GRUCells)."""
    seq_l, S, _ = inputs.shape
    Nn = a_s2n.shape[1]

    def gru(x, h, w_ih, w_hh, b_ih, b_hh):
        gi = x @ w_ih + b_ih
        gh = h @ w_hh + b_hh
        r = jax.nn.sigmoid(gi[:, :H] + gh[:, :H])
        z = jax.nn.sigmoid(gi[:, H:2 * H] + gh[:, H:2 * H])
        n = jnp.tanh(gi[:, 2 * H:] + r * gh[:, 2 * H:])
        return (1.0 - z) * n + z * h

    wh_ih = jnp.concatenate([p["wh_ih_x"], p["wh_ih_m"]], axis=0)
    h = jnp.broadcast_to(p["h0"], (S, H))
    hi = jnp.broadcast_to(p["hi0"], (S, H))
    mc = jnp.broadcast_to(p["mc0"], (Nn, H))
    m = None
    for t in range(seq_l):
        x = inputs[t]
        cm = a_s2n[t] @ x
        mc = gru(cm, mc, p["wc_ih"], p["wc_hh"], p["bc_ih"], p["bc_hh"])
        m = a_n2s[t] @ jnp.concatenate([cm, mc], axis=-1)
        h = gru(m, h, wh_ih, p["wh_hh"], p["bh_ih"], p["bh_hh"])
        hi = gru(x, hi, p["wi_ih"], p["wi_hh"], p["bi_ih"], p["bi_hh"])
    return m, h, hi


# ---------------------------------------------------------------------------
# Main
# ---------------------------------------------------------------------------
if __name__ == "__main__":
    key = jax.random.PRNGKey(0)

    num_stocks, num_news, batch = 8, 4, 2
    seq_l, C, H, E = 8, 4, 32, 24
    S = num_stocks * batch      # stocks_len = 16
    Nn = num_news * batch       # news_len   = 8

    ks = jax.random.split(key, 10)

    inputs = jax.random.normal(ks[0], (seq_l, S, C), jnp.float32)
    # edge_index[t] follows PyG bipartite convention: row 0 -> src (news), row 1 -> dst (stocks)
    e_src = jax.random.randint(ks[1], (seq_l, E), 0, Nn)
    e_dst = jax.random.randint(ks[2], (seq_l, E), 0, S)
    edge_index = jnp.stack([e_src, e_dst], axis=1)            # (seq_l, 2, E)

    # dense mean-aggregation adjacency matrices per timestep
    a_n2s = jnp.stack([build_mean_adj(edge_index[t, 0], edge_index[t, 1], Nn, S)
                       for t in range(seq_l)])                # (seq_l, S, Nn)   news -> stocks
    a_s2n = jnp.stack([build_mean_adj(edge_index[t, 1], edge_index[t, 0], S, Nn)
                       for t in range(seq_l)])                # (seq_l, Nn, S)   stocks -> news

    # deterministic parameters (matching nn.GRUCell shapes / init ranges)
    wc_ih, wc_hh, bc_ih, bc_hh = init_gru_params(ks[3], C, H)            # center_layer
    wh_ih_full, wh_hh, bh_ih, bh_hh = init_gru_params(ks[4], C + H, H)   # local_rnn_hiden
    wi_ih, wi_hh, bi_ih, bi_hh = init_gru_params(ks[5], C, H)            # local_rnn_input
    params = {
        "wc_ih": wc_ih, "wc_hh": wc_hh, "bc_ih": bc_ih, "bc_hh": bc_hh,
        "wh_ih_x": wh_ih_full[:C, :], "wh_ih_m": wh_ih_full[C:, :],
        "wh_hh": wh_hh, "bh_ih": bh_ih, "bh_hh": bh_hh,
        "wi_ih": wi_ih, "wi_hh": wi_hh, "bi_ih": bi_ih, "bi_hh": bi_hh,
        "h0": jax.random.uniform(ks[6], (1, H), jnp.float32, -1.0, 1.0),
        "hi0": jax.random.uniform(ks[7], (1, H), jnp.float32, -1.0, 1.0),
        "mc0": jax.random.uniform(ks[8], (1, H), jnp.float32, -1.0, 1.0),
    }

    m, h, h_input = gcnn_rnn_hidden(inputs, a_s2n, a_n2s, params, H)
    jax.block_until_ready((m, h, h_input))

    m_ref, h_ref, hi_ref = ref_forward(inputs, a_s2n, a_n2s, params, H)
    assert m.shape == (S, C + H) and h.shape == (S, H) and h_input.shape == (S, H)
    assert jnp.allclose(m, m_ref, rtol=1e-2, atol=1e-2)
    assert jnp.allclose(h, h_ref, rtol=1e-2, atol=1e-2)
    assert jnp.allclose(h_input, hi_ref, rtol=1e-2, atol=1e-2)

    print("KERNEL_OK")
</pallas_src>

<mosaic_0001>
module attributes {stable_mosaic.version = 11 : i64} {
  func.func @kernel(%arg0: memref<8x16x4xf32, #tpu.memory_space<vmem>>, %arg1: memref<8x8x16xf32, #tpu.memory_space<vmem>>, %arg2: memref<8x16x8xf32, #tpu.memory_space<vmem>>, %arg3: memref<36x192xf32, #tpu.memory_space<vmem>>, %arg4: memref<1x192xf32, #tpu.memory_space<vmem>>, %arg5: memref<68x192xf32, #tpu.memory_space<vmem>>, %arg6: memref<1x192xf32, #tpu.memory_space<vmem>>, %arg7: memref<36x192xf32, #tpu.memory_space<vmem>>, %arg8: memref<1x192xf32, #tpu.memory_space<vmem>>, %arg9: memref<1x32xf32, #tpu.memory_space<vmem>>, %arg10: memref<1x32xf32, #tpu.memory_space<vmem>>, %arg11: memref<1x32xf32, #tpu.memory_space<vmem>>, %arg12: memref<16x100xf32, #tpu.memory_space<vmem>>) attributes {dimension_semantics = [], scalar_prefetch = 0 : i64, scratch_operands = 0 : i64, tpu.core_type = #tpu.core_type<tc>} {
    %c0 = arith.constant 0 : index
    %c0_0 = arith.constant 0 : index
    %0 = vector.load %arg3[%c0, %c0_0] : memref<36x192xf32, #tpu.memory_space<vmem>>, vector<36x192xf32>
    %c0_1 = arith.constant 0 : index
    %c0_2 = arith.constant 0 : index
    %1 = vector.load %arg5[%c0_1, %c0_2] : memref<68x192xf32, #tpu.memory_space<vmem>>, vector<68x192xf32>
    %c0_3 = arith.constant 0 : index
    %c0_4 = arith.constant 0 : index
    %2 = vector.load %arg7[%c0_3, %c0_4] : memref<36x192xf32, #tpu.memory_space<vmem>>, vector<36x192xf32>
    %c0_5 = arith.constant 0 : index
    %c0_6 = arith.constant 0 : index
    %3 = vector.load %arg4[%c0_5, %c0_6] : memref<1x192xf32, #tpu.memory_space<vmem>>, vector<1x192xf32>
    %4 = vector.shape_cast %3 : vector<1x192xf32> to vector<1x192xf32>
    %5 = vector.broadcast %4 : vector<1x192xf32> to vector<8x192xf32>
    %c0_7 = arith.constant 0 : index
    %c0_8 = arith.constant 0 : index
    %6 = vector.load %arg6[%c0_7, %c0_8] : memref<1x192xf32, #tpu.memory_space<vmem>>, vector<1x192xf32>
    %7 = vector.shape_cast %6 : vector<1x192xf32> to vector<1x192xf32>
    %8 = vector.broadcast %7 : vector<1x192xf32> to vector<16x192xf32>
    %c0_9 = arith.constant 0 : index
    %c0_10 = arith.constant 0 : index
    %9 = vector.load %arg8[%c0_9, %c0_10] : memref<1x192xf32, #tpu.memory_space<vmem>>, vector<1x192xf32>
    %10 = vector.shape_cast %9 : vector<1x192xf32> to vector<1x192xf32>
    %11 = vector.broadcast %10 : vector<1x192xf32> to vector<16x192xf32>
    %c0_11 = arith.constant 0 : index
    %c0_12 = arith.constant 0 : index
    %12 = vector.load %arg9[%c0_11, %c0_12] : memref<1x32xf32, #tpu.memory_space<vmem>>, vector<1x32xf32>
    %13 = vector.shape_cast %12 : vector<1x32xf32> to vector<1x32xf32>
    %14 = vector.broadcast %13 : vector<1x32xf32> to vector<16x32xf32>
    %c0_13 = arith.constant 0 : index
    %c0_14 = arith.constant 0 : index
    %15 = vector.load %arg10[%c0_13, %c0_14] : memref<1x32xf32, #tpu.memory_space<vmem>>, vector<1x32xf32>
    %16 = vector.shape_cast %15 : vector<1x32xf32> to vector<1x32xf32>
    %17 = vector.broadcast %16 : vector<1x32xf32> to vector<16x32xf32>
    %c0_15 = arith.constant 0 : index
    %c0_16 = arith.constant 0 : index
    %18 = vector.load %arg11[%c0_15, %c0_16] : memref<1x32xf32, #tpu.memory_space<vmem>>, vector<1x32xf32>
    %19 = vector.shape_cast %18 : vector<1x32xf32> to vector<1x32xf32>
    %20 = vector.broadcast %19 : vector<1x32xf32> to vector<8x32xf32>
    %cst = arith.constant 0.000000e+00 : f32
    %21 = vector.broadcast %cst : f32 to vector<16x36xf32>
    %c0_i32 = arith.constant 0 : i32
    %22 = arith.index_cast %c0_i32 : i32 to index
    %c0_17 = arith.constant 0 : index
    %c0_18 = arith.constant 0 : index
    %23 = vector.load %arg0[%22, %c0_17, %c0_18] : memref<8x16x4xf32, #tpu.memory_space<vmem>>, vector<1x16x4xf32>
    %24 = vector.shape_cast %23 : vector<1x16x4xf32> to vector<16x4xf32>
    %25 = arith.index_cast %c0_i32 : i32 to index
    %c0_19 = arith.constant 0 : index
    %c0_20 = arith.constant 0 : index
    %26 = vector.load %arg1[%25, %c0_19, %c0_20] : memref<8x8x16xf32, #tpu.memory_space<vmem>>, vector<1x8x16xf32>
    %27 = vector.shape_cast %26 : vector<1x8x16xf32> to vector<8x16xf32>
    %28 = arith.index_cast %c0_i32 : i32 to index
    %c0_21 = arith.constant 0 : index
    %c0_22 = arith.constant 0 : index
    %29 = vector.load %arg2[%28, %c0_21, %c0_22] : memref<8x16x8xf32, #tpu.memory_space<vmem>>, vector<1x16x8xf32>
    %30 = vector.shape_cast %29 : vector<1x16x8xf32> to vector<16x8xf32>
    %cst_23 = arith.constant dense<0.000000e+00> : vector<8x4xf32>
    %31 = tpu.matmul %27, %24, %cst_23 {dimension_numbers = #tpu.dot_dimension_numbers<[1], [0], [0], [1], [0, 0, 1, 1], [], []>} : vector<8x16xf32>, vector<16x4xf32>, vector<8x4xf32> -> vector<8x4xf32>
    %32 = tpu.concatenate %31, %20 in 1 : vector<8x4xf32>, vector<8x32xf32> -> vector<8x36xf32>
    %cst_24 = arith.constant dense<0.000000e+00> : vector<8x192xf32>
    %33 = tpu.matmul %32, %0, %cst_24 {dimension_numbers = #tpu.dot_dimension_numbers<[1], [0], [0], [1], [0, 0, 1, 1], [], []>} : vector<8x36xf32>, vector<36x192xf32>, vector<8x192xf32> -> vector<8x192xf32>
    %34 = arith.addf %33, %5 : vector<8x192xf32>
    %35 = vector.extract_strided_slice %34 {offsets = [0, 0], sizes = [8, 96], strides = [1, 1]} : vector<8x192xf32> to vector<8x96xf32>
    %36 = vector.extract_strided_slice %34 {offsets = [0, 96], sizes = [8, 96], strides = [1, 1]} : vector<8x192xf32> to vector<8x96xf32>
    %37 = vector.extract_strided_slice %35 {offsets = [0, 0], sizes = [8, 32], strides = [1, 1]} : vector<8x96xf32> to vector<8x32xf32>
    %38 = vector.extract_strided_slice %36 {offsets = [0, 0], sizes = [8, 32], strides = [1, 1]} : vector<8x96xf32> to vector<8x32xf32>
    %39 = arith.addf %37, %38 : vector<8x32xf32>
    %40 = arith.negf %39 : vector<8x32xf32>
    %41 = math.exp %40 : vector<8x32xf32>
    %cst_25 = arith.constant 1.000000e+00 : f32
    %42 = vector.broadcast %cst_25 : f32 to vector<8x32xf32>
    %43 = arith.addf %42, %41 : vector<8x32xf32>
    %44 = arith.divf %42, %43 : vector<8x32xf32>
    %45 = vector.extract_strided_slice %35 {offsets = [0, 32], sizes = [8, 32], strides = [1, 1]} : vector<8x96xf32> to vector<8x32xf32>
    %46 = vector.extract_strided_slice %36 {offsets = [0, 32], sizes = [8, 32], strides = [1, 1]} : vector<8x96xf32> to vector<8x32xf32>
    %47 = arith.addf %45, %46 : vector<8x32xf32>
    %48 = arith.negf %47 : vector<8x32xf32>
    %49 = math.exp %48 : vector<8x32xf32>
    %cst_26 = arith.constant 1.000000e+00 : f32
    %50 = vector.broadcast %cst_26 : f32 to vector<8x32xf32>
    %51 = arith.addf %50, %49 : vector<8x32xf32>
    %52 = arith.divf %50, %51 : vector<8x32xf32>
    %53 = vector.extract_strided_slice %35 {offsets = [0, 64], sizes = [8, 32], strides = [1, 1]} : vector<8x96xf32> to vector<8x32xf32>
    %54 = vector.extract_strided_slice %36 {offsets = [0, 64], sizes = [8, 32], strides = [1, 1]} : vector<8x96xf32> to vector<8x32xf32>
    %55 = arith.mulf %44, %54 : vector<8x32xf32>
    %56 = arith.addf %53, %55 : vector<8x32xf32>
    %57 = math.tanh %56 : vector<8x32xf32>
    %cst_27 = arith.constant 1.000000e+00 : f32
    %58 = vector.broadcast %cst_27 : f32 to vector<8x32xf32>
    %59 = arith.subf %58, %52 : vector<8x32xf32>
    %60 = arith.mulf %59, %57 : vector<8x32xf32>
    %61 = arith.mulf %52, %20 : vector<8x32xf32>
    %62 = arith.addf %60, %61 : vector<8x32xf32>
    %63 = tpu.concatenate %31, %62 in 1 : vector<8x4xf32>, vector<8x32xf32> -> vector<8x36xf32>
    %cst_28 = arith.constant dense<0.000000e+00> : vector<16x36xf32>
    %64 = tpu.matmul %30, %63, %cst_28 {dimension_numbers = #tpu.dot_dimension_numbers<[1], [0], [0], [1], [0, 0, 1, 1], [], []>} : vector<16x8xf32>, vector<8x36xf32>, vector<16x36xf32> -> vector<16x36xf32>
    %65 = tpu.concatenate %64, %14 in 1 : vector<16x36xf32>, vector<16x32xf32> -> vector<16x68xf32>
    %cst_29 = arith.constant dense<0.000000e+00> : vector<16x192xf32>
    %66 = tpu.matmul %65, %1, %cst_29 {dimension_numbers = #tpu.dot_dimension_numbers<[1], [0], [0], [1], [0, 0, 1, 1], [], []>} : vector<16x68xf32>, vector<68x192xf32>, vector<16x192xf32> -> vector<16x192xf32>
    %67 = arith.addf %66, %8 : vector<16x192xf32>
    %68 = vector.extract_strided_slice %67 {offsets = [0, 0], sizes = [16, 96], strides = [1, 1]} : vector<16x192xf32> to vector<16x96xf32>
    %69 = vector.extract_strided_slice %67 {offsets = [0, 96], sizes = [16, 96], strides = [1, 1]} : vector<16x192xf32> to vector<16x96xf32>
    %70 = vector.extract_strided_slice %68 {offsets = [0, 0], sizes = [16, 32], strides = [1, 1]} : vector<16x96xf32> to vector<16x32xf32>
    %71 = vector.extract_strided_slice %69 {offsets = [0, 0], sizes = [16, 32], strides = [1, 1]} : vector<16x96xf32> to vector<16x32xf32>
    %72 = arith.addf %70, %71 : vector<16x32xf32>
    %73 = arith.negf %72 : vector<16x32xf32>
    %74 = math.exp %73 : vector<16x32xf32>
    %cst_30 = arith.constant 1.000000e+00 : f32
    %75 = vector.broadcast %cst_30 : f32 to vector<16x32xf32>
    %76 = arith.addf %75, %74 : vector<16x32xf32>
    %77 = arith.divf %75, %76 : vector<16x32xf32>
    %78 = vector.extract_strided_slice %68 {offsets = [0, 32], sizes = [16, 32], strides = [1, 1]} : vector<16x96xf32> to vector<16x32xf32>
    %79 = vector.extract_strided_slice %69 {offsets = [0, 32], sizes = [16, 32], strides = [1, 1]} : vector<16x96xf32> to vector<16x32xf32>
    %80 = arith.addf %78, %79 : vector<16x32xf32>
    %81 = arith.negf %80 : vector<16x32xf32>
    %82 = math.exp %81 : vector<16x32xf32>
    %cst_31 = arith.constant 1.000000e+00 : f32
    %83 = vector.broadcast %cst_31 : f32 to vector<16x32xf32>
    %84 = arith.addf %83, %82 : vector<16x32xf32>
    %85 = arith.divf %83, %84 : vector<16x32xf32>
    %86 = vector.extract_strided_slice %68 {offsets = [0, 64], sizes = [16, 32], strides = [1, 1]} : vector<16x96xf32> to vector<16x32xf32>
    %87 = vector.extract_strided_slice %69 {offsets = [0, 64], sizes = [16, 32], strides = [1, 1]} : vector<16x96xf32> to vector<16x32xf32>
    %88 = arith.mulf %77, %87 : vector<16x32xf32>
    %89 = arith.addf %86, %88 : vector<16x32xf32>
    %90 = math.tanh %89 : vector<16x32xf32>
    %cst_32 = arith.constant 1.000000e+00 : f32
    %91 = vector.broadcast %cst_32 : f32 to vector<16x32xf32>
    %92 = arith.subf %91, %85 : vector<16x32xf32>
    %93 = arith.mulf %92, %90 : vector<16x32xf32>
    %94 = arith.mulf %85, %14 : vector<16x32xf32>
    %95 = arith.addf %93, %94 : vector<16x32xf32>
    %96 = tpu.concatenate %24, %17 in 1 : vector<16x4xf32>, vector<16x32xf32> -> vector<16x36xf32>
    %cst_33 = arith.constant dense<0.000000e+00> : vector<16x192xf32>
    %97 = tpu.matmul %96, %2, %cst_33 {dimension_numbers = #tpu.dot_dimension_numbers<[1], [0], [0], [1], [0, 0, 1, 1], [], []>} : vector<16x36xf32>, vector<36x192xf32>, vector<16x192xf32> -> vector<16x192xf32>
    %98 = arith.addf %97, %11 : vector<16x192xf32>
    %99 = vector.extract_strided_slice %98 {offsets = [0, 0], sizes = [16, 96], strides = [1, 1]} : vector<16x192xf32> to vector<16x96xf32>
    %100 = vector.extract_strided_slice %98 {offsets = [0, 96], sizes = [16, 96], strides = [1, 1]} : vector<16x192xf32> to vector<16x96xf32>
    %101 = vector.extract_strided_slice %99 {offsets = [0, 0], sizes = [16, 32], strides = [1, 1]} : vector<16x96xf32> to vector<16x32xf32>
    %102 = vector.extract_strided_slice %100 {offsets = [0, 0], sizes = [16, 32], strides = [1, 1]} : vector<16x96xf32> to vector<16x32xf32>
    %103 = arith.addf %101, %102 : vector<16x32xf32>
    %104 = arith.negf %103 : vector<16x32xf32>
    %105 = math.exp %104 : vector<16x32xf32>
    %cst_34 = arith.constant 1.000000e+00 : f32
    %106 = vector.broadcast %cst_34 : f32 to vector<16x32xf32>
    %107 = arith.addf %106, %105 : vector<16x32xf32>
    %108 = arith.divf %106, %107 : vector<16x32xf32>
    %109 = vector.extract_strided_slice %99 {offsets = [0, 32], sizes = [16, 32], strides = [1, 1]} : vector<16x96xf32> to vector<16x32xf32>
    %110 = vector.extract_strided_slice %100 {offsets = [0, 32], sizes = [16, 32], strides = [1, 1]} : vector<16x96xf32> to vector<16x32xf32>
    %111 = arith.addf %109, %110 : vector<16x32xf32>
    %112 = arith.negf %111 : vector<16x32xf32>
    %113 = math.exp %112 : vector<16x32xf32>
    %cst_35 = arith.constant 1.000000e+00 : f32
    %114 = vector.broadcast %cst_35 : f32 to vector<16x32xf32>
    %115 = arith.addf %114, %113 : vector<16x32xf32>
    %116 = arith.divf %114, %115 : vector<16x32xf32>
    %117 = vector.extract_strided_slice %99 {offsets = [0, 64], sizes = [16, 32], strides = [1, 1]} : vector<16x96xf32> to vector<16x32xf32>
    %118 = vector.extract_strided_slice %100 {offsets = [0, 64], sizes = [16, 32], strides = [1, 1]} : vector<16x96xf32> to vector<16x32xf32>
    %119 = arith.mulf %108, %118 : vector<16x32xf32>
    %120 = arith.addf %117, %119 : vector<16x32xf32>
    %121 = math.tanh %120 : vector<16x32xf32>
    %cst_36 = arith.constant 1.000000e+00 : f32
    %122 = vector.broadcast %cst_36 : f32 to vector<16x32xf32>
    %123 = arith.subf %122, %116 : vector<16x32xf32>
    %124 = arith.mulf %123, %121 : vector<16x32xf32>
    %125 = arith.mulf %116, %17 : vector<16x32xf32>
    %126 = arith.addf %124, %125 : vector<16x32xf32>
    %c1_i32 = arith.constant 1 : i32
    %127 = arith.index_cast %c1_i32 : i32 to index
    %c0_37 = arith.constant 0 : index
    %c0_38 = arith.constant 0 : index
    %128 = vector.load %arg0[%127, %c0_37, %c0_38] : memref<8x16x4xf32, #tpu.memory_space<vmem>>, vector<1x16x4xf32>
    %129 = vector.shape_cast %128 : vector<1x16x4xf32> to vector<16x4xf32>
    %130 = arith.index_cast %c1_i32 : i32 to index
    %c0_39 = arith.constant 0 : index
    %c0_40 = arith.constant 0 : index
    %131 = vector.load %arg1[%130, %c0_39, %c0_40] : memref<8x8x16xf32, #tpu.memory_space<vmem>>, vector<1x8x16xf32>
    %132 = vector.shape_cast %131 : vector<1x8x16xf32> to vector<8x16xf32>
    %133 = arith.index_cast %c1_i32 : i32 to index
    %c0_41 = arith.constant 0 : index
    %c0_42 = arith.constant 0 : index
    %134 = vector.load %arg2[%133, %c0_41, %c0_42] : memref<8x16x8xf32, #tpu.memory_space<vmem>>, vector<1x16x8xf32>
    %135 = vector.shape_cast %134 : vector<1x16x8xf32> to vector<16x8xf32>
    %cst_43 = arith.constant dense<0.000000e+00> : vector<8x4xf32>
    %136 = tpu.matmul %132, %129, %cst_43 {dimension_numbers = #tpu.dot_dimension_numbers<[1], [0], [0], [1], [0, 0, 1, 1], [], []>} : vector<8x16xf32>, vector<16x4xf32>, vector<8x4xf32> -> vector<8x4xf32>
    %137 = tpu.concatenate %136, %62 in 1 : vector<8x4xf32>, vector<8x32xf32> -> vector<8x36xf32>
    %cst_44 = arith.constant dense<0.000000e+00> : vector<8x192xf32>
    %138 = tpu.matmul %137, %0, %cst_44 {dimension_numbers = #tpu.dot_dimension_numbers<[1], [0], [0], [1], [0, 0, 1, 1], [], []>} : vector<8x36xf32>, vector<36x192xf32>, vector<8x192xf32> -> vector<8x192xf32>
    %139 = arith.addf %138, %5 : vector<8x192xf32>
    %140 = vector.extract_strided_slice %139 {offsets = [0, 0], sizes = [8, 96], strides = [1, 1]} : vector<8x192xf32> to vector<8x96xf32>
    %141 = vector.extract_strided_slice %139 {offsets = [0, 96], sizes = [8, 96], strides = [1, 1]} : vector<8x192xf32> to vector<8x96xf32>
    %142 = vector.extract_strided_slice %140 {offsets = [0, 0], sizes = [8, 32], strides = [1, 1]} : vector<8x96xf32> to vector<8x32xf32>
    %143 = vector.extract_strided_slice %141 {offsets = [0, 0], sizes = [8, 32], strides = [1, 1]} : vector<8x96xf32> to vector<8x32xf32>
    %144 = arith.addf %142, %143 : vector<8x32xf32>
    %145 = arith.negf %144 : vector<8x32xf32>
    %146 = math.exp %145 : vector<8x32xf32>
    %cst_45 = arith.constant 1.000000e+00 : f32
    %147 = vector.broadcast %cst_45 : f32 to vector<8x32xf32>
    %148 = arith.addf %147, %146 : vector<8x32xf32>
    %149 = arith.divf %147, %148 : vector<8x32xf32>
    %150 = vector.extract_strided_slice %140 {offsets = [0, 32], sizes = [8, 32], strides = [1, 1]} : vector<8x96xf32> to vector<8x32xf32>
    %151 = vector.extract_strided_slice %141 {offsets = [0, 32], sizes = [8, 32], strides = [1, 1]} : vector<8x96xf32> to vector<8x32xf32>
    %152 = arith.addf %150, %151 : vector<8x32xf32>
    %153 = arith.negf %152 : vector<8x32xf32>
    %154 = math.exp %153 : vector<8x32xf32>
    %cst_46 = arith.constant 1.000000e+00 : f32
    %155 = vector.broadcast %cst_46 : f32 to vector<8x32xf32>
    %156 = arith.addf %155, %154 : vector<8x32xf32>
    %157 = arith.divf %155, %156 : vector<8x32xf32>
    %158 = vector.extract_strided_slice %140 {offsets = [0, 64], sizes = [8, 32], strides = [1, 1]} : vector<8x96xf32> to vector<8x32xf32>
    %159 = vector.extract_strided_slice %141 {offsets = [0, 64], sizes = [8, 32], strides = [1, 1]} : vector<8x96xf32> to vector<8x32xf32>
    %160 = arith.mulf %149, %159 : vector<8x32xf32>
    %161 = arith.addf %158, %160 : vector<8x32xf32>
    %162 = math.tanh %161 : vector<8x32xf32>
    %cst_47 = arith.constant 1.000000e+00 : f32
    %163 = vector.broadcast %cst_47 : f32 to vector<8x32xf32>
    %164 = arith.subf %163, %157 : vector<8x32xf32>
    %165 = arith.mulf %164, %162 : vector<8x32xf32>
    %166 = arith.mulf %157, %62 : vector<8x32xf32>
    %167 = arith.addf %165, %166 : vector<8x32xf32>
    %168 = tpu.concatenate %136, %167 in 1 : vector<8x4xf32>, vector<8x32xf32> -> vector<8x36xf32>
    %cst_48 = arith.constant dense<0.000000e+00> : vector<16x36xf32>
    %169 = tpu.matmul %135, %168, %cst_48 {dimension_numbers = #tpu.dot_dimension_numbers<[1], [0], [0], [1], [0, 0, 1, 1], [], []>} : vector<16x8xf32>, vector<8x36xf32>, vector<16x36xf32> -> vector<16x36xf32>
    %170 = tpu.concatenate %169, %95 in 1 : vector<16x36xf32>, vector<16x32xf32> -> vector<16x68xf32>
    %cst_49 = arith.constant dense<0.000000e+00> : vector<16x192xf32>
    %171 = tpu.matmul %170, %1, %cst_49 {dimension_numbers = #tpu.dot_dimension_numbers<[1], [0], [0], [1], [0, 0, 1, 1], [], []>} : vector<16x68xf32>, vector<68x192xf32>, vector<16x192xf32> -> vector<16x192xf32>
    %172 = arith.addf %171, %8 : vector<16x192xf32>
    %173 = vector.extract_strided_slice %172 {offsets = [0, 0], sizes = [16, 96], strides = [1, 1]} : vector<16x192xf32> to vector<16x96xf32>
    %174 = vector.extract_strided_slice %172 {offsets = [0, 96], sizes = [16, 96], strides = [1, 1]} : vector<16x192xf32> to vector<16x96xf32>
    %175 = vector.extract_strided_slice %173 {offsets = [0, 0], sizes = [16, 32], strides = [1, 1]} : vector<16x96xf32> to vector<16x32xf32>
    %176 = vector.extract_strided_slice %174 {offsets = [0, 0], sizes = [16, 32], strides = [1, 1]} : vector<16x96xf32> to vector<16x32xf32>
    %177 = arith.addf %175, %176 : vector<16x32xf32>
    %178 = arith.negf %177 : vector<16x32xf32>
    %179 = math.exp %178 : vector<16x32xf32>
    %cst_50 = arith.constant 1.000000e+00 : f32
    %180 = vector.broadcast %cst_50 : f32 to vector<16x32xf32>
    %181 = arith.addf %180, %179 : vector<16x32xf32>
    %182 = arith.divf %180, %181 : vector<16x32xf32>
    %183 = vector.extract_strided_slice %173 {offsets = [0, 32], sizes = [16, 32], strides = [1, 1]} : vector<16x96xf32> to vector<16x32xf32>
    %184 = vector.extract_strided_slice %174 {offsets = [0, 32], sizes = [16, 32], strides = [1, 1]} : vector<16x96xf32> to vector<16x32xf32>
    %185 = arith.addf %183, %184 : vector<16x32xf32>
    %186 = arith.negf %185 : vector<16x32xf32>
    %187 = math.exp %186 : vector<16x32xf32>
    %cst_51 = arith.constant 1.000000e+00 : f32
    %188 = vector.broadcast %cst_51 : f32 to vector<16x32xf32>
    %189 = arith.addf %188, %187 : vector<16x32xf32>
    %190 = arith.divf %188, %189 : vector<16x32xf32>
    %191 = vector.extract_strided_slice %173 {offsets = [0, 64], sizes = [16, 32], strides = [1, 1]} : vector<16x96xf32> to vector<16x32xf32>
    %192 = vector.extract_strided_slice %174 {offsets = [0, 64], sizes = [16, 32], strides = [1, 1]} : vector<16x96xf32> to vector<16x32xf32>
    %193 = arith.mulf %182, %192 : vector<16x32xf32>
    %194 = arith.addf %191, %193 : vector<16x32xf32>
    %195 = math.tanh %194 : vector<16x32xf32>
    %cst_52 = arith.constant 1.000000e+00 : f32
    %196 = vector.broadcast %cst_52 : f32 to vector<16x32xf32>
    %197 = arith.subf %196, %190 : vector<16x32xf32>
    %198 = arith.mulf %197, %195 : vector<16x32xf32>
    %199 = arith.mulf %190, %95 : vector<16x32xf32>
    %200 = arith.addf %198, %199 : vector<16x32xf32>
    %201 = tpu.concatenate %129, %126 in 1 : vector<16x4xf32>, vector<16x32xf32> -> vector<16x36xf32>
    %cst_53 = arith.constant dense<0.000000e+00> : vector<16x192xf32>
    %202 = tpu.matmul %201, %2, %cst_53 {dimension_numbers = #tpu.dot_dimension_numbers<[1], [0], [0], [1], [0, 0, 1, 1], [], []>} : vector<16x36xf32>, vector<36x192xf32>, vector<16x192xf32> -> vector<16x192xf32>
    %203 = arith.addf %202, %11 : vector<16x192xf32>
    %204 = vector.extract_strided_slice %203 {offsets = [0, 0], sizes = [16, 96], strides = [1, 1]} : vector<16x192xf32> to vector<16x96xf32>
    %205 = vector.extract_strided_slice %203 {offsets = [0, 96], sizes = [16, 96], strides = [1, 1]} : vector<16x192xf32> to vector<16x96xf32>
    %206 = vector.extract_strided_slice %204 {offsets = [0, 0], sizes = [16, 32], strides = [1, 1]} : vector<16x96xf32> to vector<16x32xf32>
    %207 = vector.extract_strided_slice %205 {offsets = [0, 0], sizes = [16, 32], strides = [1, 1]} : vector<16x96xf32> to vector<16x32xf32>
    %208 = arith.addf %206, %207 : vector<16x32xf32>
    %209 = arith.negf %208 : vector<16x32xf32>
    %210 = math.exp %209 : vector<16x32xf32>
    %cst_54 = arith.constant 1.000000e+00 : f32
    %211 = vector.broadcast %cst_54 : f32 to vector<16x32xf32>
    %212 = arith.addf %211, %210 : vector<16x32xf32>
    %213 = arith.divf %211, %212 : vector<16x32xf32>
    %214 = vector.extract_strided_slice %204 {offsets = [0, 32], sizes = [16, 32], strides = [1, 1]} : vector<16x96xf32> to vector<16x32xf32>
    %215 = vector.extract_strided_slice %205 {offsets = [0, 32], sizes = [16, 32], strides = [1, 1]} : vector<16x96xf32> to vector<16x32xf32>
    %216 = arith.addf %214, %215 : vector<16x32xf32>
    %217 = arith.negf %216 : vector<16x32xf32>
    %218 = math.exp %217 : vector<16x32xf32>
    %cst_55 = arith.constant 1.000000e+00 : f32
    %219 = vector.broadcast %cst_55 : f32 to vector<16x32xf32>
    %220 = arith.addf %219, %218 : vector<16x32xf32>
    %221 = arith.divf %219, %220 : vector<16x32xf32>
    %222 = vector.extract_strided_slice %204 {offsets = [0, 64], sizes = [16, 32], strides = [1, 1]} : vector<16x96xf32> to vector<16x32xf32>
    %223 = vector.extract_strided_slice %205 {offsets = [0, 64], sizes = [16, 32], strides = [1, 1]} : vector<16x96xf32> to vector<16x32xf32>
    %224 = arith.mulf %213, %223 : vector<16x32xf32>
    %225 = arith.addf %222, %224 : vector<16x32xf32>
    %226 = math.tanh %225 : vector<16x32xf32>
    %cst_56 = arith.constant 1.000000e+00 : f32
    %227 = vector.broadcast %cst_56 : f32 to vector<16x32xf32>
    %228 = arith.subf %227, %221 : vector<16x32xf32>
    %229 = arith.mulf %228, %226 : vector<16x32xf32>
    %230 = arith.mulf %221, %126 : vector<16x32xf32>
    %231 = arith.addf %229, %230 : vector<16x32xf32>
    %c2_i32 = arith.constant 2 : i32
    %232 = arith.index_cast %c2_i32 : i32 to index
    %c0_57 = arith.constant 0 : index
    %c0_58 = arith.constant 0 : index
    %233 = vector.load %arg0[%232, %c0_57, %c0_58] : memref<8x16x4xf32, #tpu.memory_space<vmem>>, vector<1x16x4xf32>
    %234 = vector.shape_cast %233 : vector<1x16x4xf32> to vector<16x4xf32>
    %235 = arith.index_cast %c2_i32 : i32 to index
    %c0_59 = arith.constant 0 : index
    %c0_60 = arith.constant 0 : index
    %236 = vector.load %arg1[%235, %c0_59, %c0_60] : memref<8x8x16xf32, #tpu.memory_space<vmem>>, vector<1x8x16xf32>
    %237 = vector.shape_cast %236 : vector<1x8x16xf32> to vector<8x16xf32>
    %238 = arith.index_cast %c2_i32 : i32 to index
    %c0_61 = arith.constant 0 : index
    %c0_62 = arith.constant 0 : index
    %239 = vector.load %arg2[%238, %c0_61, %c0_62] : memref<8x16x8xf32, #tpu.memory_space<vmem>>, vector<1x16x8xf32>
    %240 = vector.shape_cast %239 : vector<1x16x8xf32> to vector<16x8xf32>
    %cst_63 = arith.constant dense<0.000000e+00> : vector<8x4xf32>
    %241 = tpu.matmul %237, %234, %cst_63 {dimension_numbers = #tpu.dot_dimension_numbers<[1], [0], [0], [1], [0, 0, 1, 1], [], []>} : vector<8x16xf32>, vector<16x4xf32>, vector<8x4xf32> -> vector<8x4xf32>
    %242 = tpu.concatenate %241, %167 in 1 : vector<8x4xf32>, vector<8x32xf32> -> vector<8x36xf32>
    %cst_64 = arith.constant dense<0.000000e+00> : vector<8x192xf32>
    %243 = tpu.matmul %242, %0, %cst_64 {dimension_numbers = #tpu.dot_dimension_numbers<[1], [0], [0], [1], [0, 0, 1, 1], [], []>} : vector<8x36xf32>, vector<36x192xf32>, vector<8x192xf32> -> vector<8x192xf32>
    %244 = arith.addf %243, %5 : vector<8x192xf32>
    %245 = vector.extract_strided_slice %244 {offsets = [0, 0], sizes = [8, 96], strides = [1, 1]} : vector<8x192xf32> to vector<8x96xf32>
    %246 = vector.extract_strided_slice %244 {offsets = [0, 96], sizes = [8, 96], strides = [1, 1]} : vector<8x192xf32> to vector<8x96xf32>
    %247 = vector.extract_strided_slice %245 {offsets = [0, 0], sizes = [8, 32], strides = [1, 1]} : vector<8x96xf32> to vector<8x32xf32>
    %248 = vector.extract_strided_slice %246 {offsets = [0, 0], sizes = [8, 32], strides = [1, 1]} : vector<8x96xf32> to vector<8x32xf32>
    %249 = arith.addf %247, %248 : vector<8x32xf32>
    %250 = arith.negf %249 : vector<8x32xf32>
    %251 = math.exp %250 : vector<8x32xf32>
    %cst_65 = arith.constant 1.000000e+00 : f32
    %252 = vector.broadcast %cst_65 : f32 to vector<8x32xf32>
    %253 = arith.addf %252, %251 : vector<8x32xf32>
    %254 = arith.divf %252, %253 : vector<8x32xf32>
    %255 = vector.extract_strided_slice %245 {offsets = [0, 32], sizes = [8, 32], strides = [1, 1]} : vector<8x96xf32> to vector<8x32xf32>
    %256 = vector.extract_strided_slice %246 {offsets = [0, 32], sizes = [8, 32], strides = [1, 1]} : vector<8x96xf32> to vector<8x32xf32>
    %257 = arith.addf %255, %256 : vector<8x32xf32>
    %258 = arith.negf %257 : vector<8x32xf32>
    %259 = math.exp %258 : vector<8x32xf32>
    %cst_66 = arith.constant 1.000000e+00 : f32
    %260 = vector.broadcast %cst_66 : f32 to vector<8x32xf32>
    %261 = arith.addf %260, %259 : vector<8x32xf32>
    %262 = arith.divf %260, %261 : vector<8x32xf32>
    %263 = vector.extract_strided_slice %245 {offsets = [0, 64], sizes = [8, 32], strides = [1, 1]} : vector<8x96xf32> to vector<8x32xf32>
    %264 = vector.extract_strided_slice %246 {offsets = [0, 64], sizes = [8, 32], strides = [1, 1]} : vector<8x96xf32> to vector<8x32xf32>
    %265 = arith.mulf %254, %264 : vector<8x32xf32>
    %266 = arith.addf %263, %265 : vector<8x32xf32>
    %267 = math.tanh %266 : vector<8x32xf32>
    %cst_67 = arith.constant 1.000000e+00 : f32
    %268 = vector.broadcast %cst_67 : f32 to vector<8x32xf32>
    %269 = arith.subf %268, %262 : vector<8x32xf32>
    %270 = arith.mulf %269, %267 : vector<8x32xf32>
    %271 = arith.mulf %262, %167 : vector<8x32xf32>
    %272 = arith.addf %270, %271 : vector<8x32xf32>
    %273 = tpu.concatenate %241, %272 in 1 : vector<8x4xf32>, vector<8x32xf32> -> vector<8x36xf32>
    %cst_68 = arith.constant dense<0.000000e+00> : vector<16x36xf32>
    %274 = tpu.matmul %240, %273, %cst_68 {dimension_numbers = #tpu.dot_dimension_numbers<[1], [0], [0], [1], [0, 0, 1, 1], [], []>} : vector<16x8xf32>, vector<8x36xf32>, vector<16x36xf32> -> vector<16x36xf32>
    %275 = tpu.concatenate %274, %200 in 1 : vector<16x36xf32>, vector<16x32xf32> -> vector<16x68xf32>
    %cst_69 = arith.constant dense<0.000000e+00> : vector<16x192xf32>
    %276 = tpu.matmul %275, %1, %cst_69 {dimension_numbers = #tpu.dot_dimension_numbers<[1], [0], [0], [1], [0, 0, 1, 1], [], []>} : vector<16x68xf32>, vector<68x192xf32>, vector<16x192xf32> -> vector<16x192xf32>
    %277 = arith.addf %276, %8 : vector<16x192xf32>
    %278 = vector.extract_strided_slice %277 {offsets = [0, 0], sizes = [16, 96], strides = [1, 1]} : vector<16x192xf32> to vector<16x96xf32>
    %279 = vector.extract_strided_slice %277 {offsets = [0, 96], sizes = [16, 96], strides = [1, 1]} : vector<16x192xf32> to vector<16x96xf32>
    %280 = vector.extract_strided_slice %278 {offsets = [0, 0], sizes = [16, 32], strides = [1, 1]} : vector<16x96xf32> to vector<16x32xf32>
    %281 = vector.extract_strided_slice %279 {offsets = [0, 0], sizes = [16, 32], strides = [1, 1]} : vector<16x96xf32> to vector<16x32xf32>
    %282 = arith.addf %280, %281 : vector<16x32xf32>
    %283 = arith.negf %282 : vector<16x32xf32>
    %284 = math.exp %283 : vector<16x32xf32>
    %cst_70 = arith.constant 1.000000e+00 : f32
    %285 = vector.broadcast %cst_70 : f32 to vector<16x32xf32>
    %286 = arith.addf %285, %284 : vector<16x32xf32>
    %287 = arith.divf %285, %286 : vector<16x32xf32>
    %288 = vector.extract_strided_slice %278 {offsets = [0, 32], sizes = [16, 32], strides = [1, 1]} : vector<16x96xf32> to vector<16x32xf32>
    %289 = vector.extract_strided_slice %279 {offsets = [0, 32], sizes = [16, 32], strides = [1, 1]} : vector<16x96xf32> to vector<16x32xf32>
    %290 = arith.addf %288, %289 : vector<16x32xf32>
    %291 = arith.negf %290 : vector<16x32xf32>
    %292 = math.exp %291 : vector<16x32xf32>
    %cst_71 = arith.constant 1.000000e+00 : f32
    %293 = vector.broadcast %cst_71 : f32 to vector<16x32xf32>
    %294 = arith.addf %293, %292 : vector<16x32xf32>
    %295 = arith.divf %293, %294 : vector<16x32xf32>
    %296 = vector.extract_strided_slice %278 {offsets = [0, 64], sizes = [16, 32], strides = [1, 1]} : vector<16x96xf32> to vector<16x32xf32>
    %297 = vector.extract_strided_slice %279 {offsets = [0, 64], sizes = [16, 32], strides = [1, 1]} : vector<16x96xf32> to vector<16x32xf32>
    %298 = arith.mulf %287, %297 : vector<16x32xf32>
    %299 = arith.addf %296, %298 : vector<16x32xf32>
    %300 = math.tanh %299 : vector<16x32xf32>
    %cst_72 = arith.constant 1.000000e+00 : f32
    %301 = vector.broadcast %cst_72 : f32 to vector<16x32xf32>
    %302 = arith.subf %301, %295 : vector<16x32xf32>
    %303 = arith.mulf %302, %300 : vector<16x32xf32>
    %304 = arith.mulf %295, %200 : vector<16x32xf32>
    %305 = arith.addf %303, %304 : vector<16x32xf32>
    %306 = tpu.concatenate %234, %231 in 1 : vector<16x4xf32>, vector<16x32xf32> -> vector<16x36xf32>
    %cst_73 = arith.constant dense<0.000000e+00> : vector<16x192xf32>
    %307 = tpu.matmul %306, %2, %cst_73 {dimension_numbers = #tpu.dot_dimension_numbers<[1], [0], [0], [1], [0, 0, 1, 1], [], []>} : vector<16x36xf32>, vector<36x192xf32>, vector<16x192xf32> -> vector<16x192xf32>
    %308 = arith.addf %307, %11 : vector<16x192xf32>
    %309 = vector.extract_strided_slice %308 {offsets = [0, 0], sizes = [16, 96], strides = [1, 1]} : vector<16x192xf32> to vector<16x96xf32>
    %310 = vector.extract_strided_slice %308 {offsets = [0, 96], sizes = [16, 96], strides = [1, 1]} : vector<16x192xf32> to vector<16x96xf32>
    %311 = vector.extract_strided_slice %309 {offsets = [0, 0], sizes = [16, 32], strides = [1, 1]} : vector<16x96xf32> to vector<16x32xf32>
    %312 = vector.extract_strided_slice %310 {offsets = [0, 0], sizes = [16, 32], strides = [1, 1]} : vector<16x96xf32> to vector<16x32xf32>
    %313 = arith.addf %311, %312 : vector<16x32xf32>
    %314 = arith.negf %313 : vector<16x32xf32>
    %315 = math.exp %314 : vector<16x32xf32>
    %cst_74 = arith.constant 1.000000e+00 : f32
    %316 = vector.broadcast %cst_74 : f32 to vector<16x32xf32>
    %317 = arith.addf %316, %315 : vector<16x32xf32>
    %318 = arith.divf %316, %317 : vector<16x32xf32>
    %319 = vector.extract_strided_slice %309 {offsets = [0, 32], sizes = [16, 32], strides = [1, 1]} : vector<16x96xf32> to vector<16x32xf32>
    %320 = vector.extract_strided_slice %310 {offsets = [0, 32], sizes = [16, 32], strides = [1, 1]} : vector<16x96xf32> to vector<16x32xf32>
    %321 = arith.addf %319, %320 : vector<16x32xf32>
    %322 = arith.negf %321 : vector<16x32xf32>
    %323 = math.exp %322 : vector<16x32xf32>
    %cst_75 = arith.constant 1.000000e+00 : f32
    %324 = vector.broadcast %cst_75 : f32 to vector<16x32xf32>
    %325 = arith.addf %324, %323 : vector<16x32xf32>
    %326 = arith.divf %324, %325 : vector<16x32xf32>
    %327 = vector.extract_strided_slice %309 {offsets = [0, 64], sizes = [16, 32], strides = [1, 1]} : vector<16x96xf32> to vector<16x32xf32>
    %328 = vector.extract_strided_slice %310 {offsets = [0, 64], sizes = [16, 32], strides = [1, 1]} : vector<16x96xf32> to vector<16x32xf32>
    %329 = arith.mulf %318, %328 : vector<16x32xf32>
    %330 = arith.addf %327, %329 : vector<16x32xf32>
    %331 = math.tanh %330 : vector<16x32xf32>
    %cst_76 = arith.constant 1.000000e+00 : f32
    %332 = vector.broadcast %cst_76 : f32 to vector<16x32xf32>
    %333 = arith.subf %332, %326 : vector<16x32xf32>
    %334 = arith.mulf %333, %331 : vector<16x32xf32>
    %335 = arith.mulf %326, %231 : vector<16x32xf32>
    %336 = arith.addf %334, %335 : vector<16x32xf32>
    %c3_i32 = arith.constant 3 : i32
    %337 = arith.index_cast %c3_i32 : i32 to index
    %c0_77 = arith.constant 0 : index
    %c0_78 = arith.constant 0 : index
    %338 = vector.load %arg0[%337, %c0_77, %c0_78] : memref<8x16x4xf32, #tpu.memory_space<vmem>>, vector<1x16x4xf32>
    %339 = vector.shape_cast %338 : vector<1x16x4xf32> to vector<16x4xf32>
    %340 = arith.index_cast %c3_i32 : i32 to index
    %c0_79 = arith.constant 0 : index
    %c0_80 = arith.constant 0 : index
    %341 = vector.load %arg1[%340, %c0_79, %c0_80] : memref<8x8x16xf32, #tpu.memory_space<vmem>>, vector<1x8x16xf32>
    %342 = vector.shape_cast %341 : vector<1x8x16xf32> to vector<8x16xf32>
    %343 = arith.index_cast %c3_i32 : i32 to index
    %c0_81 = arith.constant 0 : index
    %c0_82 = arith.constant 0 : index
    %344 = vector.load %arg2[%343, %c0_81, %c0_82] : memref<8x16x8xf32, #tpu.memory_space<vmem>>, vector<1x16x8xf32>
    %345 = vector.shape_cast %344 : vector<1x16x8xf32> to vector<16x8xf32>
    %cst_83 = arith.constant dense<0.000000e+00> : vector<8x4xf32>
    %346 = tpu.matmul %342, %339, %cst_83 {dimension_numbers = #tpu.dot_dimension_numbers<[1], [0], [0], [1], [0, 0, 1, 1], [], []>} : vector<8x16xf32>, vector<16x4xf32>, vector<8x4xf32> -> vector<8x4xf32>
    %347 = tpu.concatenate %346, %272 in 1 : vector<8x4xf32>, vector<8x32xf32> -> vector<8x36xf32>
    %cst_84 = arith.constant dense<0.000000e+00> : vector<8x192xf32>
    %348 = tpu.matmul %347, %0, %cst_84 {dimension_numbers = #tpu.dot_dimension_numbers<[1], [0], [0], [1], [0, 0, 1, 1], [], []>} : vector<8x36xf32>, vector<36x192xf32>, vector<8x192xf32> -> vector<8x192xf32>
    %349 = arith.addf %348, %5 : vector<8x192xf32>
    %350 = vector.extract_strided_slice %349 {offsets = [0, 0], sizes = [8, 96], strides = [1, 1]} : vector<8x192xf32> to vector<8x96xf32>
    %351 = vector.extract_strided_slice %349 {offsets = [0, 96], sizes = [8, 96], strides = [1, 1]} : vector<8x192xf32> to vector<8x96xf32>
    %352 = vector.extract_strided_slice %350 {offsets = [0, 0], sizes = [8, 32], strides = [1, 1]} : vector<8x96xf32> to vector<8x32xf32>
    %353 = vector.extract_strided_slice %351 {offsets = [0, 0], sizes = [8, 32], strides = [1, 1]} : vector<8x96xf32> to vector<8x32xf32>
    %354 = arith.addf %352, %353 : vector<8x32xf32>
    %355 = arith.negf %354 : vector<8x32xf32>
    %356 = math.exp %355 : vector<8x32xf32>
    %cst_85 = arith.constant 1.000000e+00 : f32
    %357 = vector.broadcast %cst_85 : f32 to vector<8x32xf32>
    %358 = arith.addf %357, %356 : vector<8x32xf32>
    %359 = arith.divf %357, %358 : vector<8x32xf32>
    %360 = vector.extract_strided_slice %350 {offsets = [0, 32], sizes = [8, 32], strides = [1, 1]} : vector<8x96xf32> to vector<8x32xf32>
    %361 = vector.extract_strided_slice %351 {offsets = [0, 32], sizes = [8, 32], strides = [1, 1]} : vector<8x96xf32> to vector<8x32xf32>
    %362 = arith.addf %360, %361 : vector<8x32xf32>
    %363 = arith.negf %362 : vector<8x32xf32>
    %364 = math.exp %363 : vector<8x32xf32>
    %cst_86 = arith.constant 1.000000e+00 : f32
    %365 = vector.broadcast %cst_86 : f32 to vector<8x32xf32>
    %366 = arith.addf %365, %364 : vector<8x32xf32>
    %367 = arith.divf %365, %366 : vector<8x32xf32>
    %368 = vector.extract_strided_slice %350 {offsets = [0, 64], sizes = [8, 32], strides = [1, 1]} : vector<8x96xf32> to vector<8x32xf32>
    %369 = vector.extract_strided_slice %351 {offsets = [0, 64], sizes = [8, 32], strides = [1, 1]} : vector<8x96xf32> to vector<8x32xf32>
    %370 = arith.mulf %359, %369 : vector<8x32xf32>
    %371 = arith.addf %368, %370 : vector<8x32xf32>
    %372 = math.tanh %371 : vector<8x32xf32>
    %cst_87 = arith.constant 1.000000e+00 : f32
    %373 = vector.broadcast %cst_87 : f32 to vector<8x32xf32>
    %374 = arith.subf %373, %367 : vector<8x32xf32>
    %375 = arith.mulf %374, %372 : vector<8x32xf32>
    %376 = arith.mulf %367, %272 : vector<8x32xf32>
    %377 = arith.addf %375, %376 : vector<8x32xf32>
    %378 = tpu.concatenate %346, %377 in 1 : vector<8x4xf32>, vector<8x32xf32> -> vector<8x36xf32>
    %cst_88 = arith.constant dense<0.000000e+00> : vector<16x36xf32>
    %379 = tpu.matmul %345, %378, %cst_88 {dimension_numbers = #tpu.dot_dimension_numbers<[1], [0], [0], [1], [0, 0, 1, 1], [], []>} : vector<16x8xf32>, vector<8x36xf32>, vector<16x36xf32> -> vector<16x36xf32>
    %380 = tpu.concatenate %379, %305 in 1 : vector<16x36xf32>, vector<16x32xf32> -> vector<16x68xf32>
    %cst_89 = arith.constant dense<0.000000e+00> : vector<16x192xf32>
    %381 = tpu.matmul %380, %1, %cst_89 {dimension_numbers = #tpu.dot_dimension_numbers<[1], [0], [0], [1], [0, 0, 1, 1], [], []>} : vector<16x68xf32>, vector<68x192xf32>, vector<16x192xf32> -> vector<16x192xf32>
    %382 = arith.addf %381, %8 : vector<16x192xf32>
    %383 = vector.extract_strided_slice %382 {offsets = [0, 0], sizes = [16, 96], strides = [1, 1]} : vector<16x192xf32> to vector<16x96xf32>
    %384 = vector.extract_strided_slice %382 {offsets = [0, 96], sizes = [16, 96], strides = [1, 1]} : vector<16x192xf32> to vector<16x96xf32>
    %385 = vector.extract_strided_slice %383 {offsets = [0, 0], sizes = [16, 32], strides = [1, 1]} : vector<16x96xf32> to vector<16x32xf32>
    %386 = vector.extract_strided_slice %384 {offsets = [0, 0], sizes = [16, 32], strides = [1, 1]} : vector<16x96xf32> to vector<16x32xf32>
    %387 = arith.addf %385, %386 : vector<16x32xf32>
    %388 = arith.negf %387 : vector<16x32xf32>
    %389 = math.exp %388 : vector<16x32xf32>
    %cst_90 = arith.constant 1.000000e+00 : f32
    %390 = vector.broadcast %cst_90 : f32 to vector<16x32xf32>
    %391 = arith.addf %390, %389 : vector<16x32xf32>
    %392 = arith.divf %390, %391 : vector<16x32xf32>
    %393 = vector.extract_strided_slice %383 {offsets = [0, 32], sizes = [16, 32], strides = [1, 1]} : vector<16x96xf32> to vector<16x32xf32>
    %394 = vector.extract_strided_slice %384 {offsets = [0, 32], sizes = [16, 32], strides = [1, 1]} : vector<16x96xf32> to vector<16x32xf32>
    %395 = arith.addf %393, %394 : vector<16x32xf32>
    %396 = arith.negf %395 : vector<16x32xf32>
    %397 = math.exp %396 : vector<16x32xf32>
    %cst_91 = arith.constant 1.000000e+00 : f32
    %398 = vector.broadcast %cst_91 : f32 to vector<16x32xf32>
    %399 = arith.addf %398, %397 : vector<16x32xf32>
    %400 = arith.divf %398, %399 : vector<16x32xf32>
    %401 = vector.extract_strided_slice %383 {offsets = [0, 64], sizes = [16, 32], strides = [1, 1]} : vector<16x96xf32> to vector<16x32xf32>
    %402 = vector.extract_strided_slice %384 {offsets = [0, 64], sizes = [16, 32], strides = [1, 1]} : vector<16x96xf32> to vector<16x32xf32>
    %403 = arith.mulf %392, %402 : vector<16x32xf32>
    %404 = arith.addf %401, %403 : vector<16x32xf32>
    %405 = math.tanh %404 : vector<16x32xf32>
    %cst_92 = arith.constant 1.000000e+00 : f32
    %406 = vector.broadcast %cst_92 : f32 to vector<16x32xf32>
    %407 = arith.subf %406, %400 : vector<16x32xf32>
    %408 = arith.mulf %407, %405 : vector<16x32xf32>
    %409 = arith.mulf %400, %305 : vector<16x32xf32>
    %410 = arith.addf %408, %409 : vector<16x32xf32>
    %411 = tpu.concatenate %339, %336 in 1 : vector<16x4xf32>, vector<16x32xf32> -> vector<16x36xf32>
    %cst_93 = arith.constant dense<0.000000e+00> : vector<16x192xf32>
    %412 = tpu.matmul %411, %2, %cst_93 {dimension_numbers = #tpu.dot_dimension_numbers<[1], [0], [0], [1], [0, 0, 1, 1], [], []>} : vector<16x36xf32>, vector<36x192xf32>, vector<16x192xf32> -> vector<16x192xf32>
    %413 = arith.addf %412, %11 : vector<16x192xf32>
    %414 = vector.extract_strided_slice %413 {offsets = [0, 0], sizes = [16, 96], strides = [1, 1]} : vector<16x192xf32> to vector<16x96xf32>
    %415 = vector.extract_strided_slice %413 {offsets = [0, 96], sizes = [16, 96], strides = [1, 1]} : vector<16x192xf32> to vector<16x96xf32>
    %416 = vector.extract_strided_slice %414 {offsets = [0, 0], sizes = [16, 32], strides = [1, 1]} : vector<16x96xf32> to vector<16x32xf32>
    %417 = vector.extract_strided_slice %415 {offsets = [0, 0], sizes = [16, 32], strides = [1, 1]} : vector<16x96xf32> to vector<16x32xf32>
    %418 = arith.addf %416, %417 : vector<16x32xf32>
    %419 = arith.negf %418 : vector<16x32xf32>
    %420 = math.exp %419 : vector<16x32xf32>
    %cst_94 = arith.constant 1.000000e+00 : f32
    %421 = vector.broadcast %cst_94 : f32 to vector<16x32xf32>
    %422 = arith.addf %421, %420 : vector<16x32xf32>
    %423 = arith.divf %421, %422 : vector<16x32xf32>
    %424 = vector.extract_strided_slice %414 {offsets = [0, 32], sizes = [16, 32], strides = [1, 1]} : vector<16x96xf32> to vector<16x32xf32>
    %425 = vector.extract_strided_slice %415 {offsets = [0, 32], sizes = [16, 32], strides = [1, 1]} : vector<16x96xf32> to vector<16x32xf32>
    %426 = arith.addf %424, %425 : vector<16x32xf32>
    %427 = arith.negf %426 : vector<16x32xf32>
    %428 = math.exp %427 : vector<16x32xf32>
    %cst_95 = arith.constant 1.000000e+00 : f32
    %429 = vector.broadcast %cst_95 : f32 to vector<16x32xf32>
    %430 = arith.addf %429, %428 : vector<16x32xf32>
    %431 = arith.divf %429, %430 : vector<16x32xf32>
    %432 = vector.extract_strided_slice %414 {offsets = [0, 64], sizes = [16, 32], strides = [1, 1]} : vector<16x96xf32> to vector<16x32xf32>
    %433 = vector.extract_strided_slice %415 {offsets = [0, 64], sizes = [16, 32], strides = [1, 1]} : vector<16x96xf32> to vector<16x32xf32>
    %434 = arith.mulf %423, %433 : vector<16x32xf32>
    %435 = arith.addf %432, %434 : vector<16x32xf32>
    %436 = math.tanh %435 : vector<16x32xf32>
    %cst_96 = arith.constant 1.000000e+00 : f32
    %437 = vector.broadcast %cst_96 : f32 to vector<16x32xf32>
    %438 = arith.subf %437, %431 : vector<16x32xf32>
    %439 = arith.mulf %438, %436 : vector<16x32xf32>
    %440 = arith.mulf %431, %336 : vector<16x32xf32>
    %441 = arith.addf %439, %440 : vector<16x32xf32>
    %c4_i32 = arith.constant 4 : i32
    %442 = arith.index_cast %c4_i32 : i32 to index
    %c0_97 = arith.constant 0 : index
    %c0_98 = arith.constant 0 : index
    %443 = vector.load %arg0[%442, %c0_97, %c0_98] : memref<8x16x4xf32, #tpu.memory_space<vmem>>, vector<1x16x4xf32>
    %444 = vector.shape_cast %443 : vector<1x16x4xf32> to vector<16x4xf32>
    %445 = arith.index_cast %c4_i32 : i32 to index
    %c0_99 = arith.constant 0 : index
    %c0_100 = arith.constant 0 : index
    %446 = vector.load %arg1[%445, %c0_99, %c0_100] : memref<8x8x16xf32, #tpu.memory_space<vmem>>, vector<1x8x16xf32>
    %447 = vector.shape_cast %446 : vector<1x8x16xf32> to vector<8x16xf32>
    %448 = arith.index_cast %c4_i32 : i32 to index
    %c0_101 = arith.constant 0 : index
    %c0_102 = arith.constant 0 : index
    %449 = vector.load %arg2[%448, %c0_101, %c0_102] : memref<8x16x8xf32, #tpu.memory_space<vmem>>, vector<1x16x8xf32>
    %450 = vector.shape_cast %449 : vector<1x16x8xf32> to vector<16x8xf32>
    %cst_103 = arith.constant dense<0.000000e+00> : vector<8x4xf32>
    %451 = tpu.matmul %447, %444, %cst_103 {dimension_numbers = #tpu.dot_dimension_numbers<[1], [0], [0], [1], [0, 0, 1, 1], [], []>} : vector<8x16xf32>, vector<16x4xf32>, vector<8x4xf32> -> vector<8x4xf32>
    %452 = tpu.concatenate %451, %377 in 1 : vector<8x4xf32>, vector<8x32xf32> -> vector<8x36xf32>
    %cst_104 = arith.constant dense<0.000000e+00> : vector<8x192xf32>
    %453 = tpu.matmul %452, %0, %cst_104 {dimension_numbers = #tpu.dot_dimension_numbers<[1], [0], [0], [1], [0, 0, 1, 1], [], []>} : vector<8x36xf32>, vector<36x192xf32>, vector<8x192xf32> -> vector<8x192xf32>
    %454 = arith.addf %453, %5 : vector<8x192xf32>
    %455 = vector.extract_strided_slice %454 {offsets = [0, 0], sizes = [8, 96], strides = [1, 1]} : vector<8x192xf32> to vector<8x96xf32>
    %456 = vector.extract_strided_slice %454 {offsets = [0, 96], sizes = [8, 96], strides = [1, 1]} : vector<8x192xf32> to vector<8x96xf32>
    %457 = vector.extract_strided_slice %455 {offsets = [0, 0], sizes = [8, 32], strides = [1, 1]} : vector<8x96xf32> to vector<8x32xf32>
    %458 = vector.extract_strided_slice %456 {offsets = [0, 0], sizes = [8, 32], strides = [1, 1]} : vector<8x96xf32> to vector<8x32xf32>
    %459 = arith.addf %457, %458 : vector<8x32xf32>
    %460 = arith.negf %459 : vector<8x32xf32>
    %461 = math.exp %460 : vector<8x32xf32>
    %cst_105 = arith.constant 1.000000e+00 : f32
    %462 = vector.broadcast %cst_105 : f32 to vector<8x32xf32>
    %463 = arith.addf %462, %461 : vector<8x32xf32>
    %464 = arith.divf %462, %463 : vector<8x32xf32>
    %465 = vector.extract_strided_slice %455 {offsets = [0, 32], sizes = [8, 32], strides = [1, 1]} : vector<8x96xf32> to vector<8x32xf32>
    %466 = vector.extract_strided_slice %456 {offsets = [0, 32], sizes = [8, 32], strides = [1, 1]} : vector<8x96xf32> to vector<8x32xf32>
    %467 = arith.addf %465, %466 : vector<8x32xf32>
    %468 = arith.negf %467 : vector<8x32xf32>
    %469 = math.exp %468 : vector<8x32xf32>
    %cst_106 = arith.constant 1.000000e+00 : f32
    %470 = vector.broadcast %cst_106 : f32 to vector<8x32xf32>
    %471 = arith.addf %470, %469 : vector<8x32xf32>
    %472 = arith.divf %470, %471 : vector<8x32xf32>
    %473 = vector.extract_strided_slice %455 {offsets = [0, 64], sizes = [8, 32], strides = [1, 1]} : vector<8x96xf32> to vector<8x32xf32>
    %474 = vector.extract_strided_slice %456 {offsets = [0, 64], sizes = [8, 32], strides = [1, 1]} : vector<8x96xf32> to vector<8x32xf32>
    %475 = arith.mulf %464, %474 : vector<8x32xf32>
    %476 = arith.addf %473, %475 : vector<8x32xf32>
    %477 = math.tanh %476 : vector<8x32xf32>
    %cst_107 = arith.constant 1.000000e+00 : f32
    %478 = vector.broadcast %cst_107 : f32 to vector<8x32xf32>
    %479 = arith.subf %478, %472 : vector<8x32xf32>
    %480 = arith.mulf %479, %477 : vector<8x32xf32>
    %481 = arith.mulf %472, %377 : vector<8x32xf32>
    %482 = arith.addf %480, %481 : vector<8x32xf32>
    %483 = tpu.concatenate %451, %482 in 1 : vector<8x4xf32>, vector<8x32xf32> -> vector<8x36xf32>
    %cst_108 = arith.constant dense<0.000000e+00> : vector<16x36xf32>
    %484 = tpu.matmul %450, %483, %cst_108 {dimension_numbers = #tpu.dot_dimension_numbers<[1], [0], [0], [1], [0, 0, 1, 1], [], []>} : vector<16x8xf32>, vector<8x36xf32>, vector<16x36xf32> -> vector<16x36xf32>
    %485 = tpu.concatenate %484, %410 in 1 : vector<16x36xf32>, vector<16x32xf32> -> vector<16x68xf32>
    %cst_109 = arith.constant dense<0.000000e+00> : vector<16x192xf32>
    %486 = tpu.matmul %485, %1, %cst_109 {dimension_numbers = #tpu.dot_dimension_numbers<[1], [0], [0], [1], [0, 0, 1, 1], [], []>} : vector<16x68xf32>, vector<68x192xf32>, vector<16x192xf32> -> vector<16x192xf32>
    %487 = arith.addf %486, %8 : vector<16x192xf32>
    %488 = vector.extract_strided_slice %487 {offsets = [0, 0], sizes = [16, 96], strides = [1, 1]} : vector<16x192xf32> to vector<16x96xf32>
    %489 = vector.extract_strided_slice %487 {offsets = [0, 96], sizes = [16, 96], strides = [1, 1]} : vector<16x192xf32> to vector<16x96xf32>
    %490 = vector.extract_strided_slice %488 {offsets = [0, 0], sizes = [16, 32], strides = [1, 1]} : vector<16x96xf32> to vector<16x32xf32>
    %491 = vector.extract_strided_slice %489 {offsets = [0, 0], sizes = [16, 32], strides = [1, 1]} : vector<16x96xf32> to vector<16x32xf32>
    %492 = arith.addf %490, %491 : vector<16x32xf32>
    %493 = arith.negf %492 : vector<16x32xf32>
    %494 = math.exp %493 : vector<16x32xf32>
    %cst_110 = arith.constant 1.000000e+00 : f32
    %495 = vector.broadcast %cst_110 : f32 to vector<16x32xf32>
    %496 = arith.addf %495, %494 : vector<16x32xf32>
    %497 = arith.divf %495, %496 : vector<16x32xf32>
    %498 = vector.extract_strided_slice %488 {offsets = [0, 32], sizes = [16, 32], strides = [1, 1]} : vector<16x96xf32> to vector<16x32xf32>
    %499 = vector.extract_strided_slice %489 {offsets = [0, 32], sizes = [16, 32], strides = [1, 1]} : vector<16x96xf32> to vector<16x32xf32>
    %500 = arith.addf %498, %499 : vector<16x32xf32>
    %501 = arith.negf %500 : vector<16x32xf32>
    %502 = math.exp %501 : vector<16x32xf32>
    %cst_111 = arith.constant 1.000000e+00 : f32
    %503 = vector.broadcast %cst_111 : f32 to vector<16x32xf32>
    %504 = arith.addf %503, %502 : vector<16x32xf32>
    %505 = arith.divf %503, %504 : vector<16x32xf32>
    %506 = vector.extract_strided_slice %488 {offsets = [0, 64], sizes = [16, 32], strides = [1, 1]} : vector<16x96xf32> to vector<16x32xf32>
    %507 = vector.extract_strided_slice %489 {offsets = [0, 64], sizes = [16, 32], strides = [1, 1]} : vector<16x96xf32> to vector<16x32xf32>
    %508 = arith.mulf %497, %507 : vector<16x32xf32>
    %509 = arith.addf %506, %508 : vector<16x32xf32>
    %510 = math.tanh %509 : vector<16x32xf32>
    %cst_112 = arith.constant 1.000000e+00 : f32
    %511 = vector.broadcast %cst_112 : f32 to vector<16x32xf32>
    %512 = arith.subf %511, %505 : vector<16x32xf32>
    %513 = arith.mulf %512, %510 : vector<16x32xf32>
    %514 = arith.mulf %505, %410 : vector<16x32xf32>
    %515 = arith.addf %513, %514 : vector<16x32xf32>
    %516 = tpu.concatenate %444, %441 in 1 : vector<16x4xf32>, vector<16x32xf32> -> vector<16x36xf32>
    %cst_113 = arith.constant dense<0.000000e+00> : vector<16x192xf32>
    %517 = tpu.matmul %516, %2, %cst_113 {dimension_numbers = #tpu.dot_dimension_numbers<[1], [0], [0], [1], [0, 0, 1, 1], [], []>} : vector<16x36xf32>, vector<36x192xf32>, vector<16x192xf32> -> vector<16x192xf32>
    %518 = arith.addf %517, %11 : vector<16x192xf32>
    %519 = vector.extract_strided_slice %518 {offsets = [0, 0], sizes = [16, 96], strides = [1, 1]} : vector<16x192xf32> to vector<16x96xf32>
    %520 = vector.extract_strided_slice %518 {offsets = [0, 96], sizes = [16, 96], strides = [1, 1]} : vector<16x192xf32> to vector<16x96xf32>
    %521 = vector.extract_strided_slice %519 {offsets = [0, 0], sizes = [16, 32], strides = [1, 1]} : vector<16x96xf32> to vector<16x32xf32>
    %522 = vector.extract_strided_slice %520 {offsets = [0, 0], sizes = [16, 32], strides = [1, 1]} : vector<16x96xf32> to vector<16x32xf32>
    %523 = arith.addf %521, %522 : vector<16x32xf32>
    %524 = arith.negf %523 : vector<16x32xf32>
    %525 = math.exp %524 : vector<16x32xf32>
    %cst_114 = arith.constant 1.000000e+00 : f32
    %526 = vector.broadcast %cst_114 : f32 to vector<16x32xf32>
    %527 = arith.addf %526, %525 : vector<16x32xf32>
    %528 = arith.divf %526, %527 : vector<16x32xf32>
    %529 = vector.extract_strided_slice %519 {offsets = [0, 32], sizes = [16, 32], strides = [1, 1]} : vector<16x96xf32> to vector<16x32xf32>
    %530 = vector.extract_strided_slice %520 {offsets = [0, 32], sizes = [16, 32], strides = [1, 1]} : vector<16x96xf32> to vector<16x32xf32>
    %531 = arith.addf %529, %530 : vector<16x32xf32>
    %532 = arith.negf %531 : vector<16x32xf32>
    %533 = math.exp %532 : vector<16x32xf32>
    %cst_115 = arith.constant 1.000000e+00 : f32
    %534 = vector.broadcast %cst_115 : f32 to vector<16x32xf32>
    %535 = arith.addf %534, %533 : vector<16x32xf32>
    %536 = arith.divf %534, %535 : vector<16x32xf32>
    %537 = vector.extract_strided_slice %519 {offsets = [0, 64], sizes = [16, 32], strides = [1, 1]} : vector<16x96xf32> to vector<16x32xf32>
    %538 = vector.extract_strided_slice %520 {offsets = [0, 64], sizes = [16, 32], strides = [1, 1]} : vector<16x96xf32> to vector<16x32xf32>
    %539 = arith.mulf %528, %538 : vector<16x32xf32>
    %540 = arith.addf %537, %539 : vector<16x32xf32>
    %541 = math.tanh %540 : vector<16x32xf32>
    %cst_116 = arith.constant 1.000000e+00 : f32
    %542 = vector.broadcast %cst_116 : f32 to vector<16x32xf32>
    %543 = arith.subf %542, %536 : vector<16x32xf32>
    %544 = arith.mulf %543, %541 : vector<16x32xf32>
    %545 = arith.mulf %536, %441 : vector<16x32xf32>
    %546 = arith.addf %544, %545 : vector<16x32xf32>
    %c5_i32 = arith.constant 5 : i32
    %547 = arith.index_cast %c5_i32 : i32 to index
    %c0_117 = arith.constant 0 : index
    %c0_118 = arith.constant 0 : index
    %548 = vector.load %arg0[%547, %c0_117, %c0_118] : memref<8x16x4xf32, #tpu.memory_space<vmem>>, vector<1x16x4xf32>
    %549 = vector.shape_cast %548 : vector<1x16x4xf32> to vector<16x4xf32>
    %550 = arith.index_cast %c5_i32 : i32 to index
    %c0_119 = arith.constant 0 : index
    %c0_120 = arith.constant 0 : index
    %551 = vector.load %arg1[%550, %c0_119, %c0_120] : memref<8x8x16xf32, #tpu.memory_space<vmem>>, vector<1x8x16xf32>
    %552 = vector.shape_cast %551 : vector<1x8x16xf32> to vector<8x16xf32>
    %553 = arith.index_cast %c5_i32 : i32 to index
    %c0_121 = arith.constant 0 : index
    %c0_122 = arith.constant 0 : index
    %554 = vector.load %arg2[%553, %c0_121, %c0_122] : memref<8x16x8xf32, #tpu.memory_space<vmem>>, vector<1x16x8xf32>
    %555 = vector.shape_cast %554 : vector<1x16x8xf32> to vector<16x8xf32>
    %cst_123 = arith.constant dense<0.000000e+00> : vector<8x4xf32>
    %556 = tpu.matmul %552, %549, %cst_123 {dimension_numbers = #tpu.dot_dimension_numbers<[1], [0], [0], [1], [0, 0, 1, 1], [], []>} : vector<8x16xf32>, vector<16x4xf32>, vector<8x4xf32> -> vector<8x4xf32>
    %557 = tpu.concatenate %556, %482 in 1 : vector<8x4xf32>, vector<8x32xf32> -> vector<8x36xf32>
    %cst_124 = arith.constant dense<0.000000e+00> : vector<8x192xf32>
    %558 = tpu.matmul %557, %0, %cst_124 {dimension_numbers = #tpu.dot_dimension_numbers<[1], [0], [0], [1], [0, 0, 1, 1], [], []>} : vector<8x36xf32>, vector<36x192xf32>, vector<8x192xf32> -> vector<8x192xf32>
    %559 = arith.addf %558, %5 : vector<8x192xf32>
    %560 = vector.extract_strided_slice %559 {offsets = [0, 0], sizes = [8, 96], strides = [1, 1]} : vector<8x192xf32> to vector<8x96xf32>
    %561 = vector.extract_strided_slice %559 {offsets = [0, 96], sizes = [8, 96], strides = [1, 1]} : vector<8x192xf32> to vector<8x96xf32>
    %562 = vector.extract_strided_slice %560 {offsets = [0, 0], sizes = [8, 32], strides = [1, 1]} : vector<8x96xf32> to vector<8x32xf32>
    %563 = vector.extract_strided_slice %561 {offsets = [0, 0], sizes = [8, 32], strides = [1, 1]} : vector<8x96xf32> to vector<8x32xf32>
    %564 = arith.addf %562, %563 : vector<8x32xf32>
    %565 = arith.negf %564 : vector<8x32xf32>
    %566 = math.exp %565 : vector<8x32xf32>
    %cst_125 = arith.constant 1.000000e+00 : f32
    %567 = vector.broadcast %cst_125 : f32 to vector<8x32xf32>
    %568 = arith.addf %567, %566 : vector<8x32xf32>
    %569 = arith.divf %567, %568 : vector<8x32xf32>
    %570 = vector.extract_strided_slice %560 {offsets = [0, 32], sizes = [8, 32], strides = [1, 1]} : vector<8x96xf32> to vector<8x32xf32>
    %571 = vector.extract_strided_slice %561 {offsets = [0, 32], sizes = [8, 32], strides = [1, 1]} : vector<8x96xf32> to vector<8x32xf32>
    %572 = arith.addf %570, %571 : vector<8x32xf32>
    %573 = arith.negf %572 : vector<8x32xf32>
    %574 = math.exp %573 : vector<8x32xf32>
    %cst_126 = arith.constant 1.000000e+00 : f32
    %575 = vector.broadcast %cst_126 : f32 to vector<8x32xf32>
    %576 = arith.addf %575, %574 : vector<8x32xf32>
    %577 = arith.divf %575, %576 : vector<8x32xf32>
    %578 = vector.extract_strided_slice %560 {offsets = [0, 64], sizes = [8, 32], strides = [1, 1]} : vector<8x96xf32> to vector<8x32xf32>
    %579 = vector.extract_strided_slice %561 {offsets = [0, 64], sizes = [8, 32], strides = [1, 1]} : vector<8x96xf32> to vector<8x32xf32>
    %580 = arith.mulf %569, %579 : vector<8x32xf32>
    %581 = arith.addf %578, %580 : vector<8x32xf32>
    %582 = math.tanh %581 : vector<8x32xf32>
    %cst_127 = arith.constant 1.000000e+00 : f32
    %583 = vector.broadcast %cst_127 : f32 to vector<8x32xf32>
    %584 = arith.subf %583, %577 : vector<8x32xf32>
    %585 = arith.mulf %584, %582 : vector<8x32xf32>
    %586 = arith.mulf %577, %482 : vector<8x32xf32>
    %587 = arith.addf %585, %586 : vector<8x32xf32>
    %588 = tpu.concatenate %556, %587 in 1 : vector<8x4xf32>, vector<8x32xf32> -> vector<8x36xf32>
    %cst_128 = arith.constant dense<0.000000e+00> : vector<16x36xf32>
    %589 = tpu.matmul %555, %588, %cst_128 {dimension_numbers = #tpu.dot_dimension_numbers<[1], [0], [0], [1], [0, 0, 1, 1], [], []>} : vector<16x8xf32>, vector<8x36xf32>, vector<16x36xf32> -> vector<16x36xf32>
    %590 = tpu.concatenate %589, %515 in 1 : vector<16x36xf32>, vector<16x32xf32> -> vector<16x68xf32>
    %cst_129 = arith.constant dense<0.000000e+00> : vector<16x192xf32>
    %591 = tpu.matmul %590, %1, %cst_129 {dimension_numbers = #tpu.dot_dimension_numbers<[1], [0], [0], [1], [0, 0, 1, 1], [], []>} : vector<16x68xf32>, vector<68x192xf32>, vector<16x192xf32> -> vector<16x192xf32>
    %592 = arith.addf %591, %8 : vector<16x192xf32>
    %593 = vector.extract_strided_slice %592 {offsets = [0, 0], sizes = [16, 96], strides = [1, 1]} : vector<16x192xf32> to vector<16x96xf32>
    %594 = vector.extract_strided_slice %592 {offsets = [0, 96], sizes = [16, 96], strides = [1, 1]} : vector<16x192xf32> to vector<16x96xf32>
    %595 = vector.extract_strided_slice %593 {offsets = [0, 0], sizes = [16, 32], strides = [1, 1]} : vector<16x96xf32> to vector<16x32xf32>
    %596 = vector.extract_strided_slice %594 {offsets = [0, 0], sizes = [16, 32], strides = [1, 1]} : vector<16x96xf32> to vector<16x32xf32>
    %597 = arith.addf %595, %596 : vector<16x32xf32>
    %598 = arith.negf %597 : vector<16x32xf32>
    %599 = math.exp %598 : vector<16x32xf32>
    %cst_130 = arith.constant 1.000000e+00 : f32
    %600 = vector.broadcast %cst_130 : f32 to vector<16x32xf32>
    %601 = arith.addf %600, %599 : vector<16x32xf32>
    %602 = arith.divf %600, %601 : vector<16x32xf32>
    %603 = vector.extract_strided_slice %593 {offsets = [0, 32], sizes = [16, 32], strides = [1, 1]} : vector<16x96xf32> to vector<16x32xf32>
    %604 = vector.extract_strided_slice %594 {offsets = [0, 32], sizes = [16, 32], strides = [1, 1]} : vector<16x96xf32> to vector<16x32xf32>
    %605 = arith.addf %603, %604 : vector<16x32xf32>
    %606 = arith.negf %605 : vector<16x32xf32>
    %607 = math.exp %606 : vector<16x32xf32>
    %cst_131 = arith.constant 1.000000e+00 : f32
    %608 = vector.broadcast %cst_131 : f32 to vector<16x32xf32>
    %609 = arith.addf %608, %607 : vector<16x32xf32>
    %610 = arith.divf %608, %609 : vector<16x32xf32>
    %611 = vector.extract_strided_slice %593 {offsets = [0, 64], sizes = [16, 32], strides = [1, 1]} : vector<16x96xf32> to vector<16x32xf32>
    %612 = vector.extract_strided_slice %594 {offsets = [0, 64], sizes = [16, 32], strides = [1, 1]} : vector<16x96xf32> to vector<16x32xf32>
    %613 = arith.mulf %602, %612 : vector<16x32xf32>
    %614 = arith.addf %611, %613 : vector<16x32xf32>
    %615 = math.tanh %614 : vector<16x32xf32>
    %cst_132 = arith.constant 1.000000e+00 : f32
    %616 = vector.broadcast %cst_132 : f32 to vector<16x32xf32>
    %617 = arith.subf %616, %610 : vector<16x32xf32>
    %618 = arith.mulf %617, %615 : vector<16x32xf32>
    %619 = arith.mulf %610, %515 : vector<16x32xf32>
    %620 = arith.addf %618, %619 : vector<16x32xf32>
    %621 = tpu.concatenate %549, %546 in 1 : vector<16x4xf32>, vector<16x32xf32> -> vector<16x36xf32>
    %cst_133 = arith.constant dense<0.000000e+00> : vector<16x192xf32>
    %622 = tpu.matmul %621, %2, %cst_133 {dimension_numbers = #tpu.dot_dimension_numbers<[1], [0], [0], [1], [0, 0, 1, 1], [], []>} : vector<16x36xf32>, vector<36x192xf32>, vector<16x192xf32> -> vector<16x192xf32>
    %623 = arith.addf %622, %11 : vector<16x192xf32>
    %624 = vector.extract_strided_slice %623 {offsets = [0, 0], sizes = [16, 96], strides = [1, 1]} : vector<16x192xf32> to vector<16x96xf32>
    %625 = vector.extract_strided_slice %623 {offsets = [0, 96], sizes = [16, 96], strides = [1, 1]} : vector<16x192xf32> to vector<16x96xf32>
    %626 = vector.extract_strided_slice %624 {offsets = [0, 0], sizes = [16, 32], strides = [1, 1]} : vector<16x96xf32> to vector<16x32xf32>
    %627 = vector.extract_strided_slice %625 {offsets = [0, 0], sizes = [16, 32], strides = [1, 1]} : vector<16x96xf32> to vector<16x32xf32>
    %628 = arith.addf %626, %627 : vector<16x32xf32>
    %629 = arith.negf %628 : vector<16x32xf32>
    %630 = math.exp %629 : vector<16x32xf32>
    %cst_134 = arith.constant 1.000000e+00 : f32
    %631 = vector.broadcast %cst_134 : f32 to vector<16x32xf32>
    %632 = arith.addf %631, %630 : vector<16x32xf32>
    %633 = arith.divf %631, %632 : vector<16x32xf32>
    %634 = vector.extract_strided_slice %624 {offsets = [0, 32], sizes = [16, 32], strides = [1, 1]} : vector<16x96xf32> to vector<16x32xf32>
    %635 = vector.extract_strided_slice %625 {offsets = [0, 32], sizes = [16, 32], strides = [1, 1]} : vector<16x96xf32> to vector<16x32xf32>
    %636 = arith.addf %634, %635 : vector<16x32xf32>
    %637 = arith.negf %636 : vector<16x32xf32>
    %638 = math.exp %637 : vector<16x32xf32>
    %cst_135 = arith.constant 1.000000e+00 : f32
    %639 = vector.broadcast %cst_135 : f32 to vector<16x32xf32>
    %640 = arith.addf %639, %638 : vector<16x32xf32>
    %641 = arith.divf %639, %640 : vector<16x32xf32>
    %642 = vector.extract_strided_slice %624 {offsets = [0, 64], sizes = [16, 32], strides = [1, 1]} : vector<16x96xf32> to vector<16x32xf32>
    %643 = vector.extract_strided_slice %625 {offsets = [0, 64], sizes = [16, 32], strides = [1, 1]} : vector<16x96xf32> to vector<16x32xf32>
    %644 = arith.mulf %633, %643 : vector<16x32xf32>
    %645 = arith.addf %642, %644 : vector<16x32xf32>
    %646 = math.tanh %645 : vector<16x32xf32>
    %cst_136 = arith.constant 1.000000e+00 : f32
    %647 = vector.broadcast %cst_136 : f32 to vector<16x32xf32>
    %648 = arith.subf %647, %641 : vector<16x32xf32>
    %649 = arith.mulf %648, %646 : vector<16x32xf32>
    %650 = arith.mulf %641, %546 : vector<16x32xf32>
    %651 = arith.addf %649, %650 : vector<16x32xf32>
    %c6_i32 = arith.constant 6 : i32
    %652 = arith.index_cast %c6_i32 : i32 to index
    %c0_137 = arith.constant 0 : index
    %c0_138 = arith.constant 0 : index
    %653 = vector.load %arg0[%652, %c0_137, %c0_138] : memref<8x16x4xf32, #tpu.memory_space<vmem>>, vector<1x16x4xf32>
    %654 = vector.shape_cast %653 : vector<1x16x4xf32> to vector<16x4xf32>
    %655 = arith.index_cast %c6_i32 : i32 to index
    %c0_139 = arith.constant 0 : index
    %c0_140 = arith.constant 0 : index
    %656 = vector.load %arg1[%655, %c0_139, %c0_140] : memref<8x8x16xf32, #tpu.memory_space<vmem>>, vector<1x8x16xf32>
    %657 = vector.shape_cast %656 : vector<1x8x16xf32> to vector<8x16xf32>
    %658 = arith.index_cast %c6_i32 : i32 to index
    %c0_141 = arith.constant 0 : index
    %c0_142 = arith.constant 0 : index
    %659 = vector.load %arg2[%658, %c0_141, %c0_142] : memref<8x16x8xf32, #tpu.memory_space<vmem>>, vector<1x16x8xf32>
    %660 = vector.shape_cast %659 : vector<1x16x8xf32> to vector<16x8xf32>
    %cst_143 = arith.constant dense<0.000000e+00> : vector<8x4xf32>
    %661 = tpu.matmul %657, %654, %cst_143 {dimension_numbers = #tpu.dot_dimension_numbers<[1], [0], [0], [1], [0, 0, 1, 1], [], []>} : vector<8x16xf32>, vector<16x4xf32>, vector<8x4xf32> -> vector<8x4xf32>
    %662 = tpu.concatenate %661, %587 in 1 : vector<8x4xf32>, vector<8x32xf32> -> vector<8x36xf32>
    %cst_144 = arith.constant dense<0.000000e+00> : vector<8x192xf32>
    %663 = tpu.matmul %662, %0, %cst_144 {dimension_numbers = #tpu.dot_dimension_numbers<[1], [0], [0], [1], [0, 0, 1, 1], [], []>} : vector<8x36xf32>, vector<36x192xf32>, vector<8x192xf32> -> vector<8x192xf32>
    %664 = arith.addf %663, %5 : vector<8x192xf32>
    %665 = vector.extract_strided_slice %664 {offsets = [0, 0], sizes = [8, 96], strides = [1, 1]} : vector<8x192xf32> to vector<8x96xf32>
    %666 = vector.extract_strided_slice %664 {offsets = [0, 96], sizes = [8, 96], strides = [1, 1]} : vector<8x192xf32> to vector<8x96xf32>
    %667 = vector.extract_strided_slice %665 {offsets = [0, 0], sizes = [8, 32], strides = [1, 1]} : vector<8x96xf32> to vector<8x32xf32>
    %668 = vector.extract_strided_slice %666 {offsets = [0, 0], sizes = [8, 32], strides = [1, 1]} : vector<8x96xf32> to vector<8x32xf32>
    %669 = arith.addf %667, %668 : vector<8x32xf32>
    %670 = arith.negf %669 : vector<8x32xf32>
    %671 = math.exp %670 : vector<8x32xf32>
    %cst_145 = arith.constant 1.000000e+00 : f32
    %672 = vector.broadcast %cst_145 : f32 to vector<8x32xf32>
    %673 = arith.addf %672, %671 : vector<8x32xf32>
    %674 = arith.divf %672, %673 : vector<8x32xf32>
    %675 = vector.extract_strided_slice %665 {offsets = [0, 32], sizes = [8, 32], strides = [1, 1]} : vector<8x96xf32> to vector<8x32xf32>
    %676 = vector.extract_strided_slice %666 {offsets = [0, 32], sizes = [8, 32], strides = [1, 1]} : vector<8x96xf32> to vector<8x32xf32>
    %677 = arith.addf %675, %676 : vector<8x32xf32>
    %678 = arith.negf %677 : vector<8x32xf32>
    %679 = math.exp %678 : vector<8x32xf32>
    %cst_146 = arith.constant 1.000000e+00 : f32
    %680 = vector.broadcast %cst_146 : f32 to vector<8x32xf32>
    %681 = arith.addf %680, %679 : vector<8x32xf32>
    %682 = arith.divf %680, %681 : vector<8x32xf32>
    %683 = vector.extract_strided_slice %665 {offsets = [0, 64], sizes = [8, 32], strides = [1, 1]} : vector<8x96xf32> to vector<8x32xf32>
    %684 = vector.extract_strided_slice %666 {offsets = [0, 64], sizes = [8, 32], strides = [1, 1]} : vector<8x96xf32> to vector<8x32xf32>
    %685 = arith.mulf %674, %684 : vector<8x32xf32>
    %686 = arith.addf %683, %685 : vector<8x32xf32>
    %687 = math.tanh %686 : vector<8x32xf32>
    %cst_147 = arith.constant 1.000000e+00 : f32
    %688 = vector.broadcast %cst_147 : f32 to vector<8x32xf32>
    %689 = arith.subf %688, %682 : vector<8x32xf32>
    %690 = arith.mulf %689, %687 : vector<8x32xf32>
    %691 = arith.mulf %682, %587 : vector<8x32xf32>
    %692 = arith.addf %690, %691 : vector<8x32xf32>
    %693 = tpu.concatenate %661, %692 in 1 : vector<8x4xf32>, vector<8x32xf32> -> vector<8x36xf32>
    %cst_148 = arith.constant dense<0.000000e+00> : vector<16x36xf32>
    %694 = tpu.matmul %660, %693, %cst_148 {dimension_numbers = #tpu.dot_dimension_numbers<[1], [0], [0], [1], [0, 0, 1, 1], [], []>} : vector<16x8xf32>, vector<8x36xf32>, vector<16x36xf32> -> vector<16x36xf32>
    %695 = tpu.concatenate %694, %620 in 1 : vector<16x36xf32>, vector<16x32xf32> -> vector<16x68xf32>
    %cst_149 = arith.constant dense<0.000000e+00> : vector<16x192xf32>
    %696 = tpu.matmul %695, %1, %cst_149 {dimension_numbers = #tpu.dot_dimension_numbers<[1], [0], [0], [1], [0, 0, 1, 1], [], []>} : vector<16x68xf32>, vector<68x192xf32>, vector<16x192xf32> -> vector<16x192xf32>
    %697 = arith.addf %696, %8 : vector<16x192xf32>
    %698 = vector.extract_strided_slice %697 {offsets = [0, 0], sizes = [16, 96], strides = [1, 1]} : vector<16x192xf32> to vector<16x96xf32>
    %699 = vector.extract_strided_slice %697 {offsets = [0, 96], sizes = [16, 96], strides = [1, 1]} : vector<16x192xf32> to vector<16x96xf32>
    %700 = vector.extract_strided_slice %698 {offsets = [0, 0], sizes = [16, 32], strides = [1, 1]} : vector<16x96xf32> to vector<16x32xf32>
    %701 = vector.extract_strided_slice %699 {offsets = [0, 0], sizes = [16, 32], strides = [1, 1]} : vector<16x96xf32> to vector<16x32xf32>
    %702 = arith.addf %700, %701 : vector<16x32xf32>
    %703 = arith.negf %702 : vector<16x32xf32>
    %704 = math.exp %703 : vector<16x32xf32>
    %cst_150 = arith.constant 1.000000e+00 : f32
    %705 = vector.broadcast %cst_150 : f32 to vector<16x32xf32>
    %706 = arith.addf %705, %704 : vector<16x32xf32>
    %707 = arith.divf %705, %706 : vector<16x32xf32>
    %708 = vector.extract_strided_slice %698 {offsets = [0, 32], sizes = [16, 32], strides = [1, 1]} : vector<16x96xf32> to vector<16x32xf32>
    %709 = vector.extract_strided_slice %699 {offsets = [0, 32], sizes = [16, 32], strides = [1, 1]} : vector<16x96xf32> to vector<16x32xf32>
    %710 = arith.addf %708, %709 : vector<16x32xf32>
    %711 = arith.negf %710 : vector<16x32xf32>
    %712 = math.exp %711 : vector<16x32xf32>
    %cst_151 = arith.constant 1.000000e+00 : f32
    %713 = vector.broadcast %cst_151 : f32 to vector<16x32xf32>
    %714 = arith.addf %713, %712 : vector<16x32xf32>
    %715 = arith.divf %713, %714 : vector<16x32xf32>
    %716 = vector.extract_strided_slice %698 {offsets = [0, 64], sizes = [16, 32], strides = [1, 1]} : vector<16x96xf32> to vector<16x32xf32>
    %717 = vector.extract_strided_slice %699 {offsets = [0, 64], sizes = [16, 32], strides = [1, 1]} : vector<16x96xf32> to vector<16x32xf32>
    %718 = arith.mulf %707, %717 : vector<16x32xf32>
    %719 = arith.addf %716, %718 : vector<16x32xf32>
    %720 = math.tanh %719 : vector<16x32xf32>
    %cst_152 = arith.constant 1.000000e+00 : f32
    %721 = vector.broadcast %cst_152 : f32 to vector<16x32xf32>
    %722 = arith.subf %721, %715 : vector<16x32xf32>
    %723 = arith.mulf %722, %720 : vector<16x32xf32>
    %724 = arith.mulf %715, %620 : vector<16x32xf32>
    %725 = arith.addf %723, %724 : vector<16x32xf32>
    %726 = tpu.concatenate %654, %651 in 1 : vector<16x4xf32>, vector<16x32xf32> -> vector<16x36xf32>
    %cst_153 = arith.constant dense<0.000000e+00> : vector<16x192xf32>
    %727 = tpu.matmul %726, %2, %cst_153 {dimension_numbers = #tpu.dot_dimension_numbers<[1], [0], [0], [1], [0, 0, 1, 1], [], []>} : vector<16x36xf32>, vector<36x192xf32>, vector<16x192xf32> -> vector<16x192xf32>
    %728 = arith.addf %727, %11 : vector<16x192xf32>
    %729 = vector.extract_strided_slice %728 {offsets = [0, 0], sizes = [16, 96], strides = [1, 1]} : vector<16x192xf32> to vector<16x96xf32>
    %730 = vector.extract_strided_slice %728 {offsets = [0, 96], sizes = [16, 96], strides = [1, 1]} : vector<16x192xf32> to vector<16x96xf32>
    %731 = vector.extract_strided_slice %729 {offsets = [0, 0], sizes = [16, 32], strides = [1, 1]} : vector<16x96xf32> to vector<16x32xf32>
    %732 = vector.extract_strided_slice %730 {offsets = [0, 0], sizes = [16, 32], strides = [1, 1]} : vector<16x96xf32> to vector<16x32xf32>
    %733 = arith.addf %731, %732 : vector<16x32xf32>
    %734 = arith.negf %733 : vector<16x32xf32>
    %735 = math.exp %734 : vector<16x32xf32>
    %cst_154 = arith.constant 1.000000e+00 : f32
    %736 = vector.broadcast %cst_154 : f32 to vector<16x32xf32>
    %737 = arith.addf %736, %735 : vector<16x32xf32>
    %738 = arith.divf %736, %737 : vector<16x32xf32>
    %739 = vector.extract_strided_slice %729 {offsets = [0, 32], sizes = [16, 32], strides = [1, 1]} : vector<16x96xf32> to vector<16x32xf32>
    %740 = vector.extract_strided_slice %730 {offsets = [0, 32], sizes = [16, 32], strides = [1, 1]} : vector<16x96xf32> to vector<16x32xf32>
    %741 = arith.addf %739, %740 : vector<16x32xf32>
    %742 = arith.negf %741 : vector<16x32xf32>
    %743 = math.exp %742 : vector<16x32xf32>
    %cst_155 = arith.constant 1.000000e+00 : f32
    %744 = vector.broadcast %cst_155 : f32 to vector<16x32xf32>
    %745 = arith.addf %744, %743 : vector<16x32xf32>
    %746 = arith.divf %744, %745 : vector<16x32xf32>
    %747 = vector.extract_strided_slice %729 {offsets = [0, 64], sizes = [16, 32], strides = [1, 1]} : vector<16x96xf32> to vector<16x32xf32>
    %748 = vector.extract_strided_slice %730 {offsets = [0, 64], sizes = [16, 32], strides = [1, 1]} : vector<16x96xf32> to vector<16x32xf32>
    %749 = arith.mulf %738, %748 : vector<16x32xf32>
    %750 = arith.addf %747, %749 : vector<16x32xf32>
    %751 = math.tanh %750 : vector<16x32xf32>
    %cst_156 = arith.constant 1.000000e+00 : f32
    %752 = vector.broadcast %cst_156 : f32 to vector<16x32xf32>
    %753 = arith.subf %752, %746 : vector<16x32xf32>
    %754 = arith.mulf %753, %751 : vector<16x32xf32>
    %755 = arith.mulf %746, %651 : vector<16x32xf32>
    %756 = arith.addf %754, %755 : vector<16x32xf32>
    %c7_i32 = arith.constant 7 : i32
    %757 = arith.index_cast %c7_i32 : i32 to index
    %c0_157 = arith.constant 0 : index
    %c0_158 = arith.constant 0 : index
    %758 = vector.load %arg0[%757, %c0_157, %c0_158] : memref<8x16x4xf32, #tpu.memory_space<vmem>>, vector<1x16x4xf32>
    %759 = vector.shape_cast %758 : vector<1x16x4xf32> to vector<16x4xf32>
    %760 = arith.index_cast %c7_i32 : i32 to index
    %c0_159 = arith.constant 0 : index
    %c0_160 = arith.constant 0 : index
    %761 = vector.load %arg1[%760, %c0_159, %c0_160] : memref<8x8x16xf32, #tpu.memory_space<vmem>>, vector<1x8x16xf32>
    %762 = vector.shape_cast %761 : vector<1x8x16xf32> to vector<8x16xf32>
    %763 = arith.index_cast %c7_i32 : i32 to index
    %c0_161 = arith.constant 0 : index
    %c0_162 = arith.constant 0 : index
    %764 = vector.load %arg2[%763, %c0_161, %c0_162] : memref<8x16x8xf32, #tpu.memory_space<vmem>>, vector<1x16x8xf32>
    %765 = vector.shape_cast %764 : vector<1x16x8xf32> to vector<16x8xf32>
    %cst_163 = arith.constant dense<0.000000e+00> : vector<8x4xf32>
    %766 = tpu.matmul %762, %759, %cst_163 {dimension_numbers = #tpu.dot_dimension_numbers<[1], [0], [0], [1], [0, 0, 1, 1], [], []>} : vector<8x16xf32>, vector<16x4xf32>, vector<8x4xf32> -> vector<8x4xf32>
    %767 = tpu.concatenate %766, %692 in 1 : vector<8x4xf32>, vector<8x32xf32> -> vector<8x36xf32>
    %cst_164 = arith.constant dense<0.000000e+00> : vector<8x192xf32>
    %768 = tpu.matmul %767, %0, %cst_164 {dimension_numbers = #tpu.dot_dimension_numbers<[1], [0], [0], [1], [0, 0, 1, 1], [], []>} : vector<8x36xf32>, vector<36x192xf32>, vector<8x192xf32> -> vector<8x192xf32>
    %769 = arith.addf %768, %5 : vector<8x192xf32>
    %770 = vector.extract_strided_slice %769 {offsets = [0, 0], sizes = [8, 96], strides = [1, 1]} : vector<8x192xf32> to vector<8x96xf32>
    %771 = vector.extract_strided_slice %769 {offsets = [0, 96], sizes = [8, 96], strides = [1, 1]} : vector<8x192xf32> to vector<8x96xf32>
    %772 = vector.extract_strided_slice %770 {offsets = [0, 0], sizes = [8, 32], strides = [1, 1]} : vector<8x96xf32> to vector<8x32xf32>
    %773 = vector.extract_strided_slice %771 {offsets = [0, 0], sizes = [8, 32], strides = [1, 1]} : vector<8x96xf32> to vector<8x32xf32>
    %774 = arith.addf %772, %773 : vector<8x32xf32>
    %775 = arith.negf %774 : vector<8x32xf32>
    %776 = math.exp %775 : vector<8x32xf32>
    %cst_165 = arith.constant 1.000000e+00 : f32
    %777 = vector.broadcast %cst_165 : f32 to vector<8x32xf32>
    %778 = arith.addf %777, %776 : vector<8x32xf32>
    %779 = arith.divf %777, %778 : vector<8x32xf32>
    %780 = vector.extract_strided_slice %770 {offsets = [0, 32], sizes = [8, 32], strides = [1, 1]} : vector<8x96xf32> to vector<8x32xf32>
    %781 = vector.extract_strided_slice %771 {offsets = [0, 32], sizes = [8, 32], strides = [1, 1]} : vector<8x96xf32> to vector<8x32xf32>
    %782 = arith.addf %780, %781 : vector<8x32xf32>
    %783 = arith.negf %782 : vector<8x32xf32>
    %784 = math.exp %783 : vector<8x32xf32>
    %cst_166 = arith.constant 1.000000e+00 : f32
    %785 = vector.broadcast %cst_166 : f32 to vector<8x32xf32>
    %786 = arith.addf %785, %784 : vector<8x32xf32>
    %787 = arith.divf %785, %786 : vector<8x32xf32>
    %788 = vector.extract_strided_slice %770 {offsets = [0, 64], sizes = [8, 32], strides = [1, 1]} : vector<8x96xf32> to vector<8x32xf32>
    %789 = vector.extract_strided_slice %771 {offsets = [0, 64], sizes = [8, 32], strides = [1, 1]} : vector<8x96xf32> to vector<8x32xf32>
    %790 = arith.mulf %779, %789 : vector<8x32xf32>
    %791 = arith.addf %788, %790 : vector<8x32xf32>
    %792 = math.tanh %791 : vector<8x32xf32>
    %cst_167 = arith.constant 1.000000e+00 : f32
    %793 = vector.broadcast %cst_167 : f32 to vector<8x32xf32>
    %794 = arith.subf %793, %787 : vector<8x32xf32>
    %795 = arith.mulf %794, %792 : vector<8x32xf32>
    %796 = arith.mulf %787, %692 : vector<8x32xf32>
    %797 = arith.addf %795, %796 : vector<8x32xf32>
    %798 = tpu.concatenate %766, %797 in 1 : vector<8x4xf32>, vector<8x32xf32> -> vector<8x36xf32>
    %cst_168 = arith.constant dense<0.000000e+00> : vector<16x36xf32>
    %799 = tpu.matmul %765, %798, %cst_168 {dimension_numbers = #tpu.dot_dimension_numbers<[1], [0], [0], [1], [0, 0, 1, 1], [], []>} : vector<16x8xf32>, vector<8x36xf32>, vector<16x36xf32> -> vector<16x36xf32>
    %800 = tpu.concatenate %799, %725 in 1 : vector<16x36xf32>, vector<16x32xf32> -> vector<16x68xf32>
    %cst_169 = arith.constant dense<0.000000e+00> : vector<16x192xf32>
    %801 = tpu.matmul %800, %1, %cst_169 {dimension_numbers = #tpu.dot_dimension_numbers<[1], [0], [0], [1], [0, 0, 1, 1], [], []>} : vector<16x68xf32>, vector<68x192xf32>, vector<16x192xf32> -> vector<16x192xf32>
    %802 = arith.addf %801, %8 : vector<16x192xf32>
    %803 = vector.extract_strided_slice %802 {offsets = [0, 0], sizes = [16, 96], strides = [1, 1]} : vector<16x192xf32> to vector<16x96xf32>
    %804 = vector.extract_strided_slice %802 {offsets = [0, 96], sizes = [16, 96], strides = [1, 1]} : vector<16x192xf32> to vector<16x96xf32>
    %805 = vector.extract_strided_slice %803 {offsets = [0, 0], sizes = [16, 32], strides = [1, 1]} : vector<16x96xf32> to vector<16x32xf32>
    %806 = vector.extract_strided_slice %804 {offsets = [0, 0], sizes = [16, 32], strides = [1, 1]} : vector<16x96xf32> to vector<16x32xf32>
    %807 = arith.addf %805, %806 : vector<16x32xf32>
    %808 = arith.negf %807 : vector<16x32xf32>
    %809 = math.exp %808 : vector<16x32xf32>
    %cst_170 = arith.constant 1.000000e+00 : f32
    %810 = vector.broadcast %cst_170 : f32 to vector<16x32xf32>
    %811 = arith.addf %810, %809 : vector<16x32xf32>
    %812 = arith.divf %810, %811 : vector<16x32xf32>
    %813 = vector.extract_strided_slice %803 {offsets = [0, 32], sizes = [16, 32], strides = [1, 1]} : vector<16x96xf32> to vector<16x32xf32>
    %814 = vector.extract_strided_slice %804 {offsets = [0, 32], sizes = [16, 32], strides = [1, 1]} : vector<16x96xf32> to vector<16x32xf32>
    %815 = arith.addf %813, %814 : vector<16x32xf32>
    %816 = arith.negf %815 : vector<16x32xf32>
    %817 = math.exp %816 : vector<16x32xf32>
    %cst_171 = arith.constant 1.000000e+00 : f32
    %818 = vector.broadcast %cst_171 : f32 to vector<16x32xf32>
    %819 = arith.addf %818, %817 : vector<16x32xf32>
    %820 = arith.divf %818, %819 : vector<16x32xf32>
    %821 = vector.extract_strided_slice %803 {offsets = [0, 64], sizes = [16, 32], strides = [1, 1]} : vector<16x96xf32> to vector<16x32xf32>
    %822 = vector.extract_strided_slice %804 {offsets = [0, 64], sizes = [16, 32], strides = [1, 1]} : vector<16x96xf32> to vector<16x32xf32>
    %823 = arith.mulf %812, %822 : vector<16x32xf32>
    %824 = arith.addf %821, %823 : vector<16x32xf32>
    %825 = math.tanh %824 : vector<16x32xf32>
    %cst_172 = arith.constant 1.000000e+00 : f32
    %826 = vector.broadcast %cst_172 : f32 to vector<16x32xf32>
    %827 = arith.subf %826, %820 : vector<16x32xf32>
    %828 = arith.mulf %827, %825 : vector<16x32xf32>
    %829 = arith.mulf %820, %725 : vector<16x32xf32>
    %830 = arith.addf %828, %829 : vector<16x32xf32>
    %831 = tpu.concatenate %759, %756 in 1 : vector<16x4xf32>, vector<16x32xf32> -> vector<16x36xf32>
    %cst_173 = arith.constant dense<0.000000e+00> : vector<16x192xf32>
    %832 = tpu.matmul %831, %2, %cst_173 {dimension_numbers = #tpu.dot_dimension_numbers<[1], [0], [0], [1], [0, 0, 1, 1], [], []>} : vector<16x36xf32>, vector<36x192xf32>, vector<16x192xf32> -> vector<16x192xf32>
    %833 = arith.addf %832, %11 : vector<16x192xf32>
    %834 = vector.extract_strided_slice %833 {offsets = [0, 0], sizes = [16, 96], strides = [1, 1]} : vector<16x192xf32> to vector<16x96xf32>
    %835 = vector.extract_strided_slice %833 {offsets = [0, 96], sizes = [16, 96], strides = [1, 1]} : vector<16x192xf32> to vector<16x96xf32>
    %836 = vector.extract_strided_slice %834 {offsets = [0, 0], sizes = [16, 32], strides = [1, 1]} : vector<16x96xf32> to vector<16x32xf32>
    %837 = vector.extract_strided_slice %835 {offsets = [0, 0], sizes = [16, 32], strides = [1, 1]} : vector<16x96xf32> to vector<16x32xf32>
    %838 = arith.addf %836, %837 : vector<16x32xf32>
    %839 = arith.negf %838 : vector<16x32xf32>
    %840 = math.exp %839 : vector<16x32xf32>
    %cst_174 = arith.constant 1.000000e+00 : f32
    %841 = vector.broadcast %cst_174 : f32 to vector<16x32xf32>
    %842 = arith.addf %841, %840 : vector<16x32xf32>
    %843 = arith.divf %841, %842 : vector<16x32xf32>
    %844 = vector.extract_strided_slice %834 {offsets = [0, 32], sizes = [16, 32], strides = [1, 1]} : vector<16x96xf32> to vector<16x32xf32>
    %845 = vector.extract_strided_slice %835 {offsets = [0, 32], sizes = [16, 32], strides = [1, 1]} : vector<16x96xf32> to vector<16x32xf32>
    %846 = arith.addf %844, %845 : vector<16x32xf32>
    %847 = arith.negf %846 : vector<16x32xf32>
    %848 = math.exp %847 : vector<16x32xf32>
    %cst_175 = arith.constant 1.000000e+00 : f32
    %849 = vector.broadcast %cst_175 : f32 to vector<16x32xf32>
    %850 = arith.addf %849, %848 : vector<16x32xf32>
    %851 = arith.divf %849, %850 : vector<16x32xf32>
    %852 = vector.extract_strided_slice %834 {offsets = [0, 64], sizes = [16, 32], strides = [1, 1]} : vector<16x96xf32> to vector<16x32xf32>
    %853 = vector.extract_strided_slice %835 {offsets = [0, 64], sizes = [16, 32], strides = [1, 1]} : vector<16x96xf32> to vector<16x32xf32>
    %854 = arith.mulf %843, %853 : vector<16x32xf32>
    %855 = arith.addf %852, %854 : vector<16x32xf32>
    %856 = math.tanh %855 : vector<16x32xf32>
    %cst_176 = arith.constant 1.000000e+00 : f32
    %857 = vector.broadcast %cst_176 : f32 to vector<16x32xf32>
    %858 = arith.subf %857, %851 : vector<16x32xf32>
    %859 = arith.mulf %858, %856 : vector<16x32xf32>
    %860 = arith.mulf %851, %756 : vector<16x32xf32>
    %861 = arith.addf %859, %860 : vector<16x32xf32>
    %c8_i32 = arith.constant 8 : i32
    %862 = tpu.concatenate %799, %830, %861 in 1 : vector<16x36xf32>, vector<16x32xf32>, vector<16x32xf32> -> vector<16x100xf32>
    %c0_177 = arith.constant 0 : index
    %c0_178 = arith.constant 0 : index
    %863 = vector.load %arg12[%c0_177, %c0_178] : memref<16x100xf32, #tpu.memory_space<vmem>>, vector<16x100xf32>
    tpu.vector_store %arg12[%c0_177, %c0_178], %862 {strides = array<i32>} : memref<16x100xf32, #tpu.memory_space<vmem>>, vector<16x100xf32>,
    return
  }
}

</mosaic_0001>

<bundles_post_ra>
// kernel: tpu_custom_call.1
= control target key start
LH: loop header
LB: loop body
LE: loop exit
PB: predicated region body
PF: predicated region fallthrough
CT: control target
= control target key end

     0   :  { %17 = vsyncpa [#allocation3], 0  ;;  %s8172_s0 = inlined_call_operand.vmem [shape: f32[8,16,4], index: 0, kind: input, shape index: {}]   ;;  %s8173_s1 = inlined_call_operand.hbm [shape: f32[8,8,16], index: 1, kind: input, shape index: {}]   ;;  %s8174_s2 = inlined_call_operand.vmem [shape: f32[8,16,8], index: 2, kind: input, shape index: {}]   ;;  %s8175_s3 = inlined_call_operand.vmem [shape: f32[36,192], index: 3, kind: input, shape index: {}]   ;;  %s8176_s4 = inlined_call_operand.vmem [shape: f32[1,192], index: 4, kind: input, shape index: {}]   ;;  %s8177_s5 = inlined_call_operand.vmem [shape: f32[68,192], index: 5, kind: input, shape index: {}]   ;;  %s8178_s6 = inlined_call_operand.vmem [shape: f32[1,192], index: 6, kind: input, shape index: {}]   ;;  %s8179_s7 = inlined_call_operand.vmem [shape: f32[36,192], index: 7, kind: input, shape index: {}]   ;;  %s8180_s8 = inlined_call_operand.vmem [shape: f32[1,192], index: 8, kind: input, shape index: {}]   ;;  %s8181_s9 = inlined_call_operand.vmem [shape: f32[1,32], index: 9, kind: input, shape index: {}]   ;;  %s8182_s10 = inlined_call_operand.vmem [shape: f32[1,32], index: 10, kind: input, shape index: {}]   ;;  %s8183_s11 = inlined_call_operand.vmem [shape: f32[1,32], index: 11, kind: input, shape index: {}]   ;;  %s8184_s12 = inlined_call_operand.hbm [shape: f32[16,100], index: 12, kind: output, shape index: {}]  }
   0x1   :  { %18 = vsyncpa [#allocation4], 0  ;;  %s6355_s21 = smov [#allocation2]   ;;  %s6307_s25 = scalar_lea.hbm %s8173_s1, 1024 }
   0x2   :  { %s26_s22 = sshll.u32 %s6355_s21, 4  ;;  %p6308_p0 = scmp.ne.s32.totalorder %s8173_s1, %s6307_s25  ;;  %s27_s22 = int_to_ptr.vmem [resolvable:$true] %s26_s22 }
   0x3   :  { %p6311_p1 = scmp.lt.u32.totalorder %s6307_s25, %s8173_s1 }
   0x5   :  { %p6313_p2 = pnand %p6311_p1, %p6308_p0 }
   0x7   :  { %6316 = shalt.err (!%p6313_p2)
}
   0x8   :  { %s6317_s30 = scalar_lea.vmem %s27_s22, 1024  ;;  %p6322_p4 = scmp.lt.s32.totalorder %s27_s22, %s27_s22 }
   0x9   :  { %p6318_p3 = scmp.ne.s32.totalorder %s27_s22, %s6317_s30  ;;  %p6323_p5 = scmp.lt.s32.totalorder %s6317_s30, %s6317_s30 }
   0xb   :  { %p6324_p6 = por %p6323_p5, %p6322_p4 }
   0xd   :  { %p6325_p7 = pnand %p6324_p6, %p6318_p3 }
   0xf   :  { %6328 = shalt.err (!%p6325_p7)
}
  0x10   :  { %s6356_s13 = smov 128   ;;  %s6357_s14 = smov 8  }
  0x11   :  { %32 = dma.hbm_to_vmem [thread:$0]  %s8173_s1, 1024, %s27_s22, [#allocation3], %s6356_s13, %s6356_s13, %s6357_s14  }
  0x12   :  { %6351 = dma.done.wait [#allocation3], 1024  }
  0x13   :  { %6352 = vsyncadd [#allocation3], 4294966272  ;;  %v6358_v0 = vmov 0.0|0.0   ;;  %vm6359_vm0 = vmmov 0   ;;  %v6360_v1 = vmov 0.0   ;;  %v6455_v2 = vld [vmem:[%s8172_s0] sm:$0xff]  ;;  %v96_v25 = vlaneseq }
  0x14   :  { %5602 = vmatprep.subr.bf16.mxu0 %v6358_v0  ;;  %5510 = vmatprep.mubr.msk.f32.mxu0 %vm6359_vm0, %v6360_v1  ;;  %v6460_v3 = vld [vmem:[%s8172_s0 + $0x8] sm:$0xff]  ;;  %v150_v5 = vld [vmem:[#allocation2] sm:$0xff]  ;;  %v5237_v6 = vld [vmem:[%s8183_s11] ss:$0 sm:$0xff]  ;;  %s6361_s26 = smov 4   ;;  %vm153_vm1 = vcmask 130048  }
  0x15   :  { %307 = vmatprep.mubr.f32.mxu1 %v6360_v1  ;;  %v5603_v4 = vpack.c.bf16 %v6460_v3, %v6455_v2  ;;  %v57_v7 = vld [vmem:[%s8175_s3 + $0x8] sm:$0xff]  ;;  %v59_v8 = vld [vmem:[%s8175_s3 + $0x18] sm:$0xff]  ;;  %227 = vrot.lane.b32.xlu0 %v5237_v6, %s6361_s26  ;;  %v56_v10 = vld [vmem:[%s8175_s3] sm:$0xff]  ;;  %vm236_vm2 = vcmask 1043456   ;;  %vm230_vm3 = vcmask 31744   ;;  %vm232_vm4 = vcmask 293888  }
  0x16   :  { %v6474_v9 = vpack.c.bf16 %v59_v8, %v57_v7  ;;  %v58_v11 = vld [vmem:[%s8175_s3 + $0x10] sm:$0xff]  ;;  %v61_v12 = vld [vmem:[%s8175_s3 + $0x28] sm:$0xff]  ;;  %v63_v14 = vld [vmem:[%s8175_s3 + $0x38] sm:$0xff]  ;;  %v97_v26 = vshrl.u32 %v96_v25, 7  ;;  %s6362_s28 = smov 32   ;;  %s6364_s11 = smov 64  }
  0x17   :  { %5604 = vmatpush3.bf16.msra.mxu0 %v5603_v4  ;;  %v6485_v13 = vpack.c.bf16 %v58_v11, %v56_v10  ;;  %v60_v15 = vld [vmem:[%s8175_s3 + $0x20] sm:$0xff]  ;;  %v62_v16 = vld [vmem:[%s8175_s3 + $0x30] sm:$0xff]  ;;  %v6497_v17 = vpack.c.bf16 %v63_v14, %v61_v12  ;;  %v6508_v19 = vld [vmem:[%s8175_s3 + $0x48] sm:$0xf]  ;;  %vm362_vm5 = vcmask 64512   ;;  %s6365_s25 = smov 100  }
  0x18   :  { %5606 = vmatprep.subr.bf16.mxu1 %v6474_v9  ;;  %v6500_v18 = vpack.c.bf16 %v62_v16, %v60_v15  ;;  %v6515_v20 = vld [vmem:[%s8175_s3 + $0x40] sm:$0xf]  ;;  %v6525_v27 = vsub.s32 0, %v97_v26  ;;  %v6530_v29 = vsub.s32 1, %v97_v26  ;;  %v85_v46 = vld [vmem:[%s8179_s7 + $0x8] sm:$0xff]  ;;  %v87_v47 = vld [vmem:[%s8179_s7 + $0x18] sm:$0xff] }
  0x19   :  { %5608 = vmatpush1.bf16.msra.mxu1 %v6485_v13  ;;  %v94_v28 = vld [vmem:[%s8176_s4] sm:$0x3]  ;;  %s6363_s4 = smov 96   ;;  %v6565_v49 = vpack.c.bf16 %v87_v47, %v85_v46  ;;  %v86_v50 = vld [vmem:[%s8179_s7 + $0x10] sm:$0xff]  ;;  %v89_v51 = vld [vmem:[%s8179_s7 + $0x28] sm:$0xff]  ;;  %vm449_vm6 = vcmask 556032  }
  0x1a   :  { %5511 = vmatmul.mubr.msk.f32.vlgmr.msra.gmra.mrb[0].mxu0 %vm153_vm1, %v150_v5  ;;  %5610 = vmatprep.subr.bf16.mxu1 %v6497_v17  ;;  %v6533_v30 = vrot.slane %v94_v28, %v6525_v27  ;;  %v6536_v31 = vrot.slane %v94_v28, %v6530_v29  ;;  %v6550_v36 = vld [vmem:[%s8182_s10] ss:$0 sm:$0xff]  ;;  %v91_v52 = vld [vmem:[%s8179_s7 + $0x38] sm:$0xff]  ;;  %v90_v56 = vld [vmem:[%s8179_s7 + $0x30] sm:$0xff]  ;;  %vm5215_vm7 = vcmask 818176  }
  0x1b   :  { %v84_v48 = vld [vmem:[%s8179_s7] sm:$0xff]  ;;  %v6578_v54 = vpack.c.bf16 %v91_v52, %v89_v51  ;;  %v6594_v59 = vld [vmem:[%s8179_s7 + $0x48] sm:$0xf]  ;;  %v6599_v61 = vld [vmem:[%s8172_s0 + $0x10] sm:$0xff] }
  0x1c   :  { %v6576_v53 = vpack.c.bf16 %v86_v50, %v84_v48  ;;  %v88_v55 = vld [vmem:[%s8179_s7 + $0x20] sm:$0xff]  ;;  %v6604_v62 = vld [vmem:[%s8172_s0 + $0x18] sm:$0xff]  ;;  %v71_v46 = vld [vmem:[%s8177_s5 + $0x28] sm:$0xff] }
  0x1d   :  { %5612 = vmatpush1.bf16.msra.mxu1 %v6500_v18  ;;  %v6588_v58 = vpack.c.bf16 %v90_v56, %v88_v55  ;;  %v6612_v63 = vld [vmem:[%s8179_s7 + $0x40] sm:$0xf]  ;;  %v5638_v5 = vpack.c.bf16 %v6604_v62, %v6599_v61  ;;  %v73_v47 = vld [vmem:[%s8177_s5 + $0x38] sm:$0xff]  ;;  %v152_v52 = vld [vmem:[%s8174_s2 + $0x8] sm:$0xff] }
  0x1e   :  { %5239 = vmatprep.subr.msk.mxu1 %vm236_vm2, %v6508_v19  ;;  %v151_v26 = vld [vmem:[%s8174_s2] sm:$0xff]  ;;  %v6696_v56 = vpack.c.bf16 %v73_v47, %v71_v46 }
  0x1f   :  { %5515 = vmatprep.mubr.msk.f32.mxu0 %vm362_vm5, %v151_v26  ;;  %v6758_v26 = vld [vmem:[%s8177_s5 + $0x80] sm:$0xf] }
  0x21   :  { %5240 = vmatpush1.msk.msra.mxu1 %vm236_vm2, %v6515_v20 }
  0x22   :  { %5630 = vmatprep.subr.bf16.mxu1 %v6565_v49 }
  0x87   :  { %v228_v21 = vpop.permute.xlu0 %227 }
  0xed   :  { %v6519_v22 = vpop.f32.mrb[0].mxu0 }
  0xee   :  { %v231_v23 = vsel %vm230_vm3, %v6519_v22, %v228_v21  ;;  %v5512_v24 = vpop.f32.mrb[1].mxu0 }
  0xef   :  { %5241 = vmatmul.mubr.msk.f32.vlgmr.msra.gmra.mrb[0].mxu1 %vm232_vm4, %v231_v23 }
  0xf0   :  { %703 = vmatprep.mubr.f32.mxu1 %v6360_v1  ;;  %5632 = vmatpush1.bf16.msra.mxu1 %v6576_v53 }
  0xf1   :  { %5634 = vmatprep.subr.bf16.mxu1 %v6578_v54 }
  0xf4   :  { %5636 = vmatpush1.bf16.msra.mxu1 %v6588_v58 }
  0xf5   :  { %5254 = vmatprep.subr.msk.mxu1 %vm236_vm2, %v6594_v59 }
  0xf8   :  { %5255 = vmatpush1.msk.msra.mxu1 %vm236_vm2, %v6612_v63 }
  0xf9   :  { %5637 = vmatprep.subr.bf16.mxu1 %v6358_v0 }
 0x1c2   :  { %v309_v32 = vpop.f32.mrb[0].mxu1 }
 0x1c3   :  { %v6539_v33 = vadd.f32 %v309_v32, %v6533_v30  ;;  %v311_v34 = vpop.f32.mrb[1].mxu1 }
 0x1c4   :  { %v312_v35 = vadd.f32 %v311_v34, %v6536_v31 }
 0x1c5   :  { %315 = vrot.lane.b32.xlu0 %v6539_v33, %s6362_s28 }
 0x1c6   :  { %336 = vrot.lane.b32.xlu1 %v312_v35, %s6363_s4 }
 0x1c9   :  { %326 = vrot.lane.b32.xlu0 %v312_v35, %s6362_s28 }
 0x1cd   :  { %352 = vrot.lane.b32.xlu0 %v5237_v6, %s6362_s28 }
 0x1d1   :  { %622 = vrot.lane.b32.xlu0 %v6550_v36, %s6361_s26 }
 0x237   :  { %v316_v37 = vpop.permute.xlu0 %315 }
 0x238   :  { %v318_v38 = vadd.f32 %v316_v37, %v6539_v33  ;;  %v337_v43 = vpop.permute.xlu1 %336  ;;  %v6647_v37 = vld [vmem:[%s8180_s8] sm:$0x3]  ;;  %s6366_s8 = smov 36  }
 0x23a   :  { %v5242_v39 = vmul.f32 -1.442695, %v318_v38 }
 0x23b   :  { %v327_v45 = vpop.permute.xlu0 %326 }
 0x23c   :  { %5895 = vpow2.f32 %v5242_v39  ;;  %v329_v11 = vadd.f32 %v327_v45, %v6539_v33  ;;  %v6653_v39 = vrot.slane %v6647_v37, %v6525_v27  ;;  %v68_v45 = vld [vmem:[%s8177_s5 + $0x10] sm:$0xff] }
 0x23e   :  { %v5243_v12 = vmul.f32 -1.442695, %v329_v11 }
 0x23f   :  { %v353_v57 = vpop.permute.xlu0 %352 }
 0x243   :  { %v623_v60 = vpop.permute.xlu0 %622 }
 0x244   :  { %v625_v4 = vsel %vm230_vm3, %v6455_v2, %v623_v60  ;;  %v626_v6 = vsel %vm230_vm3, %v6460_v3, %v623_v60  ;;  %v803_v2 = vld [vmem:[#allocation2 + $0x8] sm:$0xff]  ;;  %v72_v60 = vld [vmem:[%s8177_s5 + $0x30] sm:$0xff] }
 0x245   :  { %5256 = vmatmul.mubr.msk.f32.vlgmr.msra.gmra.mrb[2].mxu1 %vm232_vm4, %v625_v4  ;;  %v77_v4 = vld [vmem:[%s8177_s5 + $0x58] sm:$0xff] }
 0x246   :  { %v5896_v40 = vpop.eup %5895  ;;  %709 = vmatprep.mubr.f32.mxu1 %v6360_v1  ;;  %5639 = vmatpush3.bf16.msra.mxu1 %v5638_v5 }
 0x247   :  { %v322_v41 = vadd.f32 1.0, %v5896_v40  ;;  %v6660_v40 = vld [vmem:[%s8181_s9] ss:$0 sm:$0xff] }
 0x249   :  { %5897 = vrcp.f32 %v322_v41  ;;  %5257 = vmatmul.mubr.msk.f32.gmra.mrb[4].mxu1 %vm232_vm4, %v626_v6 }
 0x24a   :  { %5522 = vmatprep.mubr.msk.f32.mxu1 %vm6359_vm0, %v6360_v1 }
 0x24d   :  { %5523 = vmatmul.mubr.msk.f32.vlgmr.msra.gmra.mrb[6].mxu1 %vm153_vm1, %v803_v2  ;;  %v74_v2 = vld [vmem:[%s8177_s5 + $0x40] sm:$0xff] }
 0x253   :  { %v5898_v42 = vpop.eup %5897 }
 0x254   :  { %v339_v44 = vmul.f32 %v5898_v42, %v337_v43  ;;  %v67_v42 = vld [vmem:[%s8177_s5 + $0x8] sm:$0xff]  ;;  %v69_v43 = vld [vmem:[%s8177_s5 + $0x18] sm:$0xff] }
 0x255   :  { %v6687_v50 = vpack.c.bf16 %v69_v43, %v67_v42 }
 0x256   :  { %341 = vrot.lane.b32.xlu1 %v339_v44, %s6364_s11  ;;  %v66_v44 = vld [vmem:[%s8177_s5] sm:$0xff] }
 0x257   :  { %v6694_v55 = vpack.c.bf16 %v68_v45, %v66_v44 }
 0x2c8   :  { %v342_v7 = vpop.permute.xlu1 %341 }
 0x2c9   :  { %v344_v8 = vadd.f32 %v342_v7, %v6539_v33  ;;  %v76_v7 = vld [vmem:[%s8177_s5 + $0x50] sm:$0xff] }
 0x2ca   :  { %v6732_v11 = vpack.c.bf16 %v76_v7, %v74_v2 }
 0x2cb   :  { %5899 = vtanh.f32 %v344_v8  ;;  %v79_v8 = vld [vmem:[%s8177_s5 + $0x68] sm:$0xff] }
 0x2cc   :  { %5901 = vpow2.f32 %v5243_v12 }
 0x2d5   :  { %v5900_v10 = vpop.eup %5899 }
 0x2d6   :  { %348 = vrot.lane.b32.xlu1 %v5900_v10, %s6363_s4  ;;  %v5902_v3 = vpop.eup %5901  ;;  %v81_v10 = vld [vmem:[%s8177_s5 + $0x78] sm:$0xff] }
 0x2d7   :  { %v333_v14 = vadd.f32 1.0, %v5902_v3  ;;  %v6735_v12 = vpack.c.bf16 %v81_v10, %v79_v8  ;;  %v78_v3 = vld [vmem:[%s8177_s5 + $0x60] sm:$0xff] }
 0x2d9   :  { %5903 = vrcp.f32 %v333_v14  ;;  %v80_v14 = vld [vmem:[%s8177_s5 + $0x70] sm:$0xff] }
 0x2e3   :  { %v5904_v28 = vpop.eup %5903 }
 0x2e4   :  { %v346_v32 = vsub.f32 1.0, %v5904_v28  ;;  %v355_v34 = vmul.f32 %v5904_v28, %v353_v57  ;;  %v70_v57 = vld [vmem:[%s8177_s5 + $0x20] sm:$0xff] }
 0x2e5   :  { %v6713_v5 = vpack.c.bf16 %v72_v60, %v70_v57 }
 0x318   :  { %v705_v15 = vpop.f32.mrb[2].mxu1 }
 0x319   :  { %v6632_v16 = vpop.f32.mrb[3].mxu1  ;;  %v6663_v41 = vadd.f32 %v705_v15, %v6653_v39  ;;  %v6744_v15 = vpack.c.bf16 %v80_v14, %v78_v3 }
 0x31c   :  { %v6634_v21 = vpop.f32.mrb[4].mxu1 }
 0x31d   :  { %v6636_v23 = vpop.f32.mrb[5].mxu1  ;;  %v6810_v60 = vadd.f32 %v6634_v21, %v6653_v39 }
 0x320   :  { %v6638_v24 = vpop.f32.mrb[6].mxu1 }
 0x321   :  { %v5524_v25 = vpop.f32.mrb[7].mxu1 }
 0x322   :  { %v6751_v25 = vld [vmem:[%s8177_s5 + $0x88] sm:$0xf] }
 0x348   :  { %v349_v33 = vpop.permute.xlu1 %348 }
 0x349   :  { %v351_v35 = vmul.f32 %v349_v33, %v346_v32 }
 0x34b   :  { %v6649_v38 = vadd.f32 %v355_v34, %v351_v35 }
 0x34d   :  { %358 = vrot.lane.b32.xlu1 %v6649_v38, %s6365_s25 }
 0x351   :  { %444 = vrot.lane.b32.xlu1 %v6660_v40, %s6366_s8 }
 0x355   :  { %718 = vrot.lane.b32.xlu1 %v6663_v41, %s6362_s28 }
 0x3bf   :  { %v359_v48 = vpop.permute.xlu1 %358 }
 0x3c0   :  { %v361_v51 = vsel %vm230_vm3, %v6519_v22, %v359_v48  ;;  %v75_v22 = vld [vmem:[%s8177_s5 + $0x48] sm:$0xff]  ;;  %v880_v42 = vsel %vm230_vm3, %v6638_v24, %v359_v48 }
 0x3c1   :  { %5513 = vmatprep.subr.mxu0 %v361_v51  ;;  %v6717_v6 = vpack.c.bf16 %v77_v4, %v75_v22 }
 0x3c2   :  { %5514 = vmatpush3.msra.mxu0 %v361_v51 }
 0x3c3   :  { %5516 = vmatmul.mubr.msk.f32.vlgmr.msra.gmra.mrb[2].mxu0 %vm362_vm5, %v152_v52  ;;  %5614 = vmatprep.subr.bf16.mxu0 %v6687_v50  ;;  %v445_v28 = vpop.permute.xlu1 %444  ;;  %v6802_v52 = vrot.slane %v6647_v37, %v6530_v29 }
 0x3c4   :  { %5616 = vmatpush1.bf16.msra.mxu0 %v6694_v55  ;;  %526 = vmatprep.mubr.f32.mxu0 %v6360_v1 }
 0x3c5   :  { %5618 = vmatprep.subr.bf16.mxu0 %v6696_v56  ;;  %v714_v22 = vadd.f32 %v6636_v23, %v6802_v52  ;;  %v708_v37 = vadd.f32 %v6632_v16, %v6802_v52 }
 0x3c7   :  { %v719_v4 = vpop.permute.xlu1 %718 }
 0x3c8   :  { %5620 = vmatpush1.bf16.msra.mxu0 %v6713_v5  ;;  %v724_v2 = vadd.f32 %v719_v4, %v6663_v41 }
 0x3c9   :  { %5622 = vmatprep.subr.bf16.mxu0 %v6717_v6 }
 0x3ca   :  { %v5258_v7 = vmul.f32 -1.442695, %v724_v2 }
 0x3cc   :  { %5624 = vmatpush1.bf16.msra.mxu0 %v6732_v11  ;;  %5905 = vpow2.f32 %v5258_v7 }
 0x3cd   :  { %5626 = vmatprep.subr.bf16.mxu0 %v6735_v12 }
 0x3d0   :  { %5628 = vmatpush1.bf16.msra.mxu0 %v6744_v15 }
 0x3d1   :  { %5246 = vmatprep.subr.msk.mxu0 %vm236_vm2, %v6751_v25 }
 0x3d4   :  { %5247 = vmatpush1.msk.msra.mxu0 %vm236_vm2, %v6758_v26 }
 0x3d5   :  { %5641 = vmatprep.subr.bf16.mxu0 %v6474_v9 }
 0x3d6   :  { %v5906_v21 = vpop.eup %5905 }
 0x3d7   :  { %v732_v8 = vadd.f32 1.0, %v5906_v21 }
 0x3d9   :  { %5907 = vrcp.f32 %v732_v8 }
 0x3e3   :  { %v5908_v16 = vpop.eup %5907 }
 0x496   :  { %v5517_v32 = vpop.f32.mrb[2].mxu0 }
 0x497   :  { %v435_v33 = vpop.f32.mrb[3].mxu0  ;;  %v448_v35 = vsel %vm232_vm4, %v5517_v32, %v445_v28 }
 0x498   :  { %v447_v34 = vsel %vm232_vm4, %v435_v33, %v445_v28 }
 0x499   :  { %5248 = vmatmul.mubr.msk.f32.vlgmr.msra.gmra.mrb[4].mxu0 %vm449_vm6, %v447_v34 }
 0x49a   :  { %5643 = vmatpush1.bf16.msra.mxu0 %v6485_v13  ;;  %532 = vmatprep.mubr.f32.mxu0 %v6360_v1 }
 0x49b   :  { %5645 = vmatprep.subr.bf16.mxu0 %v6497_v17 }
 0x49d   :  { %5249 = vmatmul.mubr.msk.f32.gmra.mrb[6].mxu0 %vm449_vm6, %v448_v35 }
 0x49e   :  { %5647 = vmatpush1.bf16.msra.mxu0 %v6500_v18  ;;  %948 = vmatprep.mubr.f32.mxu0 %v6360_v1 }
 0x49f   :  { %5267 = vmatprep.subr.msk.mxu0 %vm236_vm2, %v6508_v19 }
 0x4a2   :  { %5268 = vmatpush1.msk.msra.mxu0 %vm236_vm2, %v6515_v20 }
 0x4a3   :  { %5269 = vmatmul.mubr.msk.f32.vlgmr.msra.gmra.mrb[8].mxu0 %vm232_vm4, %v880_v42  ;;  %5665 = vmatprep.subr.bf16.mxu0 %v6565_v49 }
 0x4a4   :  { %5667 = vmatpush1.bf16.msra.mxu0 %v6576_v53  ;;  %1334 = vmatprep.mubr.f32.mxu0 %v6360_v1 }
 0x4a5   :  { %5669 = vmatprep.subr.bf16.mxu0 %v6578_v54 }
 0x4a8   :  { %5671 = vmatpush1.bf16.msra.mxu0 %v6588_v58 }
 0x4a9   :  { %5282 = vmatprep.subr.msk.mxu0 %vm236_vm2, %v6594_v59 }
 0x4ac   :  { %5283 = vmatpush1.msk.msra.mxu0 %vm236_vm2, %v6612_v63 }
 0x4ad   :  { %5672 = vmatprep.subr.bf16.mxu0 %v6358_v0 }
 0x56c   :  { %v6789_v43 = vpop.f32.mrb[4].mxu0 }
 0x56d   :  { %v6791_v44 = vpop.f32.mrb[5].mxu0 }
 0x570   :  { %v6793_v45 = vpop.f32.mrb[6].mxu0 }
 0x571   :  { %v6795_v46 = vpop.f32.mrb[7].mxu0 }
 0x576   :  { %v950_v47 = vpop.f32.mrb[8].mxu0 }
 0x577   :  { %v6798_v48 = vadd.f32 %v950_v47, %v6533_v30  ;;  %v952_v51 = vpop.f32.mrb[9].mxu0 }
 0x578   :  { %v953_v57 = vadd.f32 %v952_v51, %v6536_v31 }
 0x579   :  { %956 = vrot.lane.b32.xlu0 %v6798_v48, %s6362_s28 }
 0x57a   :  { %977 = vrot.lane.b32.xlu1 %v953_v57, %s6363_s4 }
 0x57d   :  { %720 = vrot.lane.b32.xlu0 %v6810_v60, %s6362_s28 }
 0x57e   :  { %762 = vrot.lane.b32.xlu1 %v714_v22, %s6363_s4 }
 0x581   :  { %760 = vrot.lane.b32.xlu0 %v708_v37, %s6363_s4 }
 0x5eb   :  { %v957_v10 = vpop.permute.xlu0 %956 }
 0x5ec   :  { %v959_v23 = vadd.f32 %v957_v10, %v6798_v48  ;;  %v978_v4 = vpop.permute.xlu1 %977 }
 0x5ee   :  { %v5270_v3 = vmul.f32 -1.442695, %v959_v23 }
 0x5ef   :  { %v721_v14 = vpop.permute.xlu0 %720 }
 0x5f0   :  { %5909 = vpow2.f32 %v5270_v3  ;;  %v725_v28 = vadd.f32 %v721_v14, %v6810_v60  ;;  %v763_v8 = vpop.permute.xlu1 %762 }
 0x5f2   :  { %v5259_v32 = vmul.f32 -1.442695, %v725_v28 }
 0x5f3   :  { %v761_v33 = vpop.permute.xlu0 %760 }
 0x5f4   :  { %5911 = vpow2.f32 %v5259_v32  ;;  %v766_v34 = vmul.f32 %v5908_v16, %v761_v33 }
 0x5f6   :  { %770 = vrot.lane.b32.xlu1 %v766_v34, %s6364_s11 }
 0x5fa   :  { %v5910_v35 = vpop.eup %5909  ;;  %967 = vrot.lane.b32.xlu1 %v953_v57, %s6362_s28 }
 0x5fb   :  { %v963_v42 = vadd.f32 1.0, %v5910_v35 }
 0x5fd   :  { %5913 = vrcp.f32 %v963_v42 }
 0x5fe   :  { %v5912_v47 = vpop.eup %5911  ;;  %742 = vrot.lane.b32.xlu1 %v714_v22, %s6362_s28 }
 0x5ff   :  { %v733_v51 = vadd.f32 1.0, %v5912_v47 }
 0x601   :  { %5915 = vrcp.f32 %v733_v51 }
 0x607   :  { %v5914_v2 = vpop.eup %5913 }
 0x608   :  { %v980_v7 = vmul.f32 %v5914_v2, %v978_v4 }
 0x60a   :  { %982 = vrot.lane.b32.xlu0 %v980_v7, %s6364_s11 }
 0x60b   :  { %v5916_v21 = vpop.eup %5915 }
 0x60c   :  { %v767_v10 = vmul.f32 %v5916_v21, %v763_v8 }
 0x60e   :  { %772 = vrot.lane.b32.xlu0 %v767_v10, %s6364_s11 }
 0x612   :  { %740 = vrot.lane.b32.xlu0 %v708_v37, %s6362_s28  ;;  %v106_v37 = vld [vmem:[%s8178_s6] sm:$0x3] }
 0x613   :  { %v6838_v33 = vrot.slane %v106_v37, %v6525_v27 }
 0x615   :  { %v6845_v35 = vadd.f32 %v6789_v43, %v6838_v33  ;;  %v6849_v42 = vadd.f32 %v6793_v45, %v6838_v33 }
 0x668   :  { %v771_v57 = vpop.permute.xlu1 %770 }
 0x669   :  { %v776_v23 = vadd.f32 %v771_v57, %v6663_v41 }
 0x66b   :  { %5917 = vtanh.f32 %v776_v23 }
 0x66c   :  { %v968_v27 = vpop.permute.xlu1 %967 }
 0x66d   :  { %v970_v47 = vadd.f32 %v968_v27, %v6798_v48 }
 0x66f   :  { %v5271_v2 = vmul.f32 -1.442695, %v970_v47 }
 0x675   :  { %v5918_v3 = vpop.eup %5917 }
 0x676   :  { %784 = vrot.lane.b32.xlu1 %v5918_v3, %s6363_s4 }
 0x67c   :  { %v983_v22 = vpop.permute.xlu0 %982 }
 0x67d   :  { %v985_v14 = vadd.f32 %v983_v22, %v6798_v48 }
 0x67f   :  { %5919 = vtanh.f32 %v985_v14 }
 0x680   :  { %v773_v28 = vpop.permute.xlu0 %772 }
 0x681   :  { %v777_v32 = vadd.f32 %v773_v28, %v6810_v60 }
 0x683   :  { %5921 = vtanh.f32 %v777_v32 }
 0x684   :  { %v741_v51 = vpop.permute.xlu0 %740  ;;  %5923 = vpow2.f32 %v5271_v2 }
 0x685   :  { %v746_v43 = vadd.f32 %v741_v51, %v6663_v41 }
 0x687   :  { %v5260_v45 = vmul.f32 -1.442695, %v746_v43 }
 0x689   :  { %v5920_v16 = vpop.eup %5919 }
 0x68a   :  { %989 = vrot.lane.b32.xlu0 %v5920_v16, %s6363_s4 }
 0x68d   :  { %v5922_v34 = vpop.eup %5921 }
 0x68e   :  { %792 = vrot.lane.b32.xlu0 %v6550_v36, %s6362_s28  ;;  %786 = vrot.lane.b32.xlu1 %v5922_v34, %s6363_s4  ;;  %v743_v36 = vpop.permute.xlu1 %742  ;;  %v5924_v21 = vpop.eup %5923 }
 0x68f   :  { %v747_v4 = vadd.f32 %v743_v36, %v6810_v60  ;;  %v974_v10 = vadd.f32 1.0, %v5924_v21 }
 0x691   :  { %v5261_v7 = vmul.f32 -1.442695, %v747_v4 }
 0x692   :  { %541 = vrot.lane.b32.xlu0 %v6845_v35, %s6362_s28  ;;  %543 = vrot.lane.b32.xlu1 %v6849_v42, %s6362_s28 }
 0x693   :  { %5925 = vpow2.f32 %v5261_v7 }
 0x694   :  { %5927 = vpow2.f32 %v5260_v45  ;;  %v6864_v45 = vrot.slane %v106_v37, %v6530_v29 }
 0x695   :  { %5929 = vrcp.f32 %v974_v10 }
 0x696   :  { %v537_v10 = vadd.f32 %v6795_v46, %v6864_v45 }
 0x69d   :  { %v5926_v8 = vpop.eup %5925 }
 0x69e   :  { %v5928_v57 = vpop.eup %5927  ;;  %v755_v23 = vadd.f32 1.0, %v5926_v8 }
 0x69f   :  { %v754_v3 = vadd.f32 1.0, %v5928_v57  ;;  %v5930_v48 = vpop.eup %5929 }
 0x6a0   :  { %5931 = vrcp.f32 %v755_v23  ;;  %v987_v60 = vsub.f32 1.0, %v5930_v48  ;;  %v993_v16 = vmul.f32 %v5930_v48, %v6649_v38  ;;  %v531_v38 = vadd.f32 %v6791_v44, %v6864_v45 }
 0x6a1   :  { %5933 = vrcp.f32 %v754_v3 }
 0x6aa   :  { %v5932_v22 = vpop.eup %5931 }
 0x6ab   :  { %v5934_v14 = vpop.eup %5933  ;;  %v781_v47 = vsub.f32 1.0, %v5932_v22 }
 0x6ac   :  { %v780_v34 = vsub.f32 1.0, %v5934_v14 }
 0x6e8   :  { %v785_v28 = vpop.permute.xlu1 %784 }
 0x6e9   :  { %v790_v4 = vmul.f32 %v785_v28, %v780_v34  ;;  %v6887_v28 = vld [vmem:[%s8172_s0 + $0x20] sm:$0xff] }
 0x6fc   :  { %v990_v41 = vpop.permute.xlu0 %989 }
 0x6fd   :  { %v992_v32 = vmul.f32 %v990_v41, %v987_v60  ;;  %v6892_v41 = vld [vmem:[%s8172_s0 + $0x28] sm:$0xff] }
 0x6ff   :  { %v6859_v27 = vadd.f32 %v993_v16, %v992_v32  ;;  %v5673_v16 = vpack.c.bf16 %v6892_v41, %v6887_v28 }
 0x700   :  { %v793_v36 = vpop.permute.xlu0 %792  ;;  %v787_v51 = vpop.permute.xlu1 %786 }
 0x701   :  { %v795_v2 = vmul.f32 %v5934_v14, %v793_v36  ;;  %v796_v43 = vmul.f32 %v5932_v22, %v793_v36  ;;  %v791_v7 = vmul.f32 %v787_v51, %v781_v47  ;;  %996 = vrot.lane.b32.xlu0 %v6859_v27, %s6365_s25 }
 0x703   :  { %v6866_v21 = vadd.f32 %v796_v43, %v791_v7  ;;  %v6868_v8 = vadd.f32 %v795_v2, %v790_v4 }
 0x704   :  { %v542_v29 = vpop.permute.xlu0 %541  ;;  %v544_v37 = vpop.permute.xlu1 %543 }
 0x705   :  { %1256 = vrot.lane.b32.xlu1 %v6868_v8, %s6365_s25  ;;  %1258 = vrot.lane.b32.xlu0 %v6866_v21, %s6365_s25  ;;  %v547_v57 = vadd.f32 %v542_v29, %v6845_v35  ;;  %v548_v23 = vadd.f32 %v544_v37, %v6849_v42  ;;  %v5265_v37 = vld [vmem:[%s8174_s2 + $0x18] sm:$0xff] }
 0x707   :  { %v5250_v3 = vmul.f32 -1.442695, %v547_v57  ;;  %v5251_v48 = vmul.f32 -1.442695, %v548_v23 }
 0x709   :  { %583 = vrot.lane.b32.xlu1 %v531_v38, %s6363_s4  ;;  %585 = vrot.lane.b32.xlu0 %v537_v10, %s6363_s4  ;;  %5935 = vpow2.f32 %v5250_v3 }
 0x70a   :  { %5937 = vpow2.f32 %v5251_v48 }
 0x713   :  { %v5936_v22 = vpop.eup %5935 }
 0x714   :  { %v5938_v60 = vpop.eup %5937  ;;  %v555_v44 = vadd.f32 1.0, %v5936_v22 }
 0x715   :  { %v556_v14 = vadd.f32 1.0, %v5938_v60 }
 0x716   :  { %5939 = vrcp.f32 %v555_v44 }
 0x717   :  { %5941 = vrcp.f32 %v556_v14 }
 0x720   :  { %v5940_v51 = vpop.eup %5939 }
 0x721   :  { %v5942_v4 = vpop.eup %5941 }
 0x773   :  { %v6882_v46 = vpop.permute.xlu0 %996 }
 0x774   :  { %v999_v32 = vsel %vm230_vm3, %v6638_v24, %v6882_v46 }
 0x775   :  { %5525 = vmatprep.subr.mxu1 %v999_v32 }
 0x776   :  { %5526 = vmatpush3.msra.mxu1 %v999_v32 }
 0x777   :  { %v1259_v34 = vpop.permute.xlu0 %1258  ;;  %v1257_v47 = vpop.permute.xlu1 %1256  ;;  %5649 = vmatprep.subr.bf16.mxu1 %v6687_v50 }
 0x778   :  { %v1262_v36 = vsel %vm230_vm3, %v6599_v61, %v1257_v47  ;;  %v1263_v43 = vsel %vm230_vm3, %v6604_v62, %v1259_v34  ;;  %v1431_v61 = vld [vmem:[#allocation2 + $0x10] sm:$0xff]  ;;  %v5264_v62 = vld [vmem:[%s8174_s2 + $0x10] sm:$0xff] }
 0x779   :  { %5284 = vmatmul.mubr.msk.f32.vlgmr.msra.gmra.mrb[10].mxu0 %vm232_vm4, %v1262_v36  ;;  %5527 = vmatprep.mubr.msk.f32.mxu1 %vm362_vm5, %v5264_v62 }
 0x77a   :  { %1340 = vmatprep.mubr.f32.mxu0 %v6360_v1  ;;  %5674 = vmatpush3.bf16.msra.mxu0 %v5673_v16 }
 0x77b   :  { %v586_v24 = vpop.permute.xlu0 %585  ;;  %v584_v2 = vpop.permute.xlu1 %583  ;;  %5528 = vmatmul.mubr.msk.f32.vlgmr.msra.gmra.mrb[8].mxu1 %vm362_vm5, %v5265_v37 }
 0x77c   :  { %v590_v7 = vmul.f32 %v5942_v4, %v586_v24  ;;  %v589_v29 = vmul.f32 %v5940_v51, %v584_v2  ;;  %5651 = vmatpush1.bf16.msra.mxu1 %v6694_v55  ;;  %1161 = vmatprep.mubr.f32.mxu1 %v6360_v1 }
 0x77d   :  { %5285 = vmatmul.mubr.msk.f32.gmra.mrb[12].mxu0 %vm232_vm4, %v1263_v43  ;;  %5653 = vmatprep.subr.bf16.mxu1 %v6696_v56 }
 0x77e   :  { %595 = vrot.lane.b32.xlu0 %v590_v7, %s6364_s11  ;;  %593 = vrot.lane.b32.xlu1 %v589_v29, %s6364_s11 }
 0x77f   :  { %5534 = vmatprep.mubr.msk.f32.mxu0 %vm6359_vm0, %v6360_v1 }
 0x780   :  { %5655 = vmatpush1.bf16.msra.mxu1 %v6713_v5 }
 0x781   :  { %5535 = vmatmul.mubr.msk.f32.vlgmr.msra.gmra.mrb[14].mxu0 %vm153_vm1, %v1431_v61  ;;  %5657 = vmatprep.subr.bf16.mxu1 %v6717_v6 }
 0x782   :  { %565 = vrot.lane.b32.xlu0 %v537_v10, %s6362_s28  ;;  %563 = vrot.lane.b32.xlu1 %v531_v38, %s6362_s28 }
 0x784   :  { %5659 = vmatpush1.bf16.msra.mxu1 %v6732_v11 }
 0x785   :  { %5661 = vmatprep.subr.bf16.mxu1 %v6735_v12 }
 0x786   :  { %615 = vrot.lane.b32.xlu0 %v6660_v40, %s6362_s28 }
 0x788   :  { %5663 = vmatpush1.bf16.msra.mxu1 %v6744_v15 }
 0x789   :  { %5274 = vmatprep.subr.msk.mxu1 %vm236_vm2, %v6751_v25 }
 0x78c   :  { %5275 = vmatpush1.msk.msra.mxu1 %vm236_vm2, %v6758_v26 }
 0x78d   :  { %5676 = vmatprep.subr.bf16.mxu1 %v6474_v9 }
 0x7f0   :  { %v594_v40 = vpop.permute.xlu1 %593  ;;  %v596_v38 = vpop.permute.xlu0 %595 }
 0x7f1   :  { %v599_v10 = vadd.f32 %v594_v40, %v6845_v35  ;;  %v600_v57 = vadd.f32 %v596_v38, %v6849_v42 }
 0x7f3   :  { %5943 = vtanh.f32 %v599_v10 }
 0x7f4   :  { %5945 = vtanh.f32 %v600_v57  ;;  %v564_v48 = vpop.permute.xlu1 %563  ;;  %v566_v60 = vpop.permute.xlu0 %565 }
 0x7f5   :  { %v569_v22 = vadd.f32 %v564_v48, %v6845_v35  ;;  %v570_v32 = vadd.f32 %v566_v60, %v6849_v42 }
 0x7f7   :  { %v5252_v16 = vmul.f32 -1.442695, %v569_v22  ;;  %v5253_v36 = vmul.f32 -1.442695, %v570_v32 }
 0x7f8   :  { %v616_v61 = vpop.permute.xlu0 %615 }
 0x7f9   :  { %5947 = vpow2.f32 %v5252_v16 }
 0x7fa   :  { %5949 = vpow2.f32 %v5253_v36 }
 0x7fd   :  { %v5944_v23 = vpop.eup %5943 }
 0x7fe   :  { %607 = vrot.lane.b32.xlu1 %v5944_v23, %s6363_s4  ;;  %v5946_v3 = vpop.eup %5945 }
 0x802   :  { %609 = vrot.lane.b32.xlu1 %v5946_v3, %s6363_s4 }
 0x803   :  { %v5948_v24 = vpop.eup %5947 }
 0x804   :  { %v577_v2 = vadd.f32 1.0, %v5948_v24  ;;  %v5950_v35 = vpop.eup %5949 }
 0x805   :  { %v578_v43 = vadd.f32 1.0, %v5950_v35 }
 0x806   :  { %5951 = vrcp.f32 %v577_v2 }
 0x807   :  { %5953 = vrcp.f32 %v578_v43 }
 0x810   :  { %v5952_v42 = vpop.eup %5951 }
 0x811   :  { %v603_v62 = vsub.f32 1.0, %v5952_v42  ;;  %v5954_v37 = vpop.eup %5953  ;;  %v618_v38 = vmul.f32 %v5952_v42, %v616_v61 }
 0x812   :  { %v604_v23 = vsub.f32 1.0, %v5954_v37  ;;  %v619_v48 = vmul.f32 %v5954_v37, %v616_v61 }
 0x84c   :  { %v1336_v44 = vpop.f32.mrb[10].mxu0 }
 0x84d   :  { %v6942_v14 = vpop.f32.mrb[11].mxu0  ;;  %v6960_v32 = vadd.f32 %v1336_v44, %v6653_v39 }
 0x84e   :  { %v5529_v7 = vpop.f32.mrb[8].mxu1  ;;  %v1339_v42 = vadd.f32 %v6942_v14, %v6802_v52 }
 0x84f   :  { %v1072_v29 = vpop.f32.mrb[9].mxu1 }
 0x850   :  { %v6945_v34 = vpop.f32.mrb[12].mxu0 }
 0x851   :  { %v6947_v47 = vpop.f32.mrb[13].mxu0 }
 0x854   :  { %v6949_v51 = vpop.f32.mrb[14].mxu0 }
 0x855   :  { %v5536_v4 = vpop.f32.mrb[15].mxu0  ;;  %v1508_v44 = vsel %vm230_vm3, %v6949_v51, %v6882_v46 }
 0x870   :  { %v608_v40 = vpop.permute.xlu1 %607 }
 0x871   :  { %v613_v10 = vmul.f32 %v608_v40, %v603_v62 }
 0x873   :  { %v6951_v57 = vadd.f32 %v618_v38, %v613_v10 }
 0x874   :  { %v610_v3 = vpop.permute.xlu1 %609 }
 0x875   :  { %v614_v22 = vmul.f32 %v610_v3, %v604_v23  ;;  %1083 = vrot.lane.b32.xlu0 %v6951_v57, %s6361_s26 }
 0x877   :  { %v6955_v60 = vadd.f32 %v619_v48, %v614_v22 }
 0x879   :  { %1085 = vrot.lane.b32.xlu1 %v6955_v60, %s6361_s26 }
 0x87d   :  { %1349 = vrot.lane.b32.xlu1 %v6960_v32, %s6362_s28 }
 0x8e7   :  { %v1084_v16 = vpop.permute.xlu0 %1083 }
 0x8e8   :  { %v1089_v36 = vsel %vm232_vm4, %v1072_v29, %v1084_v16 }
 0x8e9   :  { %5276 = vmatmul.mubr.msk.f32.vlgmr.msra.gmra.mrb[10].mxu1 %vm449_vm6, %v1089_v36 }
 0x8ea   :  { %5678 = vmatpush1.bf16.msra.mxu1 %v6485_v13  ;;  %1167 = vmatprep.mubr.f32.mxu1 %v6360_v1 }
 0x8eb   :  { %v1086_v4 = vpop.permute.xlu1 %1085  ;;  %5680 = vmatprep.subr.bf16.mxu1 %v6497_v17 }
 0x8ec   :  { %v1090_v24 = vsel %vm232_vm4, %v5529_v7, %v1086_v4 }
 0x8ed   :  { %5277 = vmatmul.mubr.msk.f32.gmra.mrb[12].mxu1 %vm449_vm6, %v1090_v24 }
 0x8ee   :  { %5682 = vmatpush1.bf16.msra.mxu1 %v6500_v18  ;;  %1576 = vmatprep.mubr.f32.mxu1 %v6360_v1 }
 0x8ef   :  { %5295 = vmatprep.subr.msk.mxu1 %vm236_vm2, %v6508_v19  ;;  %v1350_v61 = vpop.permute.xlu1 %1349 }
 0x8f0   :  { %v1355_v62 = vadd.f32 %v1350_v61, %v6960_v32 }
 0x8f2   :  { %5296 = vmatpush1.msk.msra.mxu1 %vm236_vm2, %v6515_v20  ;;  %v5286_v37 = vmul.f32 -1.442695, %v1355_v62 }
 0x8f3   :  { %5297 = vmatmul.mubr.msk.f32.vlgmr.msra.gmra.mrb[14].mxu1 %vm232_vm4, %v1508_v44  ;;  %5700 = vmatprep.subr.bf16.mxu1 %v6565_v49 }
 0x8f4   :  { %5702 = vmatpush1.bf16.msra.mxu1 %v6576_v53  ;;  %1962 = vmatprep.mubr.f32.mxu1 %v6360_v1  ;;  %5955 = vpow2.f32 %v5286_v37 }
 0x8f5   :  { %5704 = vmatprep.subr.bf16.mxu1 %v6578_v54 }
 0x8f8   :  { %5706 = vmatpush1.bf16.msra.mxu1 %v6588_v58 }
 0x8f9   :  { %5310 = vmatprep.subr.msk.mxu1 %vm236_vm2, %v6594_v59  ;;  %v7006_v59 = vadd.f32 %v6945_v34, %v6653_v39 }
 0x8fc   :  { %5311 = vmatpush1.msk.msra.mxu1 %vm236_vm2, %v6612_v63  ;;  %v1345_v63 = vadd.f32 %v6947_v47, %v6802_v52 }
 0x8fd   :  { %5707 = vmatprep.subr.bf16.mxu1 %v6358_v0 }
 0x8fe   :  { %v5956_v34 = vpop.eup %5955 }
 0x8ff   :  { %v1363_v40 = vadd.f32 1.0, %v5956_v34 }
 0x901   :  { %5957 = vrcp.f32 %v1363_v40 }
 0x90b   :  { %v5958_v14 = vpop.eup %5957 }
 0x9bc   :  { %v1163_v19 = vpop.f32.mrb[10].mxu1 }
 0x9bd   :  { %v6991_v20 = vpop.f32.mrb[11].mxu1 }
 0x9c0   :  { %v6993_v46 = vpop.f32.mrb[12].mxu1 }
 0x9c1   :  { %v6995_v2 = vpop.f32.mrb[13].mxu1 }
 0x9c6   :  { %v1578_v35 = vpop.f32.mrb[14].mxu1 }
 0x9c7   :  { %v6998_v43 = vadd.f32 %v1578_v35, %v6533_v30  ;;  %v1580_v7 = vpop.f32.mrb[15].mxu1 }
 0x9c8   :  { %v1581_v29 = vadd.f32 %v1580_v7, %v6536_v31 }
 0x9c9   :  { %1584 = vrot.lane.b32.xlu0 %v6998_v43, %s6362_s28 }
 0x9ca   :  { %1605 = vrot.lane.b32.xlu1 %v1581_v29, %s6363_s4 }
 0x9cd   :  { %1351 = vrot.lane.b32.xlu0 %v7006_v59, %s6362_s28 }
 0x9ce   :  { %1393 = vrot.lane.b32.xlu1 %v1345_v63, %s6363_s4 }
 0x9d1   :  { %1391 = vrot.lane.b32.xlu0 %v1339_v42, %s6363_s4 }
 0xa3b   :  { %v1585_v38 = vpop.permute.xlu0 %1584 }
 0xa3c   :  { %v1587_v47 = vadd.f32 %v1585_v38, %v6998_v43  ;;  %v1606_v35 = vpop.permute.xlu1 %1605 }
 0xa3e   :  { %v5298_v10 = vmul.f32 -1.442695, %v1587_v47 }
 0xa3f   :  { %v1352_v23 = vpop.permute.xlu0 %1351 }
 0xa40   :  { %5959 = vpow2.f32 %v5298_v10  ;;  %v1356_v3 = vadd.f32 %v1352_v23, %v7006_v59  ;;  %v1394_v37 = vpop.permute.xlu1 %1393 }
 0xa42   :  { %v5287_v48 = vmul.f32 -1.442695, %v1356_v3 }
 0xa43   :  { %v1392_v22 = vpop.permute.xlu0 %1391 }
 0xa44   :  { %5961 = vpow2.f32 %v5287_v48  ;;  %v1397_v16 = vmul.f32 %v5958_v14, %v1392_v22 }
 0xa46   :  { %1401 = vrot.lane.b32.xlu1 %v1397_v16, %s6364_s11 }
 0xa4a   :  { %v5960_v36 = vpop.eup %5959  ;;  %1595 = vrot.lane.b32.xlu1 %v1581_v29, %s6362_s28 }
 0xa4b   :  { %v1591_v4 = vadd.f32 1.0, %v5960_v36 }
 0xa4d   :  { %5963 = vrcp.f32 %v1591_v4 }
 0xa4e   :  { %v5962_v24 = vpop.eup %5961  ;;  %1373 = vrot.lane.b32.xlu1 %v1345_v63, %s6362_s28  ;;  %v7028_v63 = vadd.f32 %v1163_v19, %v6838_v33  ;;  %v7038_v19 = vadd.f32 %v6993_v46, %v6838_v33 }
 0xa4f   :  { %v1364_v44 = vadd.f32 1.0, %v5962_v24 }
 0xa51   :  { %5965 = vrcp.f32 %v1364_v44 }
 0xa57   :  { %v5964_v7 = vpop.eup %5963 }
 0xa58   :  { %v1608_v61 = vmul.f32 %v5964_v7, %v1606_v35 }
 0xa5a   :  { %1610 = vrot.lane.b32.xlu0 %v1608_v61, %s6364_s11 }
 0xa5b   :  { %v5966_v62 = vpop.eup %5965 }
 0xa5c   :  { %v1398_v34 = vmul.f32 %v5966_v62, %v1394_v37 }
 0xa5e   :  { %1403 = vrot.lane.b32.xlu0 %v1398_v34, %s6364_s11 }
 0xa62   :  { %1371 = vrot.lane.b32.xlu0 %v1339_v42, %s6362_s28 }
 0xab8   :  { %v1402_v29 = vpop.permute.xlu1 %1401 }
 0xab9   :  { %v1407_v40 = vadd.f32 %v1402_v29, %v6960_v32 }
 0xabb   :  { %5967 = vtanh.f32 %v1407_v40 }
 0xabc   :  { %v1596_v36 = vpop.permute.xlu1 %1595 }
 0xabd   :  { %v1598_v24 = vadd.f32 %v1596_v36, %v6998_v43 }
 0xabf   :  { %v5299_v7 = vmul.f32 -1.442695, %v1598_v24 }
 0xac0   :  { %v1374_v44 = vpop.permute.xlu1 %1373 }
 0xac1   :  { %v1378_v61 = vadd.f32 %v1374_v44, %v7006_v59  ;;  %v1172_v44 = vadd.f32 %v6995_v2, %v6864_v45  ;;  %v7076_v2 = vld [vmem:[%s8172_s0 + $0x38] sm:$0xff] }
 0xac3   :  { %v5289_v46 = vmul.f32 -1.442695, %v1378_v61 }
 0xac5   :  { %v5968_v38 = vpop.eup %5967 }
 0xac6   :  { %1415 = vrot.lane.b32.xlu1 %v5968_v38, %s6363_s4 }
 0xaca   :  { %1176 = vrot.lane.b32.xlu1 %v7028_v63, %s6362_s28 }
 0xacc   :  { %v1611_v47 = vpop.permute.xlu0 %1610 }
 0xacd   :  { %v1613_v10 = vadd.f32 %v1611_v47, %v6998_v43 }
 0xacf   :  { %5969 = vtanh.f32 %v1613_v10 }
 0xad0   :  { %v1404_v23 = vpop.permute.xlu0 %1403 }
 0xad1   :  { %v1408_v42 = vadd.f32 %v1404_v23, %v7006_v59  ;;  %v1166_v59 = vadd.f32 %v6991_v20, %v6864_v45 }
 0xad3   :  { %5971 = vtanh.f32 %v1408_v42 }
 0xad4   :  { %v1372_v14 = vpop.permute.xlu0 %1371 }
 0xad5   :  { %v1377_v22 = vadd.f32 %v1372_v14, %v6960_v32 }
 0xad7   :  { %v5288_v16 = vmul.f32 -1.442695, %v1377_v22 }
 0xad9   :  { %v5970_v3 = vpop.eup %5969  ;;  %5973 = vpow2.f32 %v5288_v16 }
 0xada   :  { %1617 = vrot.lane.b32.xlu0 %v5970_v3, %s6363_s4 }
 0xadd   :  { %v5972_v48 = vpop.eup %5971 }
 0xade   :  { %1417 = vrot.lane.b32.xlu0 %v5972_v48, %s6363_s4 }
 0xae2   :  { %1178 = vrot.lane.b32.xlu0 %v7038_v19, %s6362_s28 }
 0xae3   :  { %v5974_v4 = vpop.eup %5973 }
 0xae4   :  { %v1385_v35 = vadd.f32 1.0, %v5974_v4 }
 0xae6   :  { %5975 = vrcp.f32 %v1385_v35 }
 0xae7   :  { %5977 = vpow2.f32 %v5299_v7 }
 0xae8   :  { %5979 = vpow2.f32 %v5289_v46 }
 0xaf0   :  { %v5976_v62 = vpop.eup %5975 }
 0xaf1   :  { %v5978_v37 = vpop.eup %5977  ;;  %v1411_v34 = vsub.f32 1.0, %v5976_v62  ;;  %v1423_v32 = vmul.f32 %v5976_v62, %v6868_v8 }
 0xaf2   :  { %v1602_v38 = vadd.f32 1.0, %v5978_v37  ;;  %v5980_v47 = vpop.eup %5979  ;;  %v7071_v37 = vld [vmem:[%s8172_s0 + $0x30] sm:$0xff] }
 0xaf3   :  { %v1386_v43 = vadd.f32 1.0, %v5980_v47 }
 0xaf4   :  { %5981 = vrcp.f32 %v1602_v38 }
 0xaf5   :  { %5983 = vrcp.f32 %v1386_v43 }
 0xafe   :  { %v5982_v23 = vpop.eup %5981 }
 0xaff   :  { %v1615_v42 = vsub.f32 1.0, %v5982_v23  ;;  %v5984_v3 = vpop.eup %5983  ;;  %v1621_v14 = vmul.f32 %v5982_v23, %v6859_v27 }
 0xb00   :  { %v1412_v16 = vsub.f32 1.0, %v5984_v3  ;;  %v1424_v24 = vmul.f32 %v5984_v3, %v6866_v21 }
 0xb38   :  { %v1416_v29 = vpop.permute.xlu1 %1415 }
 0xb39   :  { %v1421_v40 = vmul.f32 %v1416_v29, %v1411_v34  ;;  %v5708_v29 = vpack.c.bf16 %v7076_v2, %v7071_v37 }
 0xb3b   :  { %v7046_v10 = vadd.f32 %v1423_v32, %v1421_v40 }
 0xb3c   :  { %v1177_v27 = vpop.permute.xlu1 %1176 }
 0xb3d   :  { %1884 = vrot.lane.b32.xlu0 %v7046_v10, %s6365_s25  ;;  %v1182_v35 = vadd.f32 %v1177_v27, %v7028_v63 }
 0xb3f   :  { %v5278_v7 = vmul.f32 -1.442695, %v1182_v35 }
 0xb41   :  { %1218 = vrot.lane.b32.xlu0 %v1166_v59, %s6363_s4  ;;  %5985 = vpow2.f32 %v5278_v7 }
 0xb4b   :  { %v5986_v61 = vpop.eup %5985 }
 0xb4c   :  { %v1618_v8 = vpop.permute.xlu0 %1617  ;;  %v1190_v21 = vadd.f32 1.0, %v5986_v61 }
 0xb4d   :  { %v1620_v48 = vmul.f32 %v1618_v8, %v1615_v42 }
 0xb4e   :  { %5987 = vrcp.f32 %v1190_v21 }
 0xb4f   :  { %v7054_v22 = vadd.f32 %v1621_v14, %v1620_v48  ;;  %v2059_v14 = vld [vmem:[#allocation2 + $0x18] sm:$0xff] }
 0xb50   :  { %v1418_v36 = vpop.permute.xlu0 %1417 }
 0xb51   :  { %v1422_v4 = vmul.f32 %v1418_v36, %v1412_v16  ;;  %1624 = vrot.lane.b32.xlu1 %v7054_v22, %s6365_s25 }
 0xb53   :  { %v7059_v20 = vadd.f32 %v1424_v24, %v1422_v4 }
 0xb54   :  { %v1179_v46 = vpop.permute.xlu0 %1178 }
 0xb55   :  { %1886 = vrot.lane.b32.xlu1 %v7059_v20, %s6365_s25  ;;  %v1183_v62 = vadd.f32 %v1179_v46, %v7038_v19 }
 0xb57   :  { %v5279_v34 = vmul.f32 -1.442695, %v1183_v62 }
 0xb58   :  { %v5988_v38 = vpop.eup %5987 }
 0xb59   :  { %1220 = vrot.lane.b32.xlu1 %v1172_v44, %s6363_s4  ;;  %5989 = vpow2.f32 %v5279_v34 }
 0xb63   :  { %v5990_v23 = vpop.eup %5989 }
 0xb64   :  { %v1191_v42 = vadd.f32 1.0, %v5990_v23 }
 0xb66   :  { %5991 = vrcp.f32 %v1191_v42 }
 0xb70   :  { %v5992_v16 = vpop.eup %5991 }
 0xbaf   :  { %v1885_v32 = vpop.permute.xlu0 %1884 }
 0xbb0   :  { %v1890_v40 = vsel %vm230_vm3, %v6887_v28, %v1885_v32 }
 0xbb1   :  { %5312 = vmatmul.mubr.msk.f32.vlgmr.msra.gmra.mrb[16].mxu1 %vm232_vm4, %v1890_v40 }
 0xbb2   :  { %1968 = vmatprep.mubr.f32.mxu1 %v6360_v1  ;;  %5709 = vmatpush3.bf16.msra.mxu1 %v5708_v29 }
 0xbb3   :  { %v1219_v47 = vpop.permute.xlu0 %1218 }
 0xbb4   :  { %v1224_v43 = vmul.f32 %v5988_v38, %v1219_v47 }
 0xbb6   :  { %1228 = vrot.lane.b32.xlu0 %v1224_v43, %s6364_s11 }
 0xbba   :  { %1198 = vrot.lane.b32.xlu0 %v1166_v59, %s6362_s28  ;;  %v5292_v59 = vld [vmem:[%s8174_s2 + $0x20] sm:$0xff] }
 0xbbb   :  { %5539 = vmatprep.mubr.msk.f32.mxu0 %vm362_vm5, %v5292_v59 }
 0xbc3   :  { %v7086_v3 = vpop.permute.xlu1 %1624 }
 0xbc4   :  { %v1627_v28 = vsel %vm230_vm3, %v6949_v51, %v7086_v3  ;;  %v5293_v51 = vld [vmem:[%s8174_s2 + $0x28] sm:$0xff] }
 0xbc5   :  { %5537 = vmatprep.subr.mxu0 %v1627_v28 }
 0xbc6   :  { %5538 = vmatpush3.msra.mxu0 %v1627_v28 }
 0xbc7   :  { %v1887_v8 = vpop.permute.xlu1 %1886  ;;  %5684 = vmatprep.subr.bf16.mxu0 %v6687_v50  ;;  %5540 = vmatmul.mubr.msk.f32.vlgmr.msra.gmra.mrb[16].mxu0 %vm362_vm5, %v5293_v51 }
 0xbc8   :  { %v1891_v48 = vsel %vm230_vm3, %v6892_v41, %v1887_v8  ;;  %5686 = vmatpush1.bf16.msra.mxu0 %v6694_v55  ;;  %1789 = vmatprep.mubr.f32.mxu0 %v6360_v1 }
 0xbc9   :  { %5313 = vmatmul.mubr.msk.f32.gmra.mrb[18].mxu1 %vm232_vm4, %v1891_v48  ;;  %5688 = vmatprep.subr.bf16.mxu0 %v6696_v56 }
 0xbca   :  { %5546 = vmatprep.mubr.msk.f32.mxu1 %vm6359_vm0, %v6360_v1 }
 0xbcb   :  { %v1221_v36 = vpop.permute.xlu1 %1220 }
 0xbcc   :  { %v1225_v41 = vmul.f32 %v5992_v16, %v1221_v36  ;;  %5690 = vmatpush1.bf16.msra.mxu0 %v6713_v5 }
 0xbcd   :  { %5547 = vmatmul.mubr.msk.f32.vlgmr.msra.gmra.mrb[20].mxu1 %vm153_vm1, %v2059_v14  ;;  %5692 = vmatprep.subr.bf16.mxu0 %v6717_v6 }
 0xbce   :  { %1230 = vrot.lane.b32.xlu1 %v1225_v41, %s6364_s11 }
 0xbd0   :  { %5694 = vmatpush1.bf16.msra.mxu0 %v6732_v11 }
 0xbd1   :  { %5696 = vmatprep.subr.bf16.mxu0 %v6735_v12 }
 0xbd2   :  { %1200 = vrot.lane.b32.xlu1 %v1172_v44, %s6362_s28 }
 0xbd4   :  { %5698 = vmatpush1.bf16.msra.mxu0 %v6744_v15 }
 0xbd5   :  { %5302 = vmatprep.subr.msk.mxu0 %vm236_vm2, %v6751_v25 }
 0xbd8   :  { %5303 = vmatpush1.msk.msra.mxu0 %vm236_vm2, %v6758_v26 }
 0xbd9   :  { %5711 = vmatprep.subr.bf16.mxu0 %v6474_v9 }
 0xc28   :  { %v1229_v4 = vpop.permute.xlu0 %1228 }
 0xc29   :  { %v1234_v24 = vadd.f32 %v1229_v4, %v7028_v63 }
 0xc2b   :  { %5993 = vtanh.f32 %v1234_v24 }
 0xc2c   :  { %v1199_v25 = vpop.permute.xlu0 %1198 }
 0xc2d   :  { %v1204_v61 = vadd.f32 %v1199_v25, %v7028_v63  ;;  %v7166_v25 = vld [vmem:[%s8175_s3 + $0x40] sm:$0xf] }
 0xc2f   :  { %v5280_v21 = vmul.f32 -1.442695, %v1204_v61 }
 0xc35   :  { %v5994_v27 = vpop.eup %5993 }
 0xc36   :  { %1242 = vrot.lane.b32.xlu0 %v5994_v27, %s6363_s4 }
 0xc40   :  { %v1231_v44 = vpop.permute.xlu1 %1230 }
 0xc41   :  { %v1235_v35 = vadd.f32 %v1231_v44, %v7038_v19 }
 0xc43   :  { %5995 = vtanh.f32 %v1235_v35 }
 0xc44   :  { %5997 = vpow2.f32 %v5280_v21  ;;  %v1201_v29 = vpop.permute.xlu1 %1200 }
 0xc45   :  { %v1205_v32 = vadd.f32 %v1201_v29, %v7038_v19 }
 0xc47   :  { %v5281_v38 = vmul.f32 -1.442695, %v1205_v32 }
 0xc4d   :  { %v5996_v7 = vpop.eup %5995 }
 0xc4e   :  { %1244 = vrot.lane.b32.xlu1 %v5996_v7, %s6363_s4  ;;  %v5998_v62 = vpop.eup %5997 }
 0xc4f   :  { %v1212_v34 = vadd.f32 1.0, %v5998_v62  ;;  %v7185_v62 = vld [vmem:[%s8179_s7 + $0x48] sm:$0xf] }
 0xc51   :  { %5999 = vrcp.f32 %v1212_v34 }
 0xc52   :  { %6001 = vpow2.f32 %v5281_v38 }
 0xc5b   :  { %v6000_v28 = vpop.eup %5999 }
 0xc5c   :  { %v1238_v8 = vsub.f32 1.0, %v6000_v28  ;;  %v1250_v59 = vmul.f32 %v6000_v28, %v6951_v57  ;;  %v6002_v51 = vpop.eup %6001 }
 0xc5d   :  { %v1213_v16 = vadd.f32 1.0, %v6002_v51 }
 0xc5f   :  { %6003 = vrcp.f32 %v1213_v16 }
 0xc69   :  { %v6004_v36 = vpop.eup %6003 }
 0xc6a   :  { %v1239_v41 = vsub.f32 1.0, %v6004_v36  ;;  %v1251_v24 = vmul.f32 %v6004_v36, %v6955_v60  ;;  %v7159_v60 = vld [vmem:[%s8175_s3 + $0x48] sm:$0xf] }
 0xc84   :  { %v1964_v26 = vpop.f32.mrb[16].mxu1 }
 0xc85   :  { %v7126_v46 = vpop.f32.mrb[17].mxu1  ;;  %v7146_v57 = vadd.f32 %v1964_v26, %v6653_v39 }
 0xc9a   :  { %v5541_v43 = vpop.f32.mrb[16].mxu0 }
 0xc9b   :  { %v1700_v23 = vpop.f32.mrb[17].mxu0 }
 0xc9c   :  { %v7129_v40 = vpop.f32.mrb[18].mxu1 }
 0xc9d   :  { %v7131_v47 = vpop.f32.mrb[19].mxu1 }
 0xca0   :  { %v7133_v42 = vpop.f32.mrb[20].mxu1 }
 0xca1   :  { %v5548_v63 = vpop.f32.mrb[21].mxu1  ;;  %v2136_v21 = vsel %vm230_vm3, %v7133_v42, %v7086_v3  ;;  %v7192_v3 = vld [vmem:[%s8179_s7 + $0x40] sm:$0xf] }
 0xca8   :  { %v1243_v48 = vpop.permute.xlu0 %1242 }
 0xca9   :  { %v1248_v14 = vmul.f32 %v1243_v48, %v1238_v8  ;;  %v7212_v8 = vadd.f32 %v7129_v40, %v6653_v39  ;;  %v1973_v48 = vadd.f32 %v7131_v47, %v6802_v52 }
 0xcab   :  { %v7136_v19 = vadd.f32 %v1250_v59, %v1248_v14  ;;  %v1967_v59 = vadd.f32 %v7126_v46, %v6802_v52 }
 0xcad   :  { %1711 = vrot.lane.b32.xlu0 %v7136_v19, %s6361_s26 }
 0xcc0   :  { %v1245_v4 = vpop.permute.xlu1 %1244 }
 0xcc1   :  { %v1249_v27 = vmul.f32 %v1245_v4, %v1239_v41 }
 0xcc3   :  { %v7141_v44 = vadd.f32 %v1251_v24, %v1249_v27 }
 0xcc5   :  { %1713 = vrot.lane.b32.xlu1 %v7141_v44, %s6361_s26 }
 0xcc9   :  { %1977 = vrot.lane.b32.xlu1 %v7146_v57, %s6362_s28 }
 0xd1f   :  { %v1712_v35 = vpop.permute.xlu0 %1711 }
 0xd20   :  { %v1717_v7 = vsel %vm232_vm4, %v1700_v23, %v1712_v35 }
 0xd21   :  { %5304 = vmatmul.mubr.msk.f32.vlgmr.msra.gmra.mrb[18].mxu0 %vm449_vm6, %v1717_v7 }
 0xd22   :  { %5713 = vmatpush1.bf16.msra.mxu0 %v6485_v13  ;;  %1795 = vmatprep.mubr.f32.mxu0 %v6360_v1 }
 0xd23   :  { %5715 = vmatprep.subr.bf16.mxu0 %v6497_v17 }
 0xd26   :  { %5717 = vmatpush1.bf16.msra.mxu0 %v6500_v18 }
 0xd27   :  { %5323 = vmatprep.subr.msk.mxu0 %vm236_vm2, %v7159_v60 }
 0xd2a   :  { %5324 = vmatpush1.msk.msra.mxu0 %vm236_vm2, %v7166_v25 }
 0xd2b   :  { %5735 = vmatprep.subr.bf16.mxu0 %v6565_v49 }
 0xd37   :  { %v1714_v61 = vpop.permute.xlu1 %1713 }
 0xd38   :  { %v1718_v26 = vsel %vm232_vm4, %v5541_v43, %v1714_v61 }
 0xd39   :  { %5305 = vmatmul.mubr.msk.f32.gmra.mrb[20].mxu0 %vm449_vm6, %v1718_v26 }
 0xd3a   :  { %2204 = vmatprep.mubr.f32.mxu0 %v6360_v1 }
 0xd3b   :  { %v1978_v14 = vpop.permute.xlu1 %1977 }
 0xd3c   :  { %v1983_v51 = vadd.f32 %v1978_v14, %v7146_v57 }
 0xd3d   :  { %5325 = vmatmul.mubr.msk.f32.vlgmr.msra.gmra.mrb[22].mxu0 %vm232_vm4, %v2136_v21 }
 0xd3e   :  { %5737 = vmatpush1.bf16.msra.mxu0 %v6576_v53  ;;  %2590 = vmatprep.mubr.f32.mxu0 %v6360_v1  ;;  %v5314_v16 = vmul.f32 -1.442695, %v1983_v51 }
 0xd3f   :  { %5739 = vmatprep.subr.bf16.mxu0 %v6578_v54 }
 0xd40   :  { %6005 = vpow2.f32 %v5314_v16 }
 0xd42   :  { %5741 = vmatpush1.bf16.msra.mxu0 %v6588_v58 }
 0xd43   :  { %5338 = vmatprep.subr.msk.mxu0 %vm236_vm2, %v7185_v62 }
 0xd46   :  { %5339 = vmatpush1.msk.msra.mxu0 %vm236_vm2, %v7192_v3 }
 0xd47   :  { %5742 = vmatprep.subr.bf16.mxu0 %v6358_v0 }
 0xd4a   :  { %v6006_v40 = vpop.eup %6005 }
 0xd4b   :  { %v1991_v36 = vadd.f32 1.0, %v6006_v40 }
 0xd4d   :  { %6007 = vrcp.f32 %v1991_v36 }
 0xd57   :  { %v6008_v46 = vpop.eup %6007 }
 0xdf4   :  { %v1791_v34 = vpop.f32.mrb[18].mxu0 }
 0xdf5   :  { %v7197_v29 = vpop.f32.mrb[19].mxu0 }
 0xe0c   :  { %v7199_v32 = vpop.f32.mrb[20].mxu0 }
 0xe0d   :  { %v7201_v38 = vpop.f32.mrb[21].mxu0 }
 0xe10   :  { %v2206_v43 = vpop.f32.mrb[22].mxu0 }
 0xe11   :  { %v7204_v23 = vadd.f32 %v2206_v43, %v6533_v30  ;;  %v2208_v63 = vpop.f32.mrb[23].mxu0 }
 0xe12   :  { %v2209_v28 = vadd.f32 %v2208_v63, %v6536_v31 }
 0xe13   :  { %2212 = vrot.lane.b32.xlu0 %v7204_v23, %s6362_s28 }
 0xe14   :  { %2233 = vrot.lane.b32.xlu1 %v2209_v28, %s6363_s4 }
 0xe17   :  { %1979 = vrot.lane.b32.xlu0 %v7212_v8, %s6362_s28 }
 0xe18   :  { %2021 = vrot.lane.b32.xlu1 %v1973_v48, %s6363_s4 }
 0xe1b   :  { %2019 = vrot.lane.b32.xlu0 %v1967_v59, %s6363_s4 }
 0xe85   :  { %v2213_v41 = vpop.permute.xlu0 %2212 }
 0xe86   :  { %v2215_v47 = vadd.f32 %v2213_v41, %v7204_v23  ;;  %v2234_v14 = vpop.permute.xlu1 %2233 }
 0xe88   :  { %v5326_v4 = vmul.f32 -1.442695, %v2215_v47 }
 0xe89   :  { %v1980_v24 = vpop.permute.xlu0 %1979 }
 0xe8a   :  { %6009 = vpow2.f32 %v5326_v4  ;;  %v1984_v27 = vadd.f32 %v1980_v24, %v7212_v8  ;;  %v2022_v36 = vpop.permute.xlu1 %2021 }
 0xe8c   :  { %v5315_v35 = vmul.f32 -1.442695, %v1984_v27 }
 0xe8d   :  { %v2020_v7 = vpop.permute.xlu0 %2019 }
 0xe8e   :  { %6011 = vpow2.f32 %v5315_v35  ;;  %v2025_v61 = vmul.f32 %v6008_v46, %v2020_v7 }
 0xe90   :  { %2029 = vrot.lane.b32.xlu1 %v2025_v61, %s6364_s11 }
 0xe94   :  { %v6010_v26 = vpop.eup %6009  ;;  %2223 = vrot.lane.b32.xlu1 %v2209_v28, %s6362_s28 }
 0xe95   :  { %v2219_v21 = vadd.f32 1.0, %v6010_v26 }
 0xe97   :  { %6013 = vrcp.f32 %v2219_v21 }
 0xe98   :  { %v6012_v43 = vpop.eup %6011  ;;  %2001 = vrot.lane.b32.xlu1 %v1973_v48, %s6362_s28  ;;  %v7234_v48 = vadd.f32 %v1791_v34, %v6838_v33  ;;  %v7244_v34 = vadd.f32 %v7199_v32, %v6838_v33 }
 0xe99   :  { %v1992_v63 = vadd.f32 1.0, %v6012_v43 }
 0xe9b   :  { %6015 = vrcp.f32 %v1992_v63 }
 0xea1   :  { %v6014_v51 = vpop.eup %6013 }
 0xea2   :  { %v2236_v16 = vmul.f32 %v6014_v51, %v2234_v14 }
 0xea4   :  { %2238 = vrot.lane.b32.xlu0 %v2236_v16, %s6364_s11 }
 0xea5   :  { %v6016_v40 = vpop.eup %6015 }
 0xea6   :  { %v2026_v41 = vmul.f32 %v6016_v40, %v2022_v36 }
 0xea8   :  { %2031 = vrot.lane.b32.xlu0 %v2026_v41, %s6364_s11 }
 0xeac   :  { %1999 = vrot.lane.b32.xlu0 %v1967_v59, %s6362_s28 }
 0xf02   :  { %v2030_v28 = vpop.permute.xlu1 %2029 }
 0xf03   :  { %v2035_v47 = vadd.f32 %v2030_v28, %v7146_v57 }
 0xf05   :  { %6017 = vtanh.f32 %v2035_v47 }
 0xf06   :  { %v2224_v43 = vpop.permute.xlu1 %2223 }
 0xf07   :  { %v2226_v14 = vadd.f32 %v2224_v43, %v7204_v23 }
 0xf09   :  { %v5327_v40 = vmul.f32 -1.442695, %v2226_v14 }
 0xf0a   :  { %v2002_v51 = vpop.permute.xlu1 %2001 }
 0xf0b   :  { %v2006_v36 = vadd.f32 %v2002_v51, %v7212_v8 }
 0xf0d   :  { %v5317_v32 = vmul.f32 -1.442695, %v2006_v36 }
 0xf0f   :  { %v6018_v4 = vpop.eup %6017 }
 0xf10   :  { %2043 = vrot.lane.b32.xlu1 %v6018_v4, %s6363_s4 }
 0xf14   :  { %1804 = vrot.lane.b32.xlu1 %v7234_v48, %s6362_s28 }
 0xf16   :  { %v2239_v24 = vpop.permute.xlu0 %2238 }
 0xf17   :  { %v2241_v27 = vadd.f32 %v2239_v24, %v7204_v23 }
 0xf19   :  { %6019 = vtanh.f32 %v2241_v27 }
 0xf1a   :  { %v2032_v35 = vpop.permute.xlu0 %2031 }
 0xf1b   :  { %v2036_v59 = vadd.f32 %v2032_v35, %v7212_v8  ;;  %v1794_v8 = vadd.f32 %v7197_v29, %v6864_v45 }
 0xf1d   :  { %6021 = vtanh.f32 %v2036_v59 }
 0xf1e   :  { %v2000_v61 = vpop.permute.xlu0 %1999 }
 0xf1f   :  { %v2005_v26 = vadd.f32 %v2000_v61, %v7146_v57 }
 0xf21   :  { %v5316_v21 = vmul.f32 -1.442695, %v2005_v26 }
 0xf23   :  { %v6020_v46 = vpop.eup %6019  ;;  %6023 = vpow2.f32 %v5316_v21 }
 0xf24   :  { %2245 = vrot.lane.b32.xlu0 %v6020_v46, %s6363_s4 }
 0xf27   :  { %v6022_v7 = vpop.eup %6021 }
 0xf28   :  { %2045 = vrot.lane.b32.xlu0 %v6022_v7, %s6363_s4 }
 0xf2c   :  { %1806 = vrot.lane.b32.xlu0 %v7244_v34, %s6362_s28 }
 0xf2d   :  { %v6024_v63 = vpop.eup %6023 }
 0xf2e   :  { %v2013_v16 = vadd.f32 1.0, %v6024_v63 }
 0xf30   :  { %6025 = vrcp.f32 %v2013_v16 }
 0xf31   :  { %6027 = vpow2.f32 %v5327_v40  ;;  %v1800_v40 = vadd.f32 %v7201_v38, %v6864_v45  ;;  %v7282_v38 = vld [vmem:[%s8172_s0 + $0x48] sm:$0xff] }
 0xf32   :  { %6029 = vpow2.f32 %v5317_v32 }
 0xf3a   :  { %v6026_v41 = vpop.eup %6025 }
 0xf3b   :  { %v6028_v28 = vpop.eup %6027  ;;  %v2039_v47 = vsub.f32 1.0, %v6026_v41  ;;  %v2051_v57 = vmul.f32 %v6026_v41, %v7046_v10 }
 0xf3c   :  { %v2230_v27 = vadd.f32 1.0, %v6028_v28  ;;  %v6030_v35 = vpop.eup %6029 }
 0xf3d   :  { %v2014_v23 = vadd.f32 1.0, %v6030_v35 }
 0xf3e   :  { %6031 = vrcp.f32 %v2230_v27 }
 0xf3f   :  { %6033 = vrcp.f32 %v2014_v23 }
 0xf48   :  { %v6032_v46 = vpop.eup %6031 }
 0xf49   :  { %v2243_v7 = vsub.f32 1.0, %v6032_v46  ;;  %v6034_v61 = vpop.eup %6033  ;;  %v2249_v21 = vmul.f32 %v6032_v46, %v7054_v22 }
 0xf4a   :  { %v2040_v63 = vsub.f32 1.0, %v6034_v61  ;;  %v2052_v16 = vmul.f32 %v6034_v61, %v7059_v20 }
 0xf82   :  { %v2044_v4 = vpop.permute.xlu1 %2043 }
 0xf83   :  { %v2049_v24 = vmul.f32 %v2044_v4, %v2039_v47  ;;  %v7277_v4 = vld [vmem:[%s8172_s0 + $0x40] sm:$0xff] }
 0xf85   :  { %v7252_v59 = vadd.f32 %v2051_v57, %v2049_v24  ;;  %v5743_v24 = vpack.c.bf16 %v7282_v38, %v7277_v4 }
 0xf86   :  { %v1805_v22 = vpop.permute.xlu1 %1804 }
 0xf87   :  { %2512 = vrot.lane.b32.xlu0 %v7252_v59, %s6365_s25  ;;  %v1810_v36 = vadd.f32 %v1805_v22, %v7234_v48  ;;  %v7325_v22 = vld [vmem:[%s8177_s5 + $0x88] sm:$0xf] }
 0xf89   :  { %v5306_v32 = vmul.f32 -1.442695, %v1810_v36  ;;  %v7332_v36 = vld [vmem:[%s8177_s5 + $0x80] sm:$0xf] }
 0xf8b   :  { %1846 = vrot.lane.b32.xlu0 %v1794_v8, %s6363_s4  ;;  %6035 = vpow2.f32 %v5306_v32 }
 0xf95   :  { %v6036_v41 = vpop.eup %6035 }
 0xf96   :  { %v2246_v10 = vpop.permute.xlu0 %2245  ;;  %v1818_v20 = vadd.f32 1.0, %v6036_v41 }
 0xf97   :  { %v2248_v26 = vmul.f32 %v2246_v10, %v2243_v7 }
 0xf98   :  { %6037 = vrcp.f32 %v1818_v20 }
 0xf99   :  { %v7260_v43 = vadd.f32 %v2249_v21, %v2248_v26 }
 0xf9a   :  { %v2046_v14 = vpop.permute.xlu0 %2045 }
 0xf9b   :  { %v2050_v51 = vmul.f32 %v2046_v14, %v2040_v63  ;;  %2252 = vrot.lane.b32.xlu1 %v7260_v43, %s6365_s25  ;;  %v2687_v14 = vld [vmem:[#allocation2 + $0x20] sm:$0xff] }
 0xf9d   :  { %v7265_v29 = vadd.f32 %v2052_v16, %v2050_v51 }
 0xf9e   :  { %v1807_v28 = vpop.permute.xlu0 %1806 }
 0xf9f   :  { %2514 = vrot.lane.b32.xlu1 %v7265_v29, %s6365_s25  ;;  %v1811_v47 = vadd.f32 %v1807_v28, %v7244_v34 }
 0xfa1   :  { %v5307_v57 = vmul.f32 -1.442695, %v1811_v47 }
 0xfa2   :  { %v6038_v23 = vpop.eup %6037 }
 0xfa3   :  { %1848 = vrot.lane.b32.xlu1 %v1800_v40, %s6363_s4  ;;  %6039 = vpow2.f32 %v5307_v57 }
 0xfad   :  { %v6040_v61 = vpop.eup %6039 }
 0xfae   :  { %v1819_v10 = vadd.f32 1.0, %v6040_v61 }
 0xfb0   :  { %6041 = vrcp.f32 %v1819_v10 }
 0xfba   :  { %v6042_v51 = vpop.eup %6041 }
 0xff9   :  { %v2513_v27 = vpop.permute.xlu0 %2512 }
 0xffa   :  { %v2518_v35 = vsel %vm230_vm3, %v7071_v37, %v2513_v27 }
 0xffb   :  { %5340 = vmatmul.mubr.msk.f32.vlgmr.msra.gmra.mrb[24].mxu0 %vm232_vm4, %v2518_v35 }
 0xffc   :  { %2596 = vmatprep.mubr.f32.mxu0 %v6360_v1  ;;  %5744 = vmatpush3.bf16.msra.mxu0 %v5743_v24 }
 0xffd   :  { %v1847_v46 = vpop.permute.xlu0 %1846 }
 0xffe   :  { %v1852_v7 = vmul.f32 %v6038_v23, %v1847_v46 }
0x1000   :  { %1856 = vrot.lane.b32.xlu0 %v1852_v7, %s6364_s11 }
0x1004   :  { %1826 = vrot.lane.b32.xlu0 %v1794_v8, %s6362_s28  ;;  %v5320_v8 = vld [vmem:[%s8174_s2 + $0x30] sm:$0xff] }
0x1005   :  { %5551 = vmatprep.mubr.msk.f32.mxu1 %vm362_vm5, %v5320_v8 }
0x100d   :  { %v7292_v26 = vpop.permute.xlu1 %2252 }
0x100e   :  { %v2255_v37 = vsel %vm230_vm3, %v7133_v42, %v7292_v26  ;;  %v5321_v42 = vld [vmem:[%s8174_s2 + $0x38] sm:$0xff] }
0x100f   :  { %5549 = vmatprep.subr.mxu1 %v2255_v37 }
0x1010   :  { %5550 = vmatpush3.msra.mxu1 %v2255_v37 }
0x1011   :  { %v2515_v21 = vpop.permute.xlu1 %2514  ;;  %5719 = vmatprep.subr.bf16.mxu1 %v6687_v50  ;;  %5552 = vmatmul.mubr.msk.f32.vlgmr.msra.gmra.mrb[22].mxu1 %vm362_vm5, %v5321_v42 }
0x1012   :  { %v2519_v63 = vsel %vm230_vm3, %v7076_v2, %v2515_v21  ;;  %5721 = vmatpush1.bf16.msra.mxu1 %v6694_v55  ;;  %2417 = vmatprep.mubr.f32.mxu1 %v6360_v1 }
0x1013   :  { %5341 = vmatmul.mubr.msk.f32.gmra.mrb[26].mxu0 %vm232_vm4, %v2519_v63  ;;  %5723 = vmatprep.subr.bf16.mxu1 %v6696_v56 }
0x1014   :  { %5558 = vmatprep.mubr.msk.f32.mxu0 %vm6359_vm0, %v6360_v1 }
0x1015   :  { %v1849_v16 = vpop.permute.xlu1 %1848 }
0x1016   :  { %v1853_v2 = vmul.f32 %v6042_v51, %v1849_v16  ;;  %5725 = vmatpush1.bf16.msra.mxu1 %v6713_v5 }
0x1017   :  { %5559 = vmatmul.mubr.msk.f32.vlgmr.msra.gmra.mrb[28].mxu0 %vm153_vm1, %v2687_v14  ;;  %5727 = vmatprep.subr.bf16.mxu1 %v6717_v6 }
0x1018   :  { %1858 = vrot.lane.b32.xlu1 %v1853_v2, %s6364_s11 }
0x101a   :  { %5729 = vmatpush1.bf16.msra.mxu1 %v6732_v11 }
0x101b   :  { %5731 = vmatprep.subr.bf16.mxu1 %v6735_v12 }
0x101c   :  { %1828 = vrot.lane.b32.xlu1 %v1800_v40, %s6362_s28 }
0x101e   :  { %5733 = vmatpush1.bf16.msra.mxu1 %v6744_v15 }
0x101f   :  { %5330 = vmatprep.subr.msk.mxu1 %vm236_vm2, %v7325_v22 }
0x1022   :  { %5331 = vmatpush1.msk.msra.mxu1 %vm236_vm2, %v7332_v36 }
0x1023   :  { %5746 = vmatprep.subr.bf16.mxu1 %v6474_v9 }
0x1072   :  { %v1857_v40 = vpop.permute.xlu0 %1856 }
0x1073   :  { %v1862_v32 = vadd.f32 %v1857_v40, %v7234_v48 }
0x1075   :  { %6043 = vtanh.f32 %v1862_v32 }
0x1076   :  { %v1827_v57 = vpop.permute.xlu0 %1826 }
0x1077   :  { %v1832_v24 = vadd.f32 %v1827_v57, %v7234_v48 }
0x1079   :  { %v5308_v35 = vmul.f32 -1.442695, %v1832_v24 }
0x107f   :  { %v6044_v41 = vpop.eup %6043 }
0x1080   :  { %1870 = vrot.lane.b32.xlu0 %v6044_v41, %s6363_s4 }
0x108a   :  { %v1859_v20 = vpop.permute.xlu1 %1858 }
0x108b   :  { %v1863_v28 = vadd.f32 %v1859_v20, %v7244_v34 }
0x108d   :  { %6045 = vtanh.f32 %v1863_v28 }
0x108e   :  { %6047 = vpow2.f32 %v5308_v35  ;;  %v1829_v61 = vpop.permute.xlu1 %1828 }
0x108f   :  { %v1833_v10 = vadd.f32 %v1829_v61, %v7244_v34 }
0x1091   :  { %v5309_v21 = vmul.f32 -1.442695, %v1833_v10 }
0x1097   :  { %v6046_v47 = vpop.eup %6045 }
0x1098   :  { %1872 = vrot.lane.b32.xlu1 %v6046_v47, %s6363_s4  ;;  %v6048_v46 = vpop.eup %6047 }
0x1099   :  { %v1840_v7 = vadd.f32 1.0, %v6048_v46 }
0x109b   :  { %6049 = vrcp.f32 %v1840_v7 }
0x109c   :  { %6051 = vpow2.f32 %v5309_v21 }
0x10a5   :  { %v6050_v51 = vpop.eup %6049 }
0x10a6   :  { %v1866_v16 = vsub.f32 1.0, %v6050_v51  ;;  %v1878_v40 = vmul.f32 %v6050_v51, %v7136_v19  ;;  %v6052_v41 = vpop.eup %6051 }
0x10a7   :  { %v1841_v34 = vadd.f32 1.0, %v6052_v41 }
0x10a9   :  { %6053 = vrcp.f32 %v1841_v34 }
0x10b3   :  { %v6054_v28 = vpop.eup %6053 }
0x10b4   :  { %v1867_v47 = vsub.f32 1.0, %v6054_v28  ;;  %v1879_v24 = vmul.f32 %v6054_v28, %v7141_v44 }
0x10ce   :  { %v2592_v27 = vpop.f32.mrb[24].mxu0 }
0x10cf   :  { %v7342_v23 = vpop.f32.mrb[25].mxu0  ;;  %v7358_v19 = vadd.f32 %v2592_v27, %v6653_v39 }
0x10d0   :  { %v2595_v41 = vadd.f32 %v7342_v23, %v6802_v52 }
0x10e4   :  { %v5553_v8 = vpop.f32.mrb[22].mxu1 }
0x10e5   :  { %v2328_v14 = vpop.f32.mrb[23].mxu1 }
0x10e6   :  { %v2598_v37 = vpop.f32.mrb[26].mxu0 }
0x10e7   :  { %v2600_v63 = vpop.f32.mrb[27].mxu0 }
0x10ea   :  { %v7345_v42 = vpop.f32.mrb[28].mxu0 }
0x10eb   :  { %v5560_v48 = vpop.f32.mrb[29].mxu0  ;;  %v2764_v10 = vsel %vm230_vm3, %v7345_v42, %v7292_v26 }
0x10f2   :  { %v1871_v2 = vpop.permute.xlu0 %1870 }
0x10f3   :  { %v1876_v32 = vmul.f32 %v1871_v2, %v1866_v16 }
0x10f5   :  { %v7348_v20 = vadd.f32 %v1878_v40, %v1876_v32  ;;  %v7403_v40 = vadd.f32 %v2598_v37, %v6653_v39  ;;  %v2601_v32 = vadd.f32 %v2600_v63, %v6802_v52 }
0x10f7   :  { %2339 = vrot.lane.b32.xlu0 %v7348_v20, %s6361_s26 }
0x110a   :  { %v1873_v57 = vpop.permute.xlu1 %1872 }
0x110b   :  { %v1877_v35 = vmul.f32 %v1873_v57, %v1867_v47 }
0x110d   :  { %v7353_v46 = vadd.f32 %v1879_v24, %v1877_v35 }
0x110f   :  { %2341 = vrot.lane.b32.xlu1 %v7353_v46, %s6361_s26 }
0x1113   :  { %2605 = vrot.lane.b32.xlu1 %v7358_v19, %s6362_s28 }
0x1169   :  { %v2340_v7 = vpop.permute.xlu0 %2339 }
0x116a   :  { %v2345_v61 = vsel %vm232_vm4, %v2328_v14, %v2340_v7 }
0x116b   :  { %5332 = vmatmul.mubr.msk.f32.vlgmr.msra.gmra.mrb[24].mxu1 %vm449_vm6, %v2345_v61 }
0x116c   :  { %5748 = vmatpush1.bf16.msra.mxu1 %v6485_v13  ;;  %2423 = vmatprep.mubr.f32.mxu1 %v6360_v1 }
0x116d   :  { %5750 = vmatprep.subr.bf16.mxu1 %v6497_v17 }
0x1170   :  { %5752 = vmatpush1.bf16.msra.mxu1 %v6500_v18 }
0x1171   :  { %5351 = vmatprep.subr.msk.mxu1 %vm236_vm2, %v7159_v60 }
0x1174   :  { %5352 = vmatpush1.msk.msra.mxu1 %vm236_vm2, %v7166_v25 }
0x1175   :  { %5770 = vmatprep.subr.bf16.mxu1 %v6565_v49 }
0x1181   :  { %v2342_v44 = vpop.permute.xlu1 %2341 }
0x1182   :  { %v2346_v27 = vsel %vm232_vm4, %v5553_v8, %v2342_v44 }
0x1183   :  { %5333 = vmatmul.mubr.msk.f32.gmra.mrb[26].mxu1 %vm449_vm6, %v2346_v27 }
0x1184   :  { %2832 = vmatprep.mubr.f32.mxu1 %v6360_v1 }
0x1185   :  { %v2606_v34 = vpop.permute.xlu1 %2605 }
0x1186   :  { %v2611_v28 = vadd.f32 %v2606_v34, %v7358_v19 }
0x1187   :  { %5353 = vmatmul.mubr.msk.f32.vlgmr.msra.gmra.mrb[28].mxu1 %vm232_vm4, %v2764_v10 }
0x1188   :  { %5772 = vmatpush1.bf16.msra.mxu1 %v6576_v53  ;;  %3218 = vmatprep.mubr.f32.mxu1 %v6360_v1  ;;  %v5342_v47 = vmul.f32 -1.442695, %v2611_v28 }
0x1189   :  { %5774 = vmatprep.subr.bf16.mxu1 %v6578_v54 }
0x118a   :  { %6055 = vpow2.f32 %v5342_v47 }
0x118c   :  { %5776 = vmatpush1.bf16.msra.mxu1 %v6588_v58 }
0x118d   :  { %5366 = vmatprep.subr.msk.mxu1 %vm236_vm2, %v7185_v62 }
0x1190   :  { %5367 = vmatpush1.msk.msra.mxu1 %vm236_vm2, %v7192_v3 }
0x1191   :  { %5777 = vmatprep.subr.bf16.mxu1 %v6358_v0 }
0x1194   :  { %v6056_v57 = vpop.eup %6055 }
0x1195   :  { %v2619_v37 = vadd.f32 1.0, %v6056_v57 }
0x1197   :  { %6057 = vrcp.f32 %v2619_v37 }
0x11a1   :  { %v6058_v23 = vpop.eup %6057 }
0x123e   :  { %v2419_v21 = vpop.f32.mrb[24].mxu1 }
0x123f   :  { %v7389_v26 = vpop.f32.mrb[25].mxu1 }
0x1256   :  { %v7391_v8 = vpop.f32.mrb[26].mxu1 }
0x1257   :  { %v7393_v14 = vpop.f32.mrb[27].mxu1 }
0x125a   :  { %v2834_v48 = vpop.f32.mrb[28].mxu1 }
0x125b   :  { %v7396_v51 = vadd.f32 %v2834_v48, %v6533_v30  ;;  %v2836_v16 = vpop.f32.mrb[29].mxu1 }
0x125c   :  { %v2837_v2 = vadd.f32 %v2836_v16, %v6536_v31 }
0x125d   :  { %2840 = vrot.lane.b32.xlu0 %v7396_v51, %s6362_s28 }
0x125e   :  { %2861 = vrot.lane.b32.xlu1 %v2837_v2, %s6363_s4 }
0x1261   :  { %2607 = vrot.lane.b32.xlu0 %v7403_v40, %s6362_s28 }
0x1262   :  { %2649 = vrot.lane.b32.xlu1 %v2601_v32, %s6363_s4 }
0x1265   :  { %2647 = vrot.lane.b32.xlu0 %v2595_v41, %s6363_s4 }
0x12cf   :  { %v2841_v24 = vpop.permute.xlu0 %2840 }
0x12d0   :  { %v2843_v63 = vadd.f32 %v2841_v24, %v7396_v51  ;;  %v2862_v47 = vpop.permute.xlu1 %2861 }
0x12d2   :  { %v5354_v35 = vmul.f32 -1.442695, %v2843_v63 }
0x12d3   :  { %v2608_v7 = vpop.permute.xlu0 %2607 }
0x12d4   :  { %6059 = vpow2.f32 %v5354_v35  ;;  %v2612_v61 = vadd.f32 %v2608_v7, %v7403_v40  ;;  %v2650_v63 = vpop.permute.xlu1 %2649 }
0x12d6   :  { %v5343_v44 = vmul.f32 -1.442695, %v2612_v61 }
0x12d7   :  { %v2648_v27 = vpop.permute.xlu0 %2647 }
0x12d8   :  { %6061 = vpow2.f32 %v5343_v44  ;;  %v2653_v10 = vmul.f32 %v6058_v23, %v2648_v27 }
0x12da   :  { %2657 = vrot.lane.b32.xlu1 %v2653_v10, %s6364_s11 }
0x12de   :  { %v6060_v48 = vpop.eup %6059  ;;  %2851 = vrot.lane.b32.xlu1 %v2837_v2, %s6362_s28 }
0x12df   :  { %v2847_v16 = vadd.f32 1.0, %v6060_v48 }
0x12e1   :  { %6063 = vrcp.f32 %v2847_v16 }
0x12e2   :  { %v6062_v34 = vpop.eup %6061  ;;  %2629 = vrot.lane.b32.xlu1 %v2601_v32, %s6362_s28  ;;  %v7424_v32 = vadd.f32 %v2419_v21, %v6838_v33  ;;  %v7434_v21 = vadd.f32 %v7391_v8, %v6838_v33 }
0x12e3   :  { %v2620_v28 = vadd.f32 1.0, %v6062_v34 }
0x12e5   :  { %6065 = vrcp.f32 %v2620_v28 }
0x12eb   :  { %v6064_v57 = vpop.eup %6063 }
0x12ec   :  { %v2864_v37 = vmul.f32 %v6064_v57, %v2862_v47 }
0x12ee   :  { %2866 = vrot.lane.b32.xlu0 %v2864_v37, %s6364_s11 }
0x12ef   :  { %v6066_v24 = vpop.eup %6065 }
0x12f0   :  { %v2654_v35 = vmul.f32 %v6066_v24, %v2650_v63 }
0x12f2   :  { %2659 = vrot.lane.b32.xlu0 %v2654_v35, %s6364_s11 }
0x12f6   :  { %2627 = vrot.lane.b32.xlu0 %v2595_v41, %s6362_s28 }
0x134c   :  { %v2658_v2 = vpop.permute.xlu1 %2657 }
0x134d   :  { %v2663_v7 = vadd.f32 %v2658_v2, %v7358_v19 }
0x134f   :  { %6067 = vtanh.f32 %v2663_v7 }
0x1350   :  { %v2852_v47 = vpop.permute.xlu1 %2851 }
0x1351   :  { %v2854_v37 = vadd.f32 %v2852_v47, %v7396_v51 }
0x1353   :  { %v5355_v35 = vmul.f32 -1.442695, %v2854_v37 }
0x1354   :  { %v2630_v24 = vpop.permute.xlu1 %2629 }
0x1355   :  { %v2634_v2 = vadd.f32 %v2630_v24, %v7403_v40 }
0x1357   :  { %v5345_v8 = vmul.f32 -1.442695, %v2634_v2 }
0x1359   :  { %v6068_v61 = vpop.eup %6067 }
0x135a   :  { %2671 = vrot.lane.b32.xlu1 %v6068_v61, %s6363_s4 }
0x135e   :  { %2432 = vrot.lane.b32.xlu1 %v7424_v32, %s6362_s28 }
0x1360   :  { %v2867_v44 = vpop.permute.xlu0 %2866 }
0x1361   :  { %v2869_v23 = vadd.f32 %v2867_v44, %v7396_v51 }
0x1363   :  { %6069 = vtanh.f32 %v2869_v23 }
0x1364   :  { %v2660_v27 = vpop.permute.xlu0 %2659 }
0x1365   :  { %v2664_v41 = vadd.f32 %v2660_v27, %v7403_v40  ;;  %v2422_v40 = vadd.f32 %v7389_v26, %v6864_v45 }
0x1367   :  { %6071 = vtanh.f32 %v2664_v41 }
0x1368   :  { %v2628_v16 = vpop.permute.xlu0 %2627 }
0x1369   :  { %v2633_v34 = vadd.f32 %v2628_v16, %v7358_v19 }
0x136b   :  { %v5344_v28 = vmul.f32 -1.442695, %v2633_v34 }
0x136d   :  { %v6070_v10 = vpop.eup %6069  ;;  %6073 = vpow2.f32 %v5344_v28 }
0x136e   :  { %2873 = vrot.lane.b32.xlu0 %v6070_v10, %s6363_s4 }
0x1371   :  { %v6072_v48 = vpop.eup %6071 }
0x1372   :  { %2673 = vrot.lane.b32.xlu0 %v6072_v48, %s6363_s4 }
0x1376   :  { %2434 = vrot.lane.b32.xlu0 %v7434_v21, %s6362_s28 }
0x1377   :  { %v6074_v57 = vpop.eup %6073 }
0x1378   :  { %v2641_v63 = vadd.f32 1.0, %v6074_v57 }
0x137a   :  { %6075 = vrcp.f32 %v2641_v63 }
0x137b   :  { %6077 = vpow2.f32 %v5355_v35 }
0x137c   :  { %6079 = vpow2.f32 %v5345_v8  ;;  %v2428_v8 = vadd.f32 %v7393_v14, %v6864_v45  ;;  %v7472_v14 = vld [vmem:[%s8172_s0 + $0x58] sm:$0xff] }
0x1384   :  { %v6076_v7 = vpop.eup %6075 }
0x1385   :  { %v6078_v61 = vpop.eup %6077  ;;  %v2667_v44 = vsub.f32 1.0, %v6076_v7  ;;  %v2679_v19 = vmul.f32 %v6076_v7, %v7252_v59 }
0x1386   :  { %v2858_v41 = vadd.f32 1.0, %v6078_v61  ;;  %v6080_v10 = vpop.eup %6079 }
0x1387   :  { %v2642_v51 = vadd.f32 1.0, %v6080_v10 }
0x1388   :  { %6081 = vrcp.f32 %v2858_v41 }
0x1389   :  { %6083 = vrcp.f32 %v2642_v51 }
0x1392   :  { %v6082_v16 = vpop.eup %6081 }
0x1393   :  { %v2871_v34 = vsub.f32 1.0, %v6082_v16  ;;  %v6084_v28 = vpop.eup %6083  ;;  %v2877_v57 = vmul.f32 %v6082_v16, %v7260_v43 }
0x1394   :  { %v2668_v24 = vsub.f32 1.0, %v6084_v28  ;;  %v2680_v2 = vmul.f32 %v6084_v28, %v7265_v29 }
0x13cc   :  { %v2672_v23 = vpop.permute.xlu1 %2671 }
0x13cd   :  { %v2677_v27 = vmul.f32 %v2672_v23, %v2667_v44 }
0x13cf   :  { %v7442_v48 = vadd.f32 %v2679_v19, %v2677_v27  ;;  %v7467_v27 = vld [vmem:[%s8172_s0 + $0x50] sm:$0xff] }
0x13d0   :  { %v2433_v43 = vpop.permute.xlu1 %2432  ;;  %v5778_v10 = vpack.c.bf16 %v7472_v14, %v7467_v27 }
0x13d1   :  { %3140 = vrot.lane.b32.xlu0 %v7442_v48, %s6365_s25  ;;  %v2438_v7 = vadd.f32 %v2433_v43, %v7424_v32 }
0x13d3   :  { %v5334_v61 = vmul.f32 -1.442695, %v2438_v7 }
0x13d5   :  { %2474 = vrot.lane.b32.xlu0 %v2422_v40, %s6363_s4  ;;  %6085 = vpow2.f32 %v5334_v61 }
0x13df   :  { %v6086_v44 = vpop.eup %6085 }
0x13e0   :  { %v2874_v59 = vpop.permute.xlu0 %2873  ;;  %v2446_v29 = vadd.f32 1.0, %v6086_v44 }
0x13e1   :  { %v2876_v47 = vmul.f32 %v2874_v59, %v2871_v34 }
0x13e2   :  { %6087 = vrcp.f32 %v2446_v29 }
0x13e3   :  { %v7450_v37 = vadd.f32 %v2877_v57, %v2876_v47 }
0x13e4   :  { %v2674_v63 = vpop.permute.xlu0 %2673 }
0x13e5   :  { %v2678_v35 = vmul.f32 %v2674_v63, %v2668_v24  ;;  %2880 = vrot.lane.b32.xlu1 %v7450_v37, %s6365_s25 }
0x13e7   :  { %v7455_v26 = vadd.f32 %v2680_v2, %v2678_v35  ;;  %v3315_v2 = vld [vmem:[#allocation2 + $0x28] sm:$0xff] }
0x13e8   :  { %v2435_v23 = vpop.permute.xlu0 %2434 }
0x13e9   :  { %3142 = vrot.lane.b32.xlu1 %v7455_v26, %s6365_s25  ;;  %v2439_v19 = vadd.f32 %v2435_v23, %v7434_v21 }
0x13eb   :  { %v5335_v41 = vmul.f32 -1.442695, %v2439_v19 }
0x13ec   :  { %v6088_v34 = vpop.eup %6087 }
0x13ed   :  { %2476 = vrot.lane.b32.xlu1 %v2428_v8, %s6363_s4  ;;  %6089 = vpow2.f32 %v5335_v41 }
0x13f7   :  { %v6090_v47 = vpop.eup %6089 }
0x13f8   :  { %v2447_v57 = vadd.f32 1.0, %v6090_v47 }
0x13fa   :  { %6091 = vrcp.f32 %v2447_v57 }
0x1404   :  { %v6092_v43 = vpop.eup %6091 }
0x1443   :  { %v3141_v51 = vpop.permute.xlu0 %3140 }
0x1444   :  { %v3146_v16 = vsel %vm230_vm3, %v7277_v4, %v3141_v51 }
0x1445   :  { %5368 = vmatmul.mubr.msk.f32.vlgmr.msra.gmra.mrb[30].mxu1 %vm232_vm4, %v3146_v16 }
0x1446   :  { %3224 = vmatprep.mubr.f32.mxu1 %v6360_v1  ;;  %5779 = vmatpush3.bf16.msra.mxu1 %v5778_v10 }
0x1447   :  { %v2475_v28 = vpop.permute.xlu0 %2474 }
0x1448   :  { %v2480_v59 = vmul.f32 %v6088_v34, %v2475_v28 }
0x144a   :  { %2484 = vrot.lane.b32.xlu0 %v2480_v59, %s6364_s11 }
0x144e   :  { %2454 = vrot.lane.b32.xlu0 %v2422_v40, %s6362_s28  ;;  %v5348_v40 = vld [vmem:[%s8174_s2 + $0x40] sm:$0xff] }
0x144f   :  { %5563 = vmatprep.mubr.msk.f32.mxu0 %vm362_vm5, %v5348_v40 }
0x1457   :  { %v7482_v24 = vpop.permute.xlu1 %2880 }
0x1458   :  { %v2883_v4 = vsel %vm230_vm3, %v7345_v42, %v7482_v24  ;;  %v5349_v42 = vld [vmem:[%s8174_s2 + $0x48] sm:$0xff] }
0x1459   :  { %5561 = vmatprep.subr.mxu0 %v2883_v4 }
0x145a   :  { %5562 = vmatpush3.msra.mxu0 %v2883_v4 }
0x145b   :  { %v3143_v63 = vpop.permute.xlu1 %3142  ;;  %5754 = vmatprep.subr.bf16.mxu0 %v6687_v50  ;;  %5564 = vmatmul.mubr.msk.f32.vlgmr.msra.gmra.mrb[30].mxu0 %vm362_vm5, %v5349_v42 }
0x145c   :  { %v3147_v35 = vsel %vm230_vm3, %v7282_v38, %v3143_v63  ;;  %5756 = vmatpush1.bf16.msra.mxu0 %v6694_v55  ;;  %3045 = vmatprep.mubr.f32.mxu0 %v6360_v1 }
0x145d   :  { %5369 = vmatmul.mubr.msk.f32.gmra.mrb[32].mxu1 %vm232_vm4, %v3147_v35  ;;  %5758 = vmatprep.subr.bf16.mxu0 %v6696_v56 }
0x145e   :  { %5570 = vmatprep.mubr.msk.f32.mxu1 %vm6359_vm0, %v6360_v1 }
0x145f   :  { %v2477_v7 = vpop.permute.xlu1 %2476 }
0x1460   :  { %v2481_v38 = vmul.f32 %v6092_v43, %v2477_v7  ;;  %5760 = vmatpush1.bf16.msra.mxu0 %v6713_v5 }
0x1461   :  { %5571 = vmatmul.mubr.msk.f32.vlgmr.msra.gmra.mrb[34].mxu1 %vm153_vm1, %v3315_v2  ;;  %5762 = vmatprep.subr.bf16.mxu0 %v6717_v6 }
0x1462   :  { %2486 = vrot.lane.b32.xlu1 %v2481_v38, %s6364_s11 }
0x1464   :  { %5764 = vmatpush1.bf16.msra.mxu0 %v6732_v11 }
0x1465   :  { %5766 = vmatprep.subr.bf16.mxu0 %v6735_v12 }
0x1466   :  { %2456 = vrot.lane.b32.xlu1 %v2428_v8, %s6362_s28 }
0x1468   :  { %5768 = vmatpush1.bf16.msra.mxu0 %v6744_v15 }
0x1469   :  { %5358 = vmatprep.subr.msk.mxu0 %vm236_vm2, %v7325_v22 }
0x146c   :  { %5359 = vmatpush1.msk.msra.mxu0 %vm236_vm2, %v7332_v36 }
0x146d   :  { %5781 = vmatprep.subr.bf16.mxu0 %v6474_v9 }
0x14bc   :  { %v2485_v61 = vpop.permute.xlu0 %2484 }
0x14bd   :  { %v2490_v44 = vadd.f32 %v2485_v61, %v7424_v32 }
0x14bf   :  { %6093 = vtanh.f32 %v2490_v44 }
0x14c0   :  { %v2455_v41 = vpop.permute.xlu0 %2454 }
0x14c1   :  { %v2460_v10 = vadd.f32 %v2455_v41, %v7424_v32 }
0x14c3   :  { %v5336_v16 = vmul.f32 -1.442695, %v2460_v10 }
0x14c9   :  { %v6094_v29 = vpop.eup %6093 }
0x14ca   :  { %2498 = vrot.lane.b32.xlu0 %v6094_v29, %s6363_s4 }
0x14d4   :  { %v2487_v8 = vpop.permute.xlu1 %2486 }
0x14d5   :  { %v2491_v23 = vadd.f32 %v2487_v8, %v7434_v21 }
0x14d7   :  { %6095 = vtanh.f32 %v2491_v23 }
0x14d8   :  { %6097 = vpow2.f32 %v5336_v16  ;;  %v2457_v47 = vpop.permute.xlu1 %2456 }
0x14d9   :  { %v2461_v57 = vadd.f32 %v2457_v47, %v7434_v21 }
0x14db   :  { %v5337_v63 = vmul.f32 -1.442695, %v2461_v57 }
0x14e1   :  { %v6096_v19 = vpop.eup %6095 }
0x14e2   :  { %2500 = vrot.lane.b32.xlu1 %v6096_v19, %s6363_s4  ;;  %v6098_v28 = vpop.eup %6097 }
0x14e3   :  { %v2468_v59 = vadd.f32 1.0, %v6098_v28 }
0x14e5   :  { %6099 = vrcp.f32 %v2468_v59 }
0x14e6   :  { %6101 = vpow2.f32 %v5337_v63 }
0x14ef   :  { %v6100_v43 = vpop.eup %6099 }
0x14f0   :  { %v2494_v7 = vsub.f32 1.0, %v6100_v43  ;;  %v2506_v61 = vmul.f32 %v6100_v43, %v7348_v20  ;;  %v6102_v29 = vpop.eup %6101 }
0x14f1   :  { %v2469_v21 = vadd.f32 1.0, %v6102_v29 }
0x14f3   :  { %6103 = vrcp.f32 %v2469_v21 }
0x14fd   :  { %v6104_v23 = vpop.eup %6103 }
0x14fe   :  { %v2495_v19 = vsub.f32 1.0, %v6104_v23  ;;  %v2507_v10 = vmul.f32 %v6104_v23, %v7353_v46 }
0x1518   :  { %v3220_v51 = vpop.f32.mrb[30].mxu1 }
0x1519   :  { %v7522_v34 = vpop.f32.mrb[31].mxu1  ;;  %v7538_v20 = vadd.f32 %v3220_v51, %v6653_v39 }
0x152e   :  { %v5565_v40 = vpop.f32.mrb[30].mxu0 }
0x152f   :  { %v2956_v2 = vpop.f32.mrb[31].mxu0 }
0x1530   :  { %v3226_v4 = vpop.f32.mrb[32].mxu1 }
0x1531   :  { %v3228_v35 = vpop.f32.mrb[33].mxu1 }
0x1534   :  { %v7525_v42 = vpop.f32.mrb[34].mxu1 }
0x1535   :  { %v5572_v32 = vpop.f32.mrb[35].mxu1  ;;  %v3392_v57 = vsel %vm230_vm3, %v7525_v42, %v7482_v24 }
0x153c   :  { %v2499_v38 = vpop.permute.xlu0 %2498 }
0x153d   :  { %v2504_v44 = vmul.f32 %v2499_v38, %v2494_v7  ;;  %v3223_v7 = vadd.f32 %v7522_v34, %v6802_v52 }
0x153f   :  { %v7528_v8 = vadd.f32 %v2506_v61, %v2504_v44 }
0x1541   :  { %2967 = vrot.lane.b32.xlu0 %v7528_v8, %s6361_s26 }
0x1554   :  { %v2501_v41 = vpop.permute.xlu1 %2500 }
0x1555   :  { %v2505_v16 = vmul.f32 %v2501_v41, %v2495_v19 }
0x1557   :  { %v7533_v28 = vadd.f32 %v2507_v10, %v2505_v16 }
0x1559   :  { %2969 = vrot.lane.b32.xlu1 %v7533_v28, %s6361_s26 }
0x155d   :  { %3233 = vrot.lane.b32.xlu1 %v7538_v20, %s6362_s28 }
0x15b3   :  { %v2968_v59 = vpop.permute.xlu0 %2967 }
0x15b4   :  { %v2973_v47 = vsel %vm232_vm4, %v2956_v2, %v2968_v59 }
0x15b5   :  { %5360 = vmatmul.mubr.msk.f32.vlgmr.msra.gmra.mrb[32].mxu0 %vm449_vm6, %v2973_v47 }
0x15b6   :  { %5783 = vmatpush1.bf16.msra.mxu0 %v6485_v13  ;;  %3051 = vmatprep.mubr.f32.mxu0 %v6360_v1 }
0x15b7   :  { %5785 = vmatprep.subr.bf16.mxu0 %v6497_v17 }
0x15ba   :  { %5787 = vmatpush1.bf16.msra.mxu0 %v6500_v18 }
0x15bb   :  { %5379 = vmatprep.subr.msk.mxu0 %vm236_vm2, %v7159_v60 }
0x15be   :  { %5380 = vmatpush1.msk.msra.mxu0 %vm236_vm2, %v7166_v25 }
0x15bf   :  { %5805 = vmatprep.subr.bf16.mxu0 %v6565_v49 }
0x15cb   :  { %v2970_v46 = vpop.permute.xlu1 %2969 }
0x15cc   :  { %v2974_v51 = vsel %vm232_vm4, %v5565_v40, %v2970_v46 }
0x15cd   :  { %5361 = vmatmul.mubr.msk.f32.gmra.mrb[34].mxu0 %vm449_vm6, %v2974_v51 }
0x15ce   :  { %3460 = vmatprep.mubr.f32.mxu0 %v6360_v1 }
0x15cf   :  { %v3234_v38 = vpop.permute.xlu1 %3233 }
0x15d0   :  { %v3239_v61 = vadd.f32 %v3234_v38, %v7538_v20 }
0x15d1   :  { %5381 = vmatmul.mubr.msk.f32.vlgmr.msra.gmra.mrb[36].mxu0 %vm232_vm4, %v3392_v57 }
0x15d2   :  { %5807 = vmatpush1.bf16.msra.mxu0 %v6576_v53  ;;  %3846 = vmatprep.mubr.f32.mxu0 %v6360_v1  ;;  %v5370_v44 = vmul.f32 -1.442695, %v3239_v61 }
0x15d3   :  { %5809 = vmatprep.subr.bf16.mxu0 %v6578_v54 }
0x15d4   :  { %6105 = vpow2.f32 %v5370_v44 }
0x15d6   :  { %5811 = vmatpush1.bf16.msra.mxu0 %v6588_v58 }
0x15d7   :  { %5394 = vmatprep.subr.msk.mxu0 %vm236_vm2, %v7185_v62  ;;  %v7583_v62 = vadd.f32 %v3226_v4, %v6653_v39 }
0x15da   :  { %5395 = vmatpush1.msk.msra.mxu0 %vm236_vm2, %v7192_v3  ;;  %v3229_v3 = vadd.f32 %v3228_v35, %v6802_v52 }
0x15db   :  { %5812 = vmatprep.subr.bf16.mxu0 %v6358_v0 }
0x15de   :  { %v6106_v29 = vpop.eup %6105 }
0x15df   :  { %v3247_v4 = vadd.f32 1.0, %v6106_v29 }
0x15e1   :  { %6107 = vrcp.f32 %v3247_v4 }
0x15eb   :  { %v6108_v34 = vpop.eup %6107 }
0x1688   :  { %v3047_v60 = vpop.f32.mrb[32].mxu0 }
0x1689   :  { %v7569_v25 = vpop.f32.mrb[33].mxu0 }
0x16a0   :  { %v7571_v24 = vpop.f32.mrb[34].mxu0 }
0x16a1   :  { %v7573_v63 = vpop.f32.mrb[35].mxu0 }
0x16a4   :  { %v3462_v40 = vpop.f32.mrb[36].mxu0 }
0x16a5   :  { %v7576_v2 = vadd.f32 %v3462_v40, %v6533_v30  ;;  %v3464_v32 = vpop.f32.mrb[37].mxu0 }
0x16a6   :  { %v3465_v43 = vadd.f32 %v3464_v32, %v6536_v31 }
0x16a7   :  { %3468 = vrot.lane.b32.xlu0 %v7576_v2, %s6362_s28 }
0x16a8   :  { %3489 = vrot.lane.b32.xlu1 %v3465_v43, %s6363_s4 }
0x16ab   :  { %3235 = vrot.lane.b32.xlu0 %v7583_v62, %s6362_s28 }
0x16ac   :  { %3277 = vrot.lane.b32.xlu1 %v3229_v3, %s6363_s4 }
0x16af   :  { %3275 = vrot.lane.b32.xlu0 %v3223_v7, %s6363_s4 }
0x1719   :  { %v3469_v21 = vpop.permute.xlu0 %3468 }
0x171a   :  { %v3471_v35 = vadd.f32 %v3469_v21, %v7576_v2  ;;  %v3490_v40 = vpop.permute.xlu1 %3489 }
0x171c   :  { %v5382_v23 = vmul.f32 -1.442695, %v3471_v35 }
0x171d   :  { %v3236_v19 = vpop.permute.xlu0 %3235 }
0x171e   :  { %6109 = vpow2.f32 %v5382_v23  ;;  %v3240_v41 = vadd.f32 %v3236_v19, %v7583_v62  ;;  %v3278_v44 = vpop.permute.xlu1 %3277 }
0x1720   :  { %v5371_v10 = vmul.f32 -1.442695, %v3240_v41 }
0x1721   :  { %v3276_v16 = vpop.permute.xlu0 %3275 }
0x1722   :  { %6111 = vpow2.f32 %v5371_v10  ;;  %v3281_v59 = vmul.f32 %v6108_v34, %v3276_v16 }
0x1724   :  { %3285 = vrot.lane.b32.xlu1 %v3281_v59, %s6364_s11 }
0x1728   :  { %v6110_v47 = vpop.eup %6109  ;;  %3479 = vrot.lane.b32.xlu1 %v3465_v43, %s6362_s28 }
0x1729   :  { %v3475_v46 = vadd.f32 1.0, %v6110_v47 }
0x172b   :  { %6113 = vrcp.f32 %v3475_v46 }
0x172c   :  { %v6112_v51 = vpop.eup %6111  ;;  %3257 = vrot.lane.b32.xlu1 %v3229_v3, %s6362_s28  ;;  %v7604_v3 = vadd.f32 %v3047_v60, %v6838_v33  ;;  %v7614_v60 = vadd.f32 %v7571_v24, %v6838_v33 }
0x172d   :  { %v3248_v57 = vadd.f32 1.0, %v6112_v51 }
0x172f   :  { %6115 = vrcp.f32 %v3248_v57 }
0x1735   :  { %v6114_v32 = vpop.eup %6113 }
0x1736   :  { %v3492_v38 = vmul.f32 %v6114_v32, %v3490_v40 }
0x1738   :  { %3494 = vrot.lane.b32.xlu0 %v3492_v38, %s6364_s11 }
0x1739   :  { %v6116_v61 = vpop.eup %6115 }
0x173a   :  { %v3282_v29 = vmul.f32 %v6116_v61, %v3278_v44 }
0x173c   :  { %3287 = vrot.lane.b32.xlu0 %v3282_v29, %s6364_s11 }
0x1740   :  { %3255 = vrot.lane.b32.xlu0 %v3223_v7, %s6362_s28 }
0x1796   :  { %v3286_v43 = vpop.permute.xlu1 %3285 }
0x1797   :  { %v3291_v4 = vadd.f32 %v3286_v43, %v7538_v20 }
0x1799   :  { %6117 = vtanh.f32 %v3291_v4 }
0x179a   :  { %v3480_v47 = vpop.permute.xlu1 %3479 }
0x179b   :  { %v3482_v51 = vadd.f32 %v3480_v47, %v7576_v2 }
0x179d   :  { %v5383_v32 = vmul.f32 -1.442695, %v3482_v51 }
0x179e   :  { %v3258_v57 = vpop.permute.xlu1 %3257 }
0x179f   :  { %v3262_v38 = vadd.f32 %v3258_v57, %v7583_v62  ;;  %v3056_v57 = vadd.f32 %v7573_v63, %v6864_v45  ;;  %v7652_v63 = vld [vmem:[%s8172_s0 + $0x68] sm:$0xff] }
0x17a1   :  { %v5373_v24 = vmul.f32 -1.442695, %v3262_v38 }
0x17a3   :  { %v6118_v21 = vpop.eup %6117 }
0x17a4   :  { %3299 = vrot.lane.b32.xlu1 %v6118_v21, %s6363_s4 }
0x17a8   :  { %3060 = vrot.lane.b32.xlu1 %v7604_v3, %s6362_s28 }
0x17aa   :  { %v3495_v35 = vpop.permute.xlu0 %3494 }
0x17ab   :  { %v3497_v23 = vadd.f32 %v3495_v35, %v7576_v2 }
0x17ad   :  { %6119 = vtanh.f32 %v3497_v23 }
0x17ae   :  { %v3288_v19 = vpop.permute.xlu0 %3287 }
0x17af   :  { %v3292_v7 = vadd.f32 %v3288_v19, %v7583_v62  ;;  %v3050_v62 = vadd.f32 %v7569_v25, %v6864_v45 }
0x17b1   :  { %6121 = vtanh.f32 %v3292_v7 }
0x17b2   :  { %v3256_v34 = vpop.permute.xlu0 %3255 }
0x17b3   :  { %v3261_v16 = vadd.f32 %v3256_v34, %v7538_v20 }
0x17b5   :  { %v5372_v59 = vmul.f32 -1.442695, %v3261_v16 }
0x17b7   :  { %v6120_v41 = vpop.eup %6119  ;;  %6123 = vpow2.f32 %v5372_v59 }
0x17b8   :  { %3501 = vrot.lane.b32.xlu0 %v6120_v41, %s6363_s4 }
0x17bb   :  { %v6122_v10 = vpop.eup %6121 }
0x17bc   :  { %3301 = vrot.lane.b32.xlu0 %v6122_v10, %s6363_s4 }
0x17c0   :  { %3062 = vrot.lane.b32.xlu0 %v7614_v60, %s6362_s28 }
0x17c1   :  { %v6124_v46 = vpop.eup %6123 }
0x17c2   :  { %v3269_v40 = vadd.f32 1.0, %v6124_v46 }
0x17c4   :  { %6125 = vrcp.f32 %v3269_v40 }
0x17c5   :  { %6127 = vpow2.f32 %v5383_v32 }
0x17c6   :  { %6129 = vpow2.f32 %v5373_v24 }
0x17ce   :  { %v6126_v61 = vpop.eup %6125 }
0x17cf   :  { %v6128_v44 = vpop.eup %6127  ;;  %v3295_v29 = vsub.f32 1.0, %v6126_v61  ;;  %v3307_v20 = vmul.f32 %v6126_v61, %v7442_v48 }
0x17d0   :  { %v3486_v21 = vadd.f32 1.0, %v6128_v44  ;;  %v6130_v35 = vpop.eup %6129  ;;  %v7647_v44 = vld [vmem:[%s8172_s0 + $0x60] sm:$0xff] }
0x17d1   :  { %v3270_v2 = vadd.f32 1.0, %v6130_v35 }
0x17d2   :  { %6131 = vrcp.f32 %v3486_v21 }
0x17d3   :  { %6133 = vrcp.f32 %v3270_v2 }
0x17dc   :  { %v6132_v19 = vpop.eup %6131 }
0x17dd   :  { %v3499_v7 = vsub.f32 1.0, %v6132_v19  ;;  %v6134_v41 = vpop.eup %6133  ;;  %v3505_v34 = vmul.f32 %v6132_v19, %v7450_v37 }
0x17de   :  { %v3296_v59 = vsub.f32 1.0, %v6134_v41  ;;  %v3308_v51 = vmul.f32 %v6134_v41, %v7455_v26 }
0x1816   :  { %v3300_v43 = vpop.permute.xlu1 %3299 }
0x1817   :  { %v3305_v4 = vmul.f32 %v3300_v43, %v3295_v29  ;;  %v5813_v43 = vpack.c.bf16 %v7652_v63, %v7647_v44 }
0x1819   :  { %v7622_v23 = vadd.f32 %v3307_v20, %v3305_v4 }
0x181a   :  { %v3061_v37 = vpop.permute.xlu1 %3060 }
0x181b   :  { %3768 = vrot.lane.b32.xlu0 %v7622_v23, %s6365_s25  ;;  %v3066_v40 = vadd.f32 %v3061_v37, %v7604_v3 }
0x181d   :  { %v5362_v32 = vmul.f32 -1.442695, %v3066_v40 }
0x181f   :  { %3102 = vrot.lane.b32.xlu0 %v3050_v62, %s6363_s4  ;;  %6135 = vpow2.f32 %v5362_v32 }
0x1829   :  { %v6136_v38 = vpop.eup %6135 }
0x182a   :  { %v3502_v48 = vpop.permute.xlu0 %3501  ;;  %v3074_v26 = vadd.f32 1.0, %v6136_v38 }
0x182b   :  { %v3504_v10 = vmul.f32 %v3502_v48, %v3499_v7 }
0x182c   :  { %6137 = vrcp.f32 %v3074_v26 }
0x182d   :  { %v7630_v16 = vadd.f32 %v3505_v34, %v3504_v10  ;;  %v3943_v34 = vld [vmem:[#allocation2 + $0x30] sm:$0xff] }
0x182e   :  { %v3302_v47 = vpop.permute.xlu0 %3301 }
0x182f   :  { %v3306_v46 = vmul.f32 %v3302_v47, %v3296_v59  ;;  %3508 = vrot.lane.b32.xlu1 %v7630_v16, %s6365_s25 }
0x1831   :  { %v7635_v25 = vadd.f32 %v3308_v51, %v3306_v46 }
0x1832   :  { %v3063_v24 = vpop.permute.xlu0 %3062 }
0x1833   :  { %3770 = vrot.lane.b32.xlu1 %v7635_v25, %s6365_s25  ;;  %v3067_v61 = vadd.f32 %v3063_v24, %v7614_v60 }
0x1835   :  { %v5363_v29 = vmul.f32 -1.442695, %v3067_v61 }
0x1836   :  { %v6138_v21 = vpop.eup %6137 }
0x1837   :  { %3104 = vrot.lane.b32.xlu1 %v3056_v57, %s6363_s4  ;;  %6139 = vpow2.f32 %v5363_v29 }
0x1841   :  { %v6140_v19 = vpop.eup %6139 }
0x1842   :  { %v3075_v7 = vadd.f32 1.0, %v6140_v19 }
0x1844   :  { %6141 = vrcp.f32 %v3075_v7 }
0x184e   :  { %v6142_v59 = vpop.eup %6141 }
0x188d   :  { %v3769_v20 = vpop.permute.xlu0 %3768 }
0x188e   :  { %v3774_v4 = vsel %vm230_vm3, %v7467_v27, %v3769_v20 }
0x188f   :  { %5396 = vmatmul.mubr.msk.f32.vlgmr.msra.gmra.mrb[38].mxu0 %vm232_vm4, %v3774_v4 }
0x1890   :  { %3852 = vmatprep.mubr.f32.mxu0 %v6360_v1  ;;  %5814 = vmatpush3.bf16.msra.mxu0 %v5813_v43 }
0x1891   :  { %v3103_v35 = vpop.permute.xlu0 %3102 }
0x1892   :  { %v3108_v2 = vmul.f32 %v6138_v21, %v3103_v35 }
0x1894   :  { %3112 = vrot.lane.b32.xlu0 %v3108_v2, %s6364_s11 }
0x1898   :  { %3082 = vrot.lane.b32.xlu0 %v3050_v62, %s6362_s28  ;;  %v5376_v62 = vld [vmem:[%s8174_s2 + $0x50] sm:$0xff] }
0x1899   :  { %5575 = vmatprep.mubr.msk.f32.mxu1 %vm362_vm5, %v5376_v62 }
0x18a1   :  { %v7662_v41 = vpop.permute.xlu1 %3508 }
0x18a2   :  { %v3511_v27 = vsel %vm230_vm3, %v7525_v42, %v7662_v41  ;;  %v5377_v42 = vld [vmem:[%s8174_s2 + $0x58] sm:$0xff] }
0x18a3   :  { %5573 = vmatprep.subr.mxu1 %v3511_v27 }
0x18a4   :  { %5574 = vmatpush3.msra.mxu1 %v3511_v27 }
0x18a5   :  { %v3771_v48 = vpop.permute.xlu1 %3770  ;;  %5789 = vmatprep.subr.bf16.mxu1 %v6687_v50  ;;  %5576 = vmatmul.mubr.msk.f32.vlgmr.msra.gmra.mrb[36].mxu1 %vm362_vm5, %v5377_v42 }
0x18a6   :  { %v3775_v10 = vsel %vm230_vm3, %v7472_v14, %v3771_v48  ;;  %5791 = vmatpush1.bf16.msra.mxu1 %v6694_v55  ;;  %3673 = vmatprep.mubr.f32.mxu1 %v6360_v1 }
0x18a7   :  { %5397 = vmatmul.mubr.msk.f32.gmra.mrb[40].mxu0 %vm232_vm4, %v3775_v10  ;;  %5793 = vmatprep.subr.bf16.mxu1 %v6696_v56 }
0x18a8   :  { %5582 = vmatprep.mubr.msk.f32.mxu0 %vm6359_vm0, %v6360_v1 }
0x18a9   :  { %v3105_v47 = vpop.permute.xlu1 %3104 }
0x18aa   :  { %v3109_v14 = vmul.f32 %v6142_v59, %v3105_v47  ;;  %5795 = vmatpush1.bf16.msra.mxu1 %v6713_v5 }
0x18ab   :  { %5583 = vmatmul.mubr.msk.f32.vlgmr.msra.gmra.mrb[42].mxu0 %vm153_vm1, %v3943_v34  ;;  %5797 = vmatprep.subr.bf16.mxu1 %v6717_v6 }
0x18ac   :  { %3114 = vrot.lane.b32.xlu1 %v3109_v14, %s6364_s11 }
0x18ae   :  { %5799 = vmatpush1.bf16.msra.mxu1 %v6732_v11 }
0x18af   :  { %5801 = vmatprep.subr.bf16.mxu1 %v6735_v12 }
0x18b0   :  { %3084 = vrot.lane.b32.xlu1 %v3056_v57, %s6362_s28 }
0x18b2   :  { %5803 = vmatpush1.bf16.msra.mxu1 %v6744_v15 }
0x18b3   :  { %5386 = vmatprep.subr.msk.mxu1 %vm236_vm2, %v7325_v22 }
0x18b6   :  { %5387 = vmatpush1.msk.msra.mxu1 %vm236_vm2, %v7332_v36 }
0x18b7   :  { %5816 = vmatprep.subr.bf16.mxu1 %v6474_v9 }
0x1906   :  { %v3113_v46 = vpop.permute.xlu0 %3112 }
0x1907   :  { %v3118_v51 = vadd.f32 %v3113_v46, %v7604_v3 }
0x1909   :  { %6143 = vtanh.f32 %v3118_v51 }
0x190a   :  { %v3083_v22 = vpop.permute.xlu0 %3082 }
0x190b   :  { %v3088_v38 = vadd.f32 %v3083_v22, %v7604_v3  ;;  %v7742_v22 = vld [vmem:[%s8175_s3 + $0x40] sm:$0xf] }
0x190d   :  { %v5364_v26 = vmul.f32 -1.442695, %v3088_v38 }
0x1913   :  { %v6144_v37 = vpop.eup %6143 }
0x1914   :  { %3126 = vrot.lane.b32.xlu0 %v6144_v37, %s6363_s4 }
0x191e   :  { %v3115_v57 = vpop.permute.xlu1 %3114 }
0x191f   :  { %v3119_v40 = vadd.f32 %v3115_v57, %v7614_v60 }
0x1921   :  { %6145 = vtanh.f32 %v3119_v40 }
0x1922   :  { %6147 = vpow2.f32 %v5364_v26  ;;  %v3085_v43 = vpop.permute.xlu1 %3084 }
0x1923   :  { %v3089_v20 = vadd.f32 %v3085_v43, %v7614_v60 }
0x1925   :  { %v5365_v21 = vmul.f32 -1.442695, %v3089_v20 }
0x192b   :  { %v6146_v32 = vpop.eup %6145 }
0x192c   :  { %3128 = vrot.lane.b32.xlu1 %v6146_v32, %s6363_s4  ;;  %v6148_v61 = vpop.eup %6147 }
0x192d   :  { %v3096_v29 = vadd.f32 1.0, %v6148_v61  ;;  %v7761_v61 = vld [vmem:[%s8179_s7 + $0x48] sm:$0xf] }
0x192f   :  { %6149 = vrcp.f32 %v3096_v29 }
0x1930   :  { %6151 = vpow2.f32 %v5365_v21 }
0x1939   :  { %v6150_v27 = vpop.eup %6149 }
0x193a   :  { %v3122_v48 = vsub.f32 1.0, %v6150_v27  ;;  %v3134_v62 = vmul.f32 %v6150_v27, %v7528_v8  ;;  %v6152_v42 = vpop.eup %6151 }
0x193b   :  { %v3097_v59 = vadd.f32 1.0, %v6152_v42 }
0x193d   :  { %6153 = vrcp.f32 %v3097_v59 }
0x1947   :  { %v6154_v47 = vpop.eup %6153 }
0x1948   :  { %v3123_v14 = vsub.f32 1.0, %v6154_v47  ;;  %v3135_v51 = vmul.f32 %v6154_v47, %v7533_v28  ;;  %v7735_v28 = vld [vmem:[%s8175_s3 + $0x48] sm:$0xf] }
0x1962   :  { %v3848_v36 = vpop.f32.mrb[38].mxu0 }
0x1963   :  { %v7702_v24 = vpop.f32.mrb[39].mxu0  ;;  %v7722_v8 = vadd.f32 %v3848_v36, %v6653_v39 }
0x1978   :  { %v5577_v2 = vpop.f32.mrb[36].mxu1 }
0x1979   :  { %v3584_v19 = vpop.f32.mrb[37].mxu1 }
0x197a   :  { %v7705_v4 = vpop.f32.mrb[40].mxu0 }
0x197b   :  { %v7707_v35 = vpop.f32.mrb[41].mxu0 }
0x197e   :  { %v7709_v7 = vpop.f32.mrb[42].mxu0 }
0x197f   :  { %v5584_v3 = vpop.f32.mrb[43].mxu0  ;;  %v4020_v26 = vsel %vm230_vm3, %v7709_v7, %v7662_v41  ;;  %v7768_v41 = vld [vmem:[%s8179_s7 + $0x40] sm:$0xf] }
0x1986   :  { %v3127_v10 = vpop.permute.xlu0 %3126 }
0x1987   :  { %v3132_v34 = vmul.f32 %v3127_v10, %v3122_v48  ;;  %v3857_v48 = vadd.f32 %v7707_v35, %v6802_v52  ;;  %v3851_v10 = vadd.f32 %v7702_v24, %v6802_v52 }
0x1989   :  { %v7712_v60 = vadd.f32 %v3134_v62, %v3132_v34 }
0x198b   :  { %3595 = vrot.lane.b32.xlu0 %v7712_v60, %s6361_s26 }
0x199e   :  { %v3129_v46 = vpop.permute.xlu1 %3128 }
0x199f   :  { %v3133_v37 = vmul.f32 %v3129_v46, %v3123_v14 }
0x19a1   :  { %v7717_v57 = vadd.f32 %v3135_v51, %v3133_v37 }
0x19a3   :  { %3597 = vrot.lane.b32.xlu1 %v7717_v57, %s6361_s26 }
0x19a7   :  { %3861 = vrot.lane.b32.xlu1 %v7722_v8, %s6362_s28 }
0x19fd   :  { %v3596_v40 = vpop.permute.xlu0 %3595 }
0x19fe   :  { %v3601_v32 = vsel %vm232_vm4, %v3584_v19, %v3596_v40 }
0x19ff   :  { %5388 = vmatmul.mubr.msk.f32.vlgmr.msra.gmra.mrb[38].mxu1 %vm449_vm6, %v3601_v32 }
0x1a00   :  { %5818 = vmatpush1.bf16.msra.mxu1 %v6485_v13  ;;  %3679 = vmatprep.mubr.f32.mxu1 %v6360_v1 }
0x1a01   :  { %5820 = vmatprep.subr.bf16.mxu1 %v6497_v17 }
0x1a04   :  { %5822 = vmatpush1.bf16.msra.mxu1 %v6500_v18 }
0x1a05   :  { %5407 = vmatprep.subr.msk.mxu1 %vm236_vm2, %v7735_v28 }
0x1a08   :  { %5408 = vmatpush1.msk.msra.mxu1 %vm236_vm2, %v7742_v22 }
0x1a09   :  { %5840 = vmatprep.subr.bf16.mxu1 %v6565_v49 }
0x1a15   :  { %v3598_v38 = vpop.permute.xlu1 %3597 }
0x1a16   :  { %v3602_v36 = vsel %vm232_vm4, %v5577_v2, %v3598_v38 }
0x1a17   :  { %5389 = vmatmul.mubr.msk.f32.gmra.mrb[40].mxu1 %vm449_vm6, %v3602_v36 }
0x1a18   :  { %4088 = vmatprep.mubr.f32.mxu1 %v6360_v1 }
0x1a19   :  { %v3862_v62 = vpop.permute.xlu1 %3861 }
0x1a1a   :  { %v3867_v34 = vadd.f32 %v3862_v62, %v7722_v8 }
0x1a1b   :  { %5409 = vmatmul.mubr.msk.f32.vlgmr.msra.gmra.mrb[42].mxu1 %vm232_vm4, %v4020_v26 }
0x1a1c   :  { %5842 = vmatpush1.bf16.msra.mxu1 %v6576_v53  ;;  %4474 = vmatprep.mubr.f32.mxu1 %v6360_v1  ;;  %v5398_v42 = vmul.f32 -1.442695, %v3867_v34 }
0x1a1d   :  { %5844 = vmatprep.subr.bf16.mxu1 %v6578_v54 }
0x1a1e   :  { %6155 = vpow2.f32 %v5398_v42 }
0x1a20   :  { %5846 = vmatpush1.bf16.msra.mxu1 %v6588_v58 }
0x1a21   :  { %5422 = vmatprep.subr.msk.mxu1 %vm236_vm2, %v7761_v61 }
0x1a24   :  { %5423 = vmatpush1.msk.msra.mxu1 %vm236_vm2, %v7768_v41 }
0x1a25   :  { %5847 = vmatprep.subr.bf16.mxu1 %v6358_v0  ;;  %v7788_v0 = vadd.f32 %v7705_v4, %v6653_v39 }
0x1a28   :  { %v6156_v4 = vpop.eup %6155 }
0x1a29   :  { %v3875_v59 = vadd.f32 1.0, %v6156_v4 }
0x1a2b   :  { %6157 = vrcp.f32 %v3875_v59 }
0x1a35   :  { %v6158_v24 = vpop.eup %6157 }
0x1ad2   :  { %v3675_v29 = vpop.f32.mrb[38].mxu1 }
0x1ad3   :  { %v7773_v43 = vpop.f32.mrb[39].mxu1 }
0x1aea   :  { %v7775_v20 = vpop.f32.mrb[40].mxu1 }
0x1aeb   :  { %v7777_v21 = vpop.f32.mrb[41].mxu1 }
0x1aee   :  { %v4090_v2 = vpop.f32.mrb[42].mxu1 }
0x1aef   :  { %v7780_v19 = vadd.f32 %v4090_v2, %v6533_v30  ;;  %v4092_v3 = vpop.f32.mrb[43].mxu1 }
0x1af0   :  { %v4093_v27 = vadd.f32 %v4092_v3, %v6536_v31 }
0x1af1   :  { %4096 = vrot.lane.b32.xlu0 %v7780_v19, %s6362_s28 }
0x1af2   :  { %4117 = vrot.lane.b32.xlu1 %v4093_v27, %s6363_s4 }
0x1af5   :  { %3863 = vrot.lane.b32.xlu0 %v7788_v0, %s6362_s28 }
0x1af6   :  { %3905 = vrot.lane.b32.xlu1 %v3857_v48, %s6363_s4 }
0x1af9   :  { %3903 = vrot.lane.b32.xlu0 %v3851_v10, %s6363_s4 }
0x1b63   :  { %v4097_v47 = vpop.permute.xlu0 %4096 }
0x1b64   :  { %v4099_v35 = vadd.f32 %v4097_v47, %v7780_v19  ;;  %v4118_v3 = vpop.permute.xlu1 %4117 }
0x1b66   :  { %v5410_v14 = vmul.f32 -1.442695, %v4099_v35 }
0x1b67   :  { %v3864_v46 = vpop.permute.xlu0 %3863 }
0x1b68   :  { %6159 = vpow2.f32 %v5410_v14  ;;  %v3868_v51 = vadd.f32 %v3864_v46, %v7788_v0  ;;  %v3906_v4 = vpop.permute.xlu1 %3905 }
0x1b6a   :  { %v5399_v37 = vmul.f32 -1.442695, %v3868_v51 }
0x1b6b   :  { %v3904_v40 = vpop.permute.xlu0 %3903 }
0x1b6c   :  { %6161 = vpow2.f32 %v5399_v37  ;;  %v3909_v32 = vmul.f32 %v6158_v24, %v3904_v40 }
0x1b6e   :  { %3913 = vrot.lane.b32.xlu1 %v3909_v32, %s6364_s11 }
0x1b72   :  { %v6160_v38 = vpop.eup %6159  ;;  %4107 = vrot.lane.b32.xlu1 %v4093_v27, %s6362_s28 }
0x1b73   :  { %v4103_v36 = vadd.f32 1.0, %v6160_v38 }
0x1b75   :  { %6163 = vrcp.f32 %v4103_v36 }
0x1b76   :  { %v6162_v26 = vpop.eup %6161  ;;  %3885 = vrot.lane.b32.xlu1 %v3857_v48, %s6362_s28  ;;  %v7810_v48 = vadd.f32 %v3675_v29, %v6838_v33  ;;  %v7820_v29 = vadd.f32 %v7775_v20, %v6838_v33 }
0x1b77   :  { %v3876_v2 = vadd.f32 1.0, %v6162_v26 }
0x1b79   :  { %6165 = vrcp.f32 %v3876_v2 }
0x1b7f   :  { %v6164_v62 = vpop.eup %6163 }
0x1b80   :  { %v4120_v34 = vmul.f32 %v6164_v62, %v4118_v3 }
0x1b82   :  { %4122 = vrot.lane.b32.xlu0 %v4120_v34, %s6364_s11 }
0x1b83   :  { %v6166_v42 = vpop.eup %6165 }
0x1b84   :  { %v3910_v59 = vmul.f32 %v6166_v42, %v3906_v4 }
0x1b86   :  { %3915 = vrot.lane.b32.xlu0 %v3910_v59, %s6364_s11 }
0x1b8a   :  { %3883 = vrot.lane.b32.xlu0 %v3851_v10, %s6362_s28 }
0x1be0   :  { %v3914_v27 = vpop.permute.xlu1 %3913 }
0x1be1   :  { %v3919_v47 = vadd.f32 %v3914_v27, %v7722_v8 }
0x1be3   :  { %6167 = vtanh.f32 %v3919_v47 }
0x1be4   :  { %v4108_v36 = vpop.permute.xlu1 %4107 }
0x1be5   :  { %v4110_v2 = vadd.f32 %v4108_v36, %v7780_v19 }
0x1be7   :  { %v5411_v34 = vmul.f32 -1.442695, %v4110_v2 }
0x1be8   :  { %v3886_v3 = vpop.permute.xlu1 %3885 }
0x1be9   :  { %v3890_v42 = vadd.f32 %v3886_v3, %v7788_v0 }
0x1beb   :  { %v5401_v20 = vmul.f32 -1.442695, %v3890_v42 }
0x1bed   :  { %v6168_v35 = vpop.eup %6167 }
0x1bee   :  { %3927 = vrot.lane.b32.xlu1 %v6168_v35, %s6363_s4 }
0x1bf2   :  { %3688 = vrot.lane.b32.xlu1 %v7810_v48, %s6362_s28 }
0x1bf4   :  { %v4123_v14 = vpop.permute.xlu0 %4122 }
0x1bf5   :  { %v4125_v46 = vadd.f32 %v4123_v14, %v7780_v19 }
0x1bf7   :  { %6169 = vtanh.f32 %v4125_v46 }
0x1bf8   :  { %v3916_v51 = vpop.permute.xlu0 %3915 }
0x1bf9   :  { %v3920_v10 = vadd.f32 %v3916_v51, %v7788_v0  ;;  %v3678_v0 = vadd.f32 %v7773_v43, %v6864_v45 }
0x1bfb   :  { %6171 = vtanh.f32 %v3920_v10 }
0x1bfc   :  { %v3884_v40 = vpop.permute.xlu0 %3883 }
0x1bfd   :  { %v3889_v32 = vadd.f32 %v3884_v40, %v7722_v8 }
0x1bff   :  { %v5400_v38 = vmul.f32 -1.442695, %v3889_v32 }
0x1c01   :  { %v6170_v37 = vpop.eup %6169  ;;  %6173 = vpow2.f32 %v5400_v38 }
0x1c02   :  { %4129 = vrot.lane.b32.xlu0 %v6170_v37, %s6363_s4 }
0x1c05   :  { %v6172_v24 = vpop.eup %6171 }
0x1c06   :  { %3929 = vrot.lane.b32.xlu0 %v6172_v24, %s6363_s4 }
0x1c0a   :  { %3690 = vrot.lane.b32.xlu0 %v7820_v29, %s6362_s28 }
0x1c0b   :  { %v6174_v26 = vpop.eup %6173 }
0x1c0c   :  { %v3897_v62 = vadd.f32 1.0, %v6174_v26 }
0x1c0e   :  { %6175 = vrcp.f32 %v3897_v62  ;;  %v3684_v62 = vadd.f32 %v7777_v21, %v6864_v45  ;;  %v7858_v21 = vld [vmem:[%s8172_s0 + $0x78] sm:$0xff] }
0x1c0f   :  { %6177 = vpow2.f32 %v5411_v34 }
0x1c10   :  { %6179 = vpow2.f32 %v5401_v20 }
0x1c18   :  { %v6176_v4 = vpop.eup %6175 }
0x1c19   :  { %v6178_v59 = vpop.eup %6177  ;;  %v3923_v27 = vsub.f32 1.0, %v6176_v4  ;;  %v3935_v8 = vmul.f32 %v6176_v4, %v7622_v23 }
0x1c1a   :  { %v4114_v14 = vadd.f32 1.0, %v6178_v59  ;;  %v6180_v46 = vpop.eup %6179 }
0x1c1b   :  { %v3898_v19 = vadd.f32 1.0, %v6180_v46 }
0x1c1c   :  { %6181 = vrcp.f32 %v4114_v14 }
0x1c1d   :  { %6183 = vrcp.f32 %v3898_v19 }
0x1c26   :  { %v6182_v10 = vpop.eup %6181 }
0x1c27   :  { %v4127_v37 = vsub.f32 1.0, %v6182_v10  ;;  %v6184_v24 = vpop.eup %6183  ;;  %v4133_v32 = vmul.f32 %v6182_v10, %v7630_v16 }
0x1c28   :  { %v3924_v36 = vsub.f32 1.0, %v6184_v24  ;;  %v3936_v3 = vmul.f32 %v6184_v24, %v7635_v25 }
0x1c60   :  { %v3928_v47 = vpop.permute.xlu1 %3927 }
0x1c61   :  { %v3933_v35 = vmul.f32 %v3928_v47, %v3923_v27  ;;  %v7853_v27 = vld [vmem:[%s8172_s0 + $0x70] sm:$0xff] }
0x1c63   :  { %v7828_v51 = vadd.f32 %v3935_v8, %v3933_v35  ;;  %v5848_v8 = vpack.c.bf16 %v7858_v21, %v7853_v27 }
0x1c64   :  { %v3689_v16 = vpop.permute.xlu1 %3688 }
0x1c65   :  { %4396 = vrot.lane.b32.xlu0 %v7828_v51, %s6365_s25  ;;  %v3694_v34 = vadd.f32 %v3689_v16, %v7810_v48  ;;  %v7908_v16 = vld [vmem:[%s8177_s5 + $0x80] sm:$0xf] }
0x1c67   :  { %v5390_v42 = vmul.f32 -1.442695, %v3694_v34 }
0x1c69   :  { %3730 = vrot.lane.b32.xlu0 %v3678_v0, %s6363_s4  ;;  %6185 = vpow2.f32 %v5390_v42 }
0x1c73   :  { %v6186_v20 = vpop.eup %6185 }
0x1c74   :  { %v4130_v23 = vpop.permute.xlu0 %4129  ;;  %v3702_v25 = vadd.f32 1.0, %v6186_v20 }
0x1c75   :  { %v4132_v40 = vmul.f32 %v4130_v23, %v4127_v37 }
0x1c76   :  { %6187 = vrcp.f32 %v3702_v25 }
0x1c77   :  { %v7836_v38 = vadd.f32 %v4133_v32, %v4132_v40 }
0x1c78   :  { %v3930_v26 = vpop.permute.xlu0 %3929 }
0x1c79   :  { %v3934_v2 = vmul.f32 %v3930_v26, %v3924_v36  ;;  %4136 = vrot.lane.b32.xlu1 %v7836_v38, %s6365_s25  ;;  %v4571_v36 = vld [vmem:[#allocation2 + $0x38] sm:$0xff] }
0x1c7b   :  { %v7841_v43 = vadd.f32 %v3936_v3, %v3934_v2  ;;  %v7901_v3 = vld [vmem:[%s8177_s5 + $0x88] sm:$0xf] }
0x1c7c   :  { %v3691_v4 = vpop.permute.xlu0 %3690 }
0x1c7d   :  { %4398 = vrot.lane.b32.xlu1 %v7841_v43, %s6365_s25  ;;  %v3695_v59 = vadd.f32 %v3691_v4, %v7820_v29 }
0x1c7f   :  { %v5391_v47 = vmul.f32 -1.442695, %v3695_v59 }
0x1c80   :  { %v6188_v46 = vpop.eup %6187 }
0x1c81   :  { %3732 = vrot.lane.b32.xlu1 %v3684_v62, %s6363_s4  ;;  %6189 = vpow2.f32 %v5391_v47 }
0x1c8b   :  { %v6190_v37 = vpop.eup %6189 }
0x1c8c   :  { %v3703_v24 = vadd.f32 1.0, %v6190_v37 }
0x1c8e   :  { %6191 = vrcp.f32 %v3703_v24 }
0x1c98   :  { %v6192_v26 = vpop.eup %6191 }
0x1cd7   :  { %v4397_v35 = vpop.permute.xlu0 %4396 }
0x1cd8   :  { %v4402_v14 = vsel %vm230_vm3, %v7647_v44, %v4397_v35 }
0x1cd9   :  { %5424 = vmatmul.mubr.msk.f32.vlgmr.msra.gmra.mrb[44].mxu1 %vm232_vm4, %v4402_v14 }
0x1cda   :  { %4480 = vmatprep.mubr.f32.mxu1 %v6360_v1  ;;  %5849 = vmatpush3.bf16.msra.mxu1 %v5848_v8 }
0x1cdb   :  { %v3731_v19 = vpop.permute.xlu0 %3730 }
0x1cdc   :  { %v3736_v10 = vmul.f32 %v6188_v46, %v3731_v19 }
0x1cde   :  { %3740 = vrot.lane.b32.xlu0 %v3736_v10, %s6364_s11 }
0x1ce2   :  { %3710 = vrot.lane.b32.xlu0 %v3678_v0, %s6362_s28  ;;  %v5404_v0 = vld [vmem:[%s8174_s2 + $0x60] sm:$0xff] }
0x1ce3   :  { %5587 = vmatprep.mubr.msk.f32.mxu0 %vm362_vm5, %v5404_v0 }
0x1ceb   :  { %v7868_v23 = vpop.permute.xlu1 %4136 }
0x1cec   :  { %v4139_v44 = vsel %vm230_vm3, %v7709_v7, %v7868_v23  ;;  %v5405_v7 = vld [vmem:[%s8174_s2 + $0x68] sm:$0xff] }
0x1ced   :  { %5585 = vmatprep.subr.mxu0 %v4139_v44 }
0x1cee   :  { %5586 = vmatpush3.msra.mxu0 %v4139_v44 }
0x1cef   :  { %v4399_v40 = vpop.permute.xlu1 %4398  ;;  %5824 = vmatprep.subr.bf16.mxu0 %v6687_v50  ;;  %5588 = vmatmul.mubr.msk.f32.vlgmr.msra.gmra.mrb[44].mxu0 %vm362_vm5, %v5405_v7 }
0x1cf0   :  { %v4403_v32 = vsel %vm230_vm3, %v7652_v63, %v4399_v40  ;;  %5826 = vmatpush1.bf16.msra.mxu0 %v6694_v55  ;;  %4301 = vmatprep.mubr.f32.mxu0 %v6360_v1 }
0x1cf1   :  { %5425 = vmatmul.mubr.msk.f32.gmra.mrb[46].mxu1 %vm232_vm4, %v4403_v32  ;;  %5828 = vmatprep.subr.bf16.mxu0 %v6696_v56 }
0x1cf2   :  { %5594 = vmatprep.mubr.msk.f32.mxu1 %vm6359_vm0, %v6360_v1 }
0x1cf3   :  { %v3733_v2 = vpop.permute.xlu1 %3732 }
0x1cf4   :  { %v3737_v63 = vmul.f32 %v6192_v26, %v3733_v2  ;;  %5830 = vmatpush1.bf16.msra.mxu0 %v6713_v5 }
0x1cf5   :  { %5595 = vmatmul.mubr.msk.f32.vlgmr.msra.gmra.mrb[48].mxu1 %vm153_vm1, %v4571_v36  ;;  %5832 = vmatprep.subr.bf16.mxu0 %v6717_v6 }
0x1cf6   :  { %3742 = vrot.lane.b32.xlu1 %v3737_v63, %s6364_s11 }
0x1cf8   :  { %5834 = vmatpush1.bf16.msra.mxu0 %v6732_v11 }
0x1cf9   :  { %5836 = vmatprep.subr.bf16.mxu0 %v6735_v12 }
0x1cfa   :  { %3712 = vrot.lane.b32.xlu1 %v3684_v62, %s6362_s28 }
0x1cfc   :  { %5838 = vmatpush1.bf16.msra.mxu0 %v6744_v15 }
0x1cfd   :  { %5414 = vmatprep.subr.msk.mxu0 %vm236_vm2, %v7901_v3 }
0x1d00   :  { %5415 = vmatpush1.msk.msra.mxu0 %vm236_vm2, %v7908_v16 }
0x1d01   :  { %5851 = vmatprep.subr.bf16.mxu0 %v6474_v9 }
0x1d50   :  { %v3741_v62 = vpop.permute.xlu0 %3740 }
0x1d51   :  { %v3746_v34 = vadd.f32 %v3741_v62, %v7810_v48 }
0x1d53   :  { %6193 = vtanh.f32 %v3746_v34 }
0x1d54   :  { %v3711_v59 = vpop.permute.xlu0 %3710 }
0x1d55   :  { %v3716_v47 = vadd.f32 %v3711_v59, %v7810_v48 }
0x1d57   :  { %v5392_v9 = vmul.f32 -1.442695, %v3716_v47 }
0x1d5d   :  { %v6194_v42 = vpop.eup %6193 }
0x1d5e   :  { %3754 = vrot.lane.b32.xlu0 %v6194_v42, %s6363_s4 }
0x1d68   :  { %v3743_v20 = vpop.permute.xlu1 %3742 }
0x1d69   :  { %v3747_v25 = vadd.f32 %v3743_v20, %v7820_v29 }
0x1d6b   :  { %6195 = vtanh.f32 %v3747_v25 }
0x1d6c   :  { %6197 = vpow2.f32 %v5392_v9  ;;  %v3713_v19 = vpop.permute.xlu1 %3712 }
0x1d6d   :  { %v3717_v10 = vadd.f32 %v3713_v19, %v7820_v29 }
0x1d6f   :  { %v5393_v24 = vmul.f32 -1.442695, %v3717_v10 }
0x1d75   :  { %v6196_v4 = vpop.eup %6195 }
0x1d76   :  { %3756 = vrot.lane.b32.xlu1 %v6196_v4, %s6363_s4  ;;  %v6198_v14 = vpop.eup %6197 }
0x1d77   :  { %v3724_v46 = vadd.f32 1.0, %v6198_v14 }
0x1d79   :  { %6199 = vrcp.f32 %v3724_v46 }
0x1d7a   :  { %6201 = vpow2.f32 %v5393_v24 }
0x1d83   :  { %v6200_v36 = vpop.eup %6199 }
0x1d84   :  { %v3750_v7 = vsub.f32 1.0, %v6200_v36  ;;  %v3762_v2 = vmul.f32 %v6200_v36, %v7712_v60  ;;  %v6202_v62 = vpop.eup %6201 }
0x1d85   :  { %v3725_v34 = vadd.f32 1.0, %v6202_v62 }
0x1d87   :  { %6203 = vrcp.f32 %v3725_v34 }
0x1d91   :  { %v6204_v42 = vpop.eup %6203 }
0x1d92   :  { %v3751_v20 = vsub.f32 1.0, %v6204_v42  ;;  %v3763_v4 = vmul.f32 %v6204_v42, %v7717_v57 }
0x1dac   :  { %v7918_v8 = vpop.f32.mrb[44].mxu1 }
0x1dad   :  { %v7920_v35 = vpop.f32.mrb[45].mxu1 }
0x1dc2   :  { %v5589_v40 = vpop.f32.mrb[44].mxu0 }
0x1dc3   :  { %v4212_v32 = vpop.f32.mrb[45].mxu0 }
0x1dc4   :  { %v7923_v37 = vpop.f32.mrb[46].mxu1 }
0x1dc5   :  { %v7925_v44 = vpop.f32.mrb[47].mxu1 }
0x1dc8   :  { %v7927_v48 = vpop.f32.mrb[48].mxu1 }
0x1dc9   :  { %v5596_v0 = vpop.f32.mrb[49].mxu1 }
0x1dd0   :  { %v3755_v26 = vpop.permute.xlu0 %3754 }
0x1dd1   :  { %v3760_v63 = vmul.f32 %v3755_v26, %v3750_v7  ;;  %v7984_v7 = vadd.f32 %v7918_v8, %v6653_v39  ;;  %v7990_v26 = vadd.f32 %v7923_v37, %v6653_v39 }
0x1dd3   :  { %v7930_v29 = vadd.f32 %v3762_v2, %v3760_v63 }
0x1dd5   :  { %4223 = vrot.lane.b32.xlu0 %v7930_v29, %s6361_s26 }
0x1de8   :  { %v3757_v25 = vpop.permute.xlu1 %3756 }
0x1de9   :  { %v3761_v59 = vmul.f32 %v3757_v25, %v3751_v20 }
0x1deb   :  { %v7935_v47 = vadd.f32 %v3763_v4, %v3761_v59 }
0x1ded   :  { %4225 = vrot.lane.b32.xlu1 %v7935_v47, %s6361_s26 }
0x1e47   :  { %v4224_v60 = vpop.permute.xlu0 %4223 }
0x1e48   :  { %v4229_v9 = vsel %vm232_vm4, %v4212_v32, %v4224_v60 }
0x1e49   :  { %5416 = vmatmul.mubr.msk.f32.vlgmr.msra.gmra.mrb[46].mxu0 %vm449_vm6, %v4229_v9 }
0x1e4a   :  { %5853 = vmatpush1.bf16.msra.mxu0 %v6485_v13  ;;  %4307 = vmatprep.mubr.f32.mxu0 %v6360_v1  ;;  %v4648_v13 = vsel %vm230_vm3, %v7927_v48, %v7868_v23 }
0x1e4b   :  { %5855 = vmatprep.subr.bf16.mxu0 %v6497_v17 }
0x1e4e   :  { %5857 = vmatpush1.bf16.msra.mxu0 %v6500_v18 }
0x1e4f   :  { %5435 = vmatprep.subr.msk.mxu0 %vm236_vm2, %v7735_v28 }
0x1e52   :  { %5436 = vmatpush1.msk.msra.mxu0 %vm236_vm2, %v7742_v22 }
0x1e53   :  { %5875 = vmatprep.subr.bf16.mxu0 %v6565_v49 }
0x1e5f   :  { %v4226_v57 = vpop.permute.xlu1 %4225 }
0x1e60   :  { %v4230_v14 = vsel %vm232_vm4, %v5589_v40, %v4226_v57 }
0x1e61   :  { %5417 = vmatmul.mubr.msk.f32.gmra.mrb[48].mxu0 %vm449_vm6, %v4230_v14 }
0x1e62   :  { %4716 = vmatprep.mubr.f32.mxu0 %v6360_v1 }
0x1e65   :  { %5437 = vmatmul.mubr.msk.f32.vlgmr.msra.gmra.mrb[50].mxu0 %vm232_vm4, %v4648_v13 }
0x1e66   :  { %5877 = vmatpush1.bf16.msra.mxu0 %v6576_v53  ;;  %5102 = vmatprep.mubr.f32.mxu0 %v6360_v1 }
0x1e67   :  { %5879 = vmatprep.subr.bf16.mxu0 %v6578_v54 }
0x1e6a   :  { %5881 = vmatpush1.bf16.msra.mxu0 %v6588_v58 }
0x1e6b   :  { %5450 = vmatprep.subr.msk.mxu0 %vm236_vm2, %v7761_v61 }
0x1e6e   :  { %5451 = vmatpush1.msk.msra.mxu0 %vm236_vm2, %v7768_v41 }
0x1f1c   :  { %v4303_v17 = vpop.f32.mrb[46].mxu0 }
0x1f1d   :  { %v4305_v18 = vpop.f32.mrb[47].mxu0  ;;  %v7971_v54 = vadd.f32 %v4303_v17, %v6838_v33 }
0x1f1e   :  { %v4306_v2 = vadd.f32 %v4305_v18, %v6864_v45 }
0x1f34   :  { %v4309_v49 = vpop.f32.mrb[48].mxu0 }
0x1f35   :  { %v4311_v28 = vpop.f32.mrb[49].mxu0  ;;  %v7976_v58 = vadd.f32 %v4309_v49, %v6838_v33 }
0x1f36   :  { %v4312_v63 = vadd.f32 %v4311_v28, %v6864_v45 }
0x1f38   :  { %v4718_v22 = vpop.f32.mrb[50].mxu0 }
0x1f39   :  { %v4719_v23 = vadd.f32 %v4718_v22, %v6533_v30  ;;  %v4720_v53 = vpop.f32.mrb[51].mxu0 }
0x1f3a   :  { %v4721_v46 = vadd.f32 %v4720_v53, %v6536_v31 }
0x1f3b   :  { %4724 = vrot.lane.b32.xlu0 %v4719_v23, %s6362_s28 }
0x1f3c   :  { %4745 = vrot.lane.b32.xlu1 %v4721_v46, %s6363_s4 }
0x1f40   :  { %4735 = vrot.lane.b32.xlu1 %v4721_v46, %s6362_s28 }
0x1f44   :  { %4316 = vrot.lane.b32.xlu1 %v7971_v54, %s6362_s28 }
0x1f48   :  { %4318 = vrot.lane.b32.xlu1 %v7976_v58, %s6362_s28 }
0x1fad   :  { %v4725_v30 = vpop.permute.xlu0 %4724 }
0x1fae   :  { %v4727_v31 = vadd.f32 %v4725_v30, %v4719_v23  ;;  %v4746_v24 = vpop.permute.xlu1 %4745  ;;  %v4479_v30 = vadd.f32 %v7920_v35, %v6802_v52  ;;  %v5432_v35 = vld [vmem:[%s8174_s2 + $0x70] sm:$0xff] }
0x1faf   :  { %5599 = vmatprep.mubr.msk.f32.mxu1 %vm362_vm5, %v5432_v35 }
0x1fb0   :  { %v5438_v61 = vmul.f32 -1.442695, %v4727_v31 }
0x1fb2   :  { %6205 = vpow2.f32 %v5438_v61  ;;  %v4736_v8 = vpop.permute.xlu1 %4735  ;;  %v4485_v61 = vadd.f32 %v7925_v44, %v6802_v52 }
0x1fb3   :  { %v4738_v62 = vadd.f32 %v4736_v8, %v4719_v23 }
0x1fb5   :  { %v5439_v34 = vmul.f32 -1.442695, %v4738_v62 }
0x1fb6   :  { %v4317_v42 = vpop.permute.xlu1 %4316 }
0x1fb7   :  { %v4322_v20 = vadd.f32 %v4317_v42, %v7971_v54 }
0x1fb9   :  { %v5418_v4 = vmul.f32 -1.442695, %v4322_v20  ;;  %v5433_v20 = vld [vmem:[%s8174_s2 + $0x78] sm:$0xff]  ;;  %s6367_s2 = smov [#allocation5]  }
0x1fba   :  { %v4319_v37 = vpop.permute.xlu1 %4318 }
0x1fbb   :  { %v4323_v59 = vadd.f32 %v4319_v37, %v7976_v58 }
0x1fbc   :  { %v6206_v41 = vpop.eup %6205 }
0x1fbd   :  { %v4731_v19 = vadd.f32 1.0, %v6206_v41  ;;  %v5419_v9 = vmul.f32 -1.442695, %v4323_v59 }
0x1fbf   :  { %6207 = vrcp.f32 %v4731_v19 }
0x1fc9   :  { %v6208_v10 = vpop.eup %6207 }
0x1fca   :  { %v4748_v40 = vmul.f32 %v6208_v10, %v4746_v24 }
0x1fcc   :  { %4750 = vrot.lane.b32.xlu0 %v4748_v40, %s6364_s11 }
0x203e   :  { %v4751_v32 = vpop.permute.xlu0 %4750 }
0x203f   :  { %v4753_v0 = vadd.f32 %v4751_v32, %v4719_v23 }
0x2041   :  { %6209 = vtanh.f32 %v4753_v0 }
0x2042   :  { %6211 = vpow2.f32 %v5439_v34 }
0x2043   :  { %6213 = vpow2.f32 %v5418_v4 }
0x204b   :  { %v6210_v36 = vpop.eup %6209 }
0x204c   :  { %4757 = vrot.lane.b32.xlu0 %v6210_v36, %s6363_s4  ;;  %v6212_v25 = vpop.eup %6211 }
0x204d   :  { %v4742_v60 = vadd.f32 1.0, %v6212_v25  ;;  %v6214_v57 = vpop.eup %6213 }
0x204e   :  { %v4330_v13 = vadd.f32 1.0, %v6214_v57 }
0x204f   :  { %6215 = vrcp.f32 %v4742_v60 }
0x2050   :  { %4489 = vrot.lane.b32.xlu0 %v7984_v7, %s6362_s28  ;;  %6217 = vpow2.f32 %v5419_v9 }
0x2051   :  { %6219 = vrcp.f32 %v4330_v13 }
0x2054   :  { %4491 = vrot.lane.b32.xlu0 %v7990_v26, %s6362_s28 }
0x2058   :  { %4358 = vrot.lane.b32.xlu0 %v4306_v2, %s6363_s4 }
0x2059   :  { %v6216_v14 = vpop.eup %6215 }
0x205a   :  { %v6218_v17 = vpop.eup %6217  ;;  %v4755_v18 = vsub.f32 1.0, %v6216_v14  ;;  %v4761_v22 = vmul.f32 %v6216_v14, %v7836_v38 }
0x205b   :  { %v4331_v23 = vadd.f32 1.0, %v6218_v17  ;;  %v6220_v41 = vpop.eup %6219 }
0x205c   :  { %4360 = vrot.lane.b32.xlu0 %v4312_v63, %s6363_s4 }
0x205d   :  { %6221 = vrcp.f32 %v4331_v23 }
0x2067   :  { %v6222_v38 = vpop.eup %6221 }
0x20be   :  { %v4758_v49 = vpop.permute.xlu0 %4757 }
0x20bf   :  { %v4760_v28 = vmul.f32 %v4758_v49, %v4755_v18 }
0x20c1   :  { %v4762_v53 = vadd.f32 %v4761_v22, %v4760_v28 }
0x20c2   :  { %v4490_v46 = vpop.permute.xlu0 %4489 }
0x20c3   :  { %4764 = vrot.lane.b32.xlu1 %v4762_v53, %s6365_s25  ;;  %v4495_v44 = vadd.f32 %v4490_v46, %v7984_v7 }
0x20c5   :  { %v5426_v32 = vmul.f32 -1.442695, %v4495_v44 }
0x20c6   :  { %v4492_v31 = vpop.permute.xlu0 %4491 }
0x20c7   :  { %4531 = vrot.lane.b32.xlu1 %v4479_v30, %s6363_s4  ;;  %v4496_v0 = vadd.f32 %v4492_v31, %v7990_v26  ;;  %6223 = vpow2.f32 %v5426_v32 }
0x20c9   :  { %v5427_v36 = vmul.f32 -1.442695, %v4496_v0 }
0x20ca   :  { %v4359_v19 = vpop.permute.xlu0 %4358 }
0x20cb   :  { %v4364_v10 = vmul.f32 %v6220_v41, %v4359_v19  ;;  %4533 = vrot.lane.b32.xlu1 %v4485_v61, %s6363_s4  ;;  %6225 = vpow2.f32 %v5427_v36 }
0x20cd   :  { %4368 = vrot.lane.b32.xlu0 %v4364_v10, %s6364_s11 }
0x20ce   :  { %v4361_v24 = vpop.permute.xlu0 %4360 }
0x20cf   :  { %v4365_v40 = vmul.f32 %v6222_v38, %v4361_v24 }
0x20d1   :  { %4370 = vrot.lane.b32.xlu0 %v4365_v40, %s6364_s11  ;;  %v6224_v8 = vpop.eup %6223 }
0x20d2   :  { %v4503_v62 = vadd.f32 1.0, %v6224_v8 }
0x20d4   :  { %6227 = vrcp.f32 %v4503_v62 }
0x20d5   :  { %4338 = vrot.lane.b32.xlu0 %v4306_v2, %s6362_s28  ;;  %v6226_v34 = vpop.eup %6225 }
0x20d6   :  { %v4504_v2 = vadd.f32 1.0, %v6226_v34 }
0x20d8   :  { %6229 = vrcp.f32 %v4504_v2 }
0x20d9   :  { %4340 = vrot.lane.b32.xlu0 %v4312_v63, %s6362_s28 }
0x20de   :  { %v6228_v37 = vpop.eup %6227 }
0x2135   :  { %v4765_v63 = vpop.permute.xlu1 %4764 }
0x2136   :  { %v4767_v42 = vsel %vm230_vm3, %v7927_v48, %v4765_v63  ;;  %v6230_v48 = vpop.eup %6229 }
0x2137   :  { %5597 = vmatprep.subr.mxu1 %v4767_v42 }
0x2138   :  { %5598 = vmatpush3.msra.mxu1 %v4767_v42 }
0x2139   :  { %v4532_v25 = vpop.permute.xlu1 %4531  ;;  %5600 = vmatmul.mubr.msk.f32.vlgmr.msra.gmra.mrb[50].mxu1 %vm362_vm5, %v5433_v20  ;;  %5859 = vmatprep.subr.bf16.mxu1 %v6687_v50 }
0x213a   :  { %v4537_v4 = vmul.f32 %v6228_v37, %v4532_v25  ;;  %5861 = vmatpush1.bf16.msra.mxu1 %v6694_v55  ;;  %4929 = vmatprep.mubr.f32.mxu1 %v6360_v1 }
0x213b   :  { %5863 = vmatprep.subr.bf16.mxu1 %v6696_v56 }
0x213c   :  { %4541 = vrot.lane.b32.xlu1 %v4537_v4, %s6364_s11 }
0x213d   :  { %v4534_v59 = vpop.permute.xlu1 %4533 }
0x213e   :  { %v4538_v60 = vmul.f32 %v6230_v48, %v4534_v59  ;;  %5865 = vmatpush1.bf16.msra.mxu1 %v6713_v5 }
0x213f   :  { %v4369_v9 = vpop.permute.xlu0 %4368  ;;  %5867 = vmatprep.subr.bf16.mxu1 %v6717_v6 }
0x2140   :  { %v4374_v57 = vadd.f32 %v4369_v9, %v7971_v54  ;;  %4543 = vrot.lane.b32.xlu1 %v4538_v60, %s6364_s11 }
0x2142   :  { %6231 = vtanh.f32 %v4374_v57  ;;  %5869 = vmatpush1.bf16.msra.mxu1 %v6732_v11 }
0x2143   :  { %v4371_v50 = vpop.permute.xlu0 %4370  ;;  %5871 = vmatprep.subr.bf16.mxu1 %v6735_v12 }
0x2144   :  { %v4375_v55 = vadd.f32 %v4371_v50, %v7976_v58  ;;  %4511 = vrot.lane.b32.xlu1 %v4479_v30, %s6362_s28 }
0x2146   :  { %6233 = vtanh.f32 %v4375_v55  ;;  %5873 = vmatpush1.bf16.msra.mxu1 %v6744_v15 }
0x2147   :  { %5442 = vmatprep.subr.msk.mxu1 %vm236_vm2, %v7901_v3  ;;  %v4339_v6 = vpop.permute.xlu0 %4338 }
0x2148   :  { %4513 = vrot.lane.b32.xlu1 %v4485_v61, %s6362_s28  ;;  %v4344_v11 = vadd.f32 %v4339_v6, %v7971_v54 }
0x214a   :  { %5443 = vmatpush1.msk.msra.mxu1 %vm236_vm2, %v7908_v16  ;;  %v5420_v14 = vmul.f32 -1.442695, %v4344_v11 }
0x214b   :  { %v4341_v12 = vpop.permute.xlu0 %4340 }
0x214c   :  { %v6232_v56 = vpop.eup %6231  ;;  %v4345_v15 = vadd.f32 %v4341_v12, %v7976_v58  ;;  %6235 = vpow2.f32 %v5420_v14 }
0x214d   :  { %4382 = vrot.lane.b32.xlu0 %v6232_v56, %s6363_s4 }
0x214e   :  { %v5421_v3 = vmul.f32 -1.442695, %v4345_v15 }
0x2150   :  { %v6234_v5 = vpop.eup %6233  ;;  %6237 = vpow2.f32 %v5421_v3 }
0x2151   :  { %4384 = vrot.lane.b32.xlu0 %v6234_v5, %s6363_s4 }
0x2156   :  { %v6236_v13 = vpop.eup %6235 }
0x2157   :  { %v4352_v17 = vadd.f32 1.0, %v6236_v13 }
0x2159   :  { %6239 = vrcp.f32 %v4352_v17 }
0x215a   :  { %v6238_v18 = vpop.eup %6237 }
0x215b   :  { %v4353_v28 = vadd.f32 1.0, %v6238_v18 }
0x2163   :  { %v6240_v54 = vpop.eup %6239 }
0x2164   :  { %v4378_v46 = vsub.f32 1.0, %v6240_v54  ;;  %v4390_v61 = vmul.f32 %v6240_v54, %v7930_v29 }
0x21ae   :  { %v4542_v16 = vpop.permute.xlu1 %4541 }
0x21af   :  { %v4547_v49 = vadd.f32 %v4542_v16, %v7984_v7 }
0x21b1   :  { %6241 = vtanh.f32 %v4547_v49 }
0x21b2   :  { %v4544_v22 = vpop.permute.xlu1 %4543  ;;  %6243 = vrcp.f32 %v4353_v28 }
0x21b3   :  { %v4548_v23 = vadd.f32 %v4544_v22, %v7990_v26 }
0x21b5   :  { %6245 = vtanh.f32 %v4548_v23 }
0x21b6   :  { %v4512_v44 = vpop.permute.xlu1 %4511 }
0x21b7   :  { %v4517_v29 = vadd.f32 %v4512_v44, %v7984_v7 }
0x21b9   :  { %v5428_v0 = vmul.f32 -1.442695, %v4517_v29 }
0x21ba   :  { %v4514_v32 = vpop.permute.xlu1 %4513 }
0x21bb   :  { %v6242_v53 = vpop.eup %6241  ;;  %v4518_v36 = vadd.f32 %v4514_v32, %v7990_v26  ;;  %6247 = vpow2.f32 %v5428_v0 }
0x21bc   :  { %4555 = vrot.lane.b32.xlu1 %v6242_v53, %s6363_s4  ;;  %v6244_v58 = vpop.eup %6243 }
0x21bd   :  { %v4379_v10 = vsub.f32 1.0, %v6244_v58  ;;  %v4391_v24 = vmul.f32 %v6244_v58, %v7935_v47  ;;  %v5429_v47 = vmul.f32 -1.442695, %v4518_v36 }
0x21bf   :  { %v6246_v30 = vpop.eup %6245  ;;  %v4383_v31 = vpop.permute.xlu0 %4382  ;;  %6249 = vpow2.f32 %v5429_v47 }
0x21c0   :  { %v4388_v41 = vmul.f32 %v4383_v31, %v4378_v46  ;;  %4557 = vrot.lane.b32.xlu1 %v6246_v30, %s6363_s4 }
0x21c2   :  { %v8052_v19 = vadd.f32 %v4390_v61, %v4388_v41 }
0x21c3   :  { %v4385_v38 = vpop.permute.xlu0 %4384 }
0x21c4   :  { %v4389_v40 = vmul.f32 %v4385_v38, %v4379_v10  ;;  %4851 = vrot.lane.b32.xlu0 %v8052_v19, %s6361_s26 }
0x21c5   :  { %v6248_v34 = vpop.eup %6247 }
0x21c6   :  { %v8057_v35 = vadd.f32 %v4391_v24, %v4389_v40  ;;  %v4525_v2 = vadd.f32 1.0, %v6248_v34 }
0x21c8   :  { %4853 = vrot.lane.b32.xlu0 %v8057_v35, %s6361_s26  ;;  %6251 = vrcp.f32 %v4525_v2 }
0x21c9   :  { %v6250_v63 = vpop.eup %6249 }
0x21ca   :  { %v4526_v42 = vadd.f32 1.0, %v6250_v63 }
0x21cc   :  { %6253 = vrcp.f32 %v4526_v42 }
0x21d2   :  { %v6252_v20 = vpop.eup %6251 }
0x21d3   :  { %v4551_v37 = vsub.f32 1.0, %v6252_v20  ;;  %v4563_v4 = vmul.f32 %v6252_v20, %v7828_v51 }
0x21d6   :  { %v6254_v7 = vpop.eup %6253 }
0x21d7   :  { %v4552_v59 = vsub.f32 1.0, %v6254_v7  ;;  %v4564_v9 = vmul.f32 %v6254_v7, %v7841_v43 }
0x220c   :  { %v8063_v8 = vpop.f32.mrb[50].mxu1 }
0x220d   :  { %v8065_v62 = vpop.f32.mrb[51].mxu1 }
0x222e   :  { %v4556_v25 = vpop.permute.xlu1 %4555 }
0x222f   :  { %v4561_v26 = vmul.f32 %v4556_v25, %v4551_v37 }
0x2231   :  { %v8068_v48 = vadd.f32 %v4563_v4, %v4561_v26 }
0x2232   :  { %v4558_v60 = vpop.permute.xlu1 %4557 }
0x2233   :  { %v4562_v57 = vmul.f32 %v4558_v60, %v4552_v59  ;;  %5024 = vrot.lane.b32.xlu1 %v8068_v48, %s6365_s25 }
0x2235   :  { %v8073_v50 = vadd.f32 %v4564_v9, %v4562_v57 }
0x2236   :  { %v4852_v55 = vpop.permute.xlu0 %4851 }
0x2237   :  { %v4857_v56 = vsel %vm232_vm4, %v8065_v62, %v4852_v55  ;;  %5026 = vrot.lane.b32.xlu1 %v8073_v50, %s6365_s25 }
0x2238   :  { %5444 = vmatmul.mubr.msk.f32.vlgmr.msra.gmra.mrb[52].mxu1 %vm449_vm6, %v4857_v56 }
0x2239   :  { %4935 = vmatprep.mubr.f32.mxu1 %v6360_v1 }
0x223a   :  { %v4854_v51 = vpop.permute.xlu0 %4853 }
0x223b   :  { %v4858_v43 = vsel %vm232_vm4, %v8063_v8, %v4854_v51 }
0x223c   :  { %5445 = vmatmul.mubr.msk.f32.gmra.mrb[54].mxu1 %vm449_vm6, %v4858_v43 }
0x22a5   :  { %v5025_v5 = vpop.permute.xlu1 %5024 }
0x22a6   :  { %v5030_v6 = vsel %vm230_vm3, %v7853_v27, %v5025_v5 }
0x22a7   :  { %5452 = vmatmul.mubr.msk.f32.vlgmr.msra.gmra.mrb[52].mxu0 %vm232_vm4, %v5030_v6 }
0x22a8   :  { %5108 = vmatprep.mubr.f32.mxu0 %v6360_v1 }
0x22a9   :  { %v5027_v11 = vpop.permute.xlu1 %5026 }
0x22aa   :  { %v5031_v12 = vsel %vm230_vm3, %v7858_v21, %v5027_v11 }
0x22ab   :  { %5453 = vmatmul.mubr.msk.f32.gmra.mrb[54].mxu0 %vm232_vm4, %v5031_v12 }
0x230b   :  { %v4931_v14 = vpop.f32.mrb[52].mxu1 }
0x230c   :  { %v8092_v15 = vadd.f32 %v4931_v14, %v6838_v33  ;;  %v4933_v3 = vpop.f32.mrb[53].mxu1 }
0x230d   :  { %v4934_v49 = vadd.f32 %v4933_v3, %v6864_v45 }
0x230e   :  { %4944 = vrot.lane.b32.xlu0 %v8092_v15, %s6362_s28 }
0x230f   :  { %v4937_v13 = vpop.f32.mrb[54].mxu1 }
0x2310   :  { %v8097_v27 = vadd.f32 %v4937_v13, %v6838_v33  ;;  %v4939_v17 = vpop.f32.mrb[55].mxu1 }
0x2311   :  { %v4940_v22 = vadd.f32 %v4939_v17, %v6864_v45 }
0x2312   :  { %4946 = vrot.lane.b32.xlu1 %v8097_v27, %s6362_s28 }
0x237a   :  { %v5104_v1 = vpop.f32.mrb[52].mxu0 }
0x237b   :  { %v8102_v21 = vadd.f32 %v5104_v1, %v6653_v39  ;;  %v5106_v18 = vpop.f32.mrb[53].mxu0 }
0x237c   :  { %v5107_v23 = vadd.f32 %v5106_v18, %v6802_v52 }
0x237d   :  { %5117 = vrot.lane.b32.xlu0 %v8102_v21, %s6362_s28 }
0x237e   :  { %v5110_v16 = vpop.f32.mrb[54].mxu0 }
0x237f   :  { %v8108_v28 = vadd.f32 %v5110_v16, %v6653_v39  ;;  %v5112_v33 = vpop.f32.mrb[55].mxu0 }
0x2380   :  { %v5113_v54 = vadd.f32 %v5112_v33, %v6802_v52  ;;  %v4945_v39 = vpop.permute.xlu0 %4944 }
0x2381   :  { %4986 = vrot.lane.b32.xlu0 %v4934_v49, %s6363_s4  ;;  %5119 = vrot.lane.b32.xlu1 %v8108_v28, %s6362_s28  ;;  %v4950_v53 = vadd.f32 %v4945_v39, %v8092_v15 }
0x2383   :  { %v5446_v46 = vmul.f32 -1.442695, %v4950_v53 }
0x2384   :  { %v4947_v58 = vpop.permute.xlu1 %4946 }
0x2385   :  { %5159 = vrot.lane.b32.xlu0 %v5107_v23, %s6363_s4  ;;  %4988 = vrot.lane.b32.xlu1 %v4940_v22, %s6363_s4  ;;  %v4951_v30 = vadd.f32 %v4947_v58, %v8097_v27  ;;  %6255 = vpow2.f32 %v5446_v46 }
0x2387   :  { %v5447_v31 = vmul.f32 -1.442695, %v4951_v30 }
0x2389   :  { %5161 = vrot.lane.b32.xlu1 %v5113_v54, %s6363_s4  ;;  %6257 = vpow2.f32 %v5447_v31 }
0x238f   :  { %v6256_v45 = vpop.eup %6255 }
0x2390   :  { %v4958_v61 = vadd.f32 1.0, %v6256_v45 }
0x2392   :  { %6259 = vrcp.f32 %v4958_v61 }
0x2393   :  { %v6258_v41 = vpop.eup %6257 }
0x2394   :  { %v4959_v10 = vadd.f32 1.0, %v6258_v41 }
0x2396   :  { %6261 = vrcp.f32 %v4959_v10 }
0x239c   :  { %v6260_v40 = vpop.eup %6259 }
0x23a0   :  { %v6262_v47 = vpop.eup %6261 }
0x23ef   :  { %v5118_v38 = vpop.permute.xlu0 %5117 }
0x23f0   :  { %v5123_v52 = vadd.f32 %v5118_v38, %v8102_v21 }
0x23f2   :  { %v5454_v24 = vmul.f32 -1.442695, %v5123_v52 }
0x23f3   :  { %v4987_v44 = vpop.permute.xlu0 %4986  ;;  %v5120_v29 = vpop.permute.xlu1 %5119 }
0x23f4   :  { %6263 = vpow2.f32 %v5454_v24  ;;  %v4992_v32 = vmul.f32 %v6260_v40, %v4987_v44  ;;  %v5124_v0 = vadd.f32 %v5120_v29, %v8108_v28 }
0x23f6   :  { %v5455_v36 = vmul.f32 -1.442695, %v5124_v0  ;;  %4996 = vrot.lane.b32.xlu0 %v4992_v32, %s6364_s11 }
0x23f7   :  { %v4989_v34 = vpop.permute.xlu1 %4988  ;;  %v5160_v25 = vpop.permute.xlu0 %5159 }
0x23f8   :  { %6265 = vpow2.f32 %v5455_v36  ;;  %v4993_v2 = vmul.f32 %v6262_v47, %v4989_v34 }
0x23fa   :  { %4998 = vrot.lane.b32.xlu1 %v4993_v2, %s6364_s11 }
0x23fb   :  { %v5162_v59 = vpop.permute.xlu1 %5161 }
0x23fe   :  { %v6264_v63 = vpop.eup %6263 }
0x23ff   :  { %v5131_v42 = vadd.f32 1.0, %v6264_v63 }
0x2401   :  { %6267 = vrcp.f32 %v5131_v42 }
0x2402   :  { %v6266_v20 = vpop.eup %6265 }
0x2403   :  { %v5132_v37 = vadd.f32 1.0, %v6266_v20 }
0x2405   :  { %6269 = vrcp.f32 %v5132_v37 }
0x240b   :  { %v6268_v7 = vpop.eup %6267 }
0x240c   :  { %v5165_v4 = vmul.f32 %v6268_v7, %v5160_v25 }
0x240e   :  { %5169 = vrot.lane.b32.xlu0 %v5165_v4, %s6364_s11 }
0x240f   :  { %v6270_v26 = vpop.eup %6269 }
0x2410   :  { %v5166_v60 = vmul.f32 %v6270_v26, %v5162_v59 }
0x2412   :  { %4966 = vrot.lane.b32.xlu0 %v4934_v49, %s6362_s28  ;;  %5171 = vrot.lane.b32.xlu1 %v5166_v60, %s6364_s11 }
0x2416   :  { %5139 = vrot.lane.b32.xlu0 %v5107_v23, %s6362_s28  ;;  %4968 = vrot.lane.b32.xlu1 %v4940_v22, %s6362_s28 }
0x241a   :  { %5141 = vrot.lane.b32.xlu1 %v5113_v54, %s6362_s28 }
0x2468   :  { %v4997_v9 = vpop.permute.xlu0 %4996 }
0x2469   :  { %v5002_v57 = vadd.f32 %v4997_v9, %v8092_v15 }
0x246b   :  { %6271 = vtanh.f32 %v5002_v57 }
0x246c   :  { %v4999_v55 = vpop.permute.xlu1 %4998 }
0x246d   :  { %v5003_v56 = vadd.f32 %v4999_v55, %v8097_v27 }
0x246f   :  { %6273 = vtanh.f32 %v5003_v56 }
0x2475   :  { %v6272_v51 = vpop.eup %6271 }
0x2476   :  { %5010 = vrot.lane.b32.xlu0 %v6272_v51, %s6363_s4 }
0x2479   :  { %v6274_v43 = vpop.eup %6273 }
0x247a   :  { %5012 = vrot.lane.b32.xlu1 %v6274_v43, %s6363_s4 }
0x2480   :  { %v5170_v5 = vpop.permute.xlu0 %5169 }
0x2481   :  { %v5175_v6 = vadd.f32 %v5170_v5, %v8102_v21 }
0x2483   :  { %6275 = vtanh.f32 %v5175_v6 }
0x2484   :  { %v5172_v11 = vpop.permute.xlu1 %5171  ;;  %v4967_v13 = vpop.permute.xlu0 %4966 }
0x2485   :  { %v5176_v12 = vadd.f32 %v5172_v11, %v8108_v28  ;;  %v4972_v17 = vadd.f32 %v4967_v13, %v8092_v15 }
0x2487   :  { %6277 = vtanh.f32 %v5176_v12  ;;  %v5448_v18 = vmul.f32 -1.442695, %v4972_v17 }
0x2488   :  { %v4969_v1 = vpop.permute.xlu1 %4968  ;;  %v5140_v23 = vpop.permute.xlu0 %5139 }
0x2489   :  { %v4973_v16 = vadd.f32 %v4969_v1, %v8097_v27  ;;  %6279 = vpow2.f32 %v5448_v18  ;;  %v5145_v39 = vadd.f32 %v5140_v23, %v8102_v21 }
0x248b   :  { %v5449_v49 = vmul.f32 -1.442695, %v4973_v16  ;;  %v5456_v46 = vmul.f32 -1.442695, %v5145_v39 }
0x248c   :  { %v5142_v58 = vpop.permute.xlu1 %5141 }
0x248d   :  { %v6276_v14 = vpop.eup %6275  ;;  %6281 = vpow2.f32 %v5449_v49  ;;  %v5146_v30 = vadd.f32 %v5142_v58, %v8108_v28 }
0x248e   :  { %5183 = vrot.lane.b32.xlu0 %v6276_v14, %s6363_s4 }
0x248f   :  { %v5457_v15 = vmul.f32 -1.442695, %v5146_v30 }
0x2491   :  { %v6278_v3 = vpop.eup %6277 }
0x2492   :  { %5185 = vrot.lane.b32.xlu1 %v6278_v3, %s6363_s4 }
0x2493   :  { %v6280_v33 = vpop.eup %6279 }
0x2494   :  { %v4980_v22 = vadd.f32 1.0, %v6280_v33 }
0x2496   :  { %6283 = vrcp.f32 %v4980_v22 }
0x2497   :  { %v6282_v54 = vpop.eup %6281 }
0x2498   :  { %v4981_v53 = vadd.f32 1.0, %v6282_v54 }
0x249a   :  { %6285 = vrcp.f32 %v4981_v53 }
0x249b   :  { %6287 = vpow2.f32 %v5456_v46 }
0x249c   :  { %6289 = vpow2.f32 %v5457_v15 }
0x24a0   :  { %v6284_v31 = vpop.eup %6283 }
0x24a1   :  { %v5006_v27 = vsub.f32 1.0, %v6284_v31  ;;  %v5018_v41 = vmul.f32 %v6284_v31, %v8052_v19 }
0x24a4   :  { %v6286_v45 = vpop.eup %6285 }
0x24a5   :  { %v6288_v38 = vpop.eup %6287  ;;  %v5007_v21 = vsub.f32 1.0, %v6286_v45  ;;  %v5019_v40 = vmul.f32 %v6286_v45, %v8057_v35 }
0x24a6   :  { %v5153_v28 = vadd.f32 1.0, %v6288_v38  ;;  %v6290_v29 = vpop.eup %6289 }
0x24a7   :  { %v5154_v0 = vadd.f32 1.0, %v6290_v29 }
0x24a8   :  { %6291 = vrcp.f32 %v5153_v28 }
0x24a9   :  { %6293 = vrcp.f32 %v5154_v0 }
0x24b2   :  { %v6292_v36 = vpop.eup %6291 }
0x24b3   :  { %v5179_v19 = vsub.f32 1.0, %v6292_v36  ;;  %v6294_v47 = vpop.eup %6293  ;;  %v5191_v2 = vmul.f32 %v6292_v36, %v8068_v48 }
0x24b4   :  { %v5180_v35 = vsub.f32 1.0, %v6294_v47  ;;  %v5192_v37 = vmul.f32 %v6294_v47, %v8073_v50 }
0x24e8   :  { %v5011_v61 = vpop.permute.xlu0 %5010 }
0x24e9   :  { %v5016_v10 = vmul.f32 %v5011_v61, %v5006_v27 }
0x24eb   :  { %v5020_v52 = vadd.f32 %v5018_v41, %v5016_v10 }
0x24ec   :  { %v5013_v24 = vpop.permute.xlu1 %5012 }
0x24ed   :  { %v5017_v44 = vmul.f32 %v5013_v24, %v5007_v21  ;;  %5197 = vrot.lane.b32.xlu0 %v5020_v52, %s6361_s26 }
0x24ef   :  { %v5021_v32 = vadd.f32 %v5019_v40, %v5017_v44 }
0x24f1   :  { %5199 = vrot.lane.b32.xlu1 %v5021_v32, %s6361_s26  ;;  %s5223_s26 = sshll.u32 %s6367_s2, 4  ;;  %s5224_s26 = int_to_ptr.vmem [resolvable:$true] %s5223_s26 }
0x24f2   :  { %s6329_s28 = scalar_lea.vmem %s5224_s26, 256  ;;  %p6334_p9 = scmp.lt.s32.totalorder %s5224_s26, %s5224_s26 }
0x24f3   :  { %p6330_p8 = scmp.ne.s32.totalorder %s5224_s26, %s6329_s28  ;;  %p6335_p10 = scmp.lt.s32.totalorder %s6329_s28, %s6329_s28 }
0x24f5   :  { %p6336_p11 = por %p6335_p10, %p6334_p9 }
0x24f7   :  { %p6337_p12 = pnand %p6336_p11, %p6330_p8 }
0x2500   :  { %v5184_v34 = vpop.permute.xlu0 %5183 }
0x2501   :  { %v5189_v63 = vmul.f32 %v5184_v34, %v5179_v19 }
0x2503   :  { %v5193_v42 = vadd.f32 %v5191_v2, %v5189_v63 }
0x2504   :  { %v5186_v20 = vpop.permute.xlu1 %5185 }
0x2505   :  { %v5190_v7 = vmul.f32 %v5186_v20, %v5180_v35  ;;  %5205 = vrot.lane.b32.xlu0 %v5193_v42, %s6366_s8 }
0x2507   :  { %v5194_v25 = vadd.f32 %v5192_v37, %v5190_v7 }
0x2509   :  { %5207 = vrot.lane.b32.xlu1 %v5194_v25, %s6366_s8 }
0x255f   :  { %v5198_v4 = vpop.permute.xlu0 %5197 }
0x2560   :  { %v5211_v26 = vsel %vm232_vm4, %v8065_v62, %v5198_v4 }
0x2563   :  { %v5200_v59 = vpop.permute.xlu1 %5199 }
0x2564   :  { %v5212_v50 = vsel %vm232_vm4, %v8063_v8, %v5200_v59 }
0x2577   :  { %v5206_v60 = vpop.permute.xlu0 %5205 }
0x2578   :  { %v5213_v48 = vsel %vm449_vm6, %v5211_v26, %v5206_v60 }
0x2579   :  { %5216 = vst.msk [vmem:[#allocation5] sm:$0xff] %vm5215_vm7, %v5213_v48 }
0x257b   :  { %v5208_v9 = vpop.permute.xlu1 %5207 }
0x257c   :  { %v5214_v57 = vsel %vm449_vm6, %v5212_v50, %v5208_v9 }
0x257d   :  { %5217 = vst.msk [vmem:[#allocation5 + $0x8] sm:$0xff] %vm5215_vm7, %v5214_v57 }
0x257e   :  { %6340 = shalt.err (!%p6337_p12)
}
0x257f   :  { %s6341_s25 = scalar_lea.hbm %s8184_s12, 256 }
0x2580   :  { %p6342_p13 = scmp.ne.s32.totalorder %s8184_s12, %s6341_s25  ;;  %p6345_p0 = scmp.lt.u32.totalorder %s6341_s25, %s8184_s12 }
0x2582   :  { %p6347_p1 = pnand %p6345_p0, %p6342_p13 }
0x2584   :  { %6350 = shalt.err (!%p6347_p1)
}
0x2585   :  { %5229 = dma.vmem_to_hbm [thread:$0]  %s5224_s26, 256, %s8184_s12, [#allocation4], %s6356_s13, %s6356_s13, %s6357_s14  }
0x2586   :  { %6353 = dma.done.wait [#allocation4], 256  }
0x2587   :  { %6354 = vsyncadd [#allocation4], 4294967040 }
0x2588   :  { %5233 = vsyncpa [#allocation3], 1 }
0x2589   :  { %5234 = vsyncpa [#allocation4], 1 }

</bundles_post_ra>
